<compile_context>
chip_gen: v7x
topology: tpu7x:2x2x1
jax: 0.10.0
libtpu: 0.0.40
codegen_flags: <defaults>
</compile_context>

<pallas_src>
import functools

import jax
import jax.numpy as jnp
from jax.experimental import pallas as pl
from jax.experimental.pallas import tpu as pltpu


def _conv3x3_block(y, w_ref, b_ref, *, pool):
    """3x3 conv (padding=1, single im2col matmul) -> optional 2x2/2 maxpool -> ReLU.

    y:      (Nb, Hi, Wi, Ci) f32 value (lives in VMEM)
    w_ref:  (9*Ci, Co)       flattened HWIO conv weights
    b_ref:  (1, Co)          conv bias
    """
    nb, hi, wi, ci = y.shape
    co = w_ref.shape[-1]

    # In-kernel zero padding (padding=1) via concatenation — no HBM round-trip.
    zrow = jnp.zeros((nb, 1, wi, ci), jnp.float32)
    yp = jnp.concatenate([zrow, y, zrow], axis=1)              # (nb, hi+2, wi,   ci)
    zcol = jnp.zeros((nb, hi + 2, 1, ci), jnp.float32)
    yp = jnp.concatenate([zcol, yp, zcol], axis=2)             # (nb, hi+2, wi+2, ci)

    # im2col: 9 shifted windows concatenated along channels -> one (M, 9*Ci)x(9*Ci, Co)
    # MXU matmul. Ordering (dy, dx, ci) matches weights flattened over (ky, kx, cin).
    cols = [yp[:, dy:dy + hi, dx:dx + wi, :]
            for dy in range(3) for dx in range(3)]
    patches = jnp.concatenate(cols, axis=-1).reshape(nb * hi * wi, 9 * ci)

    acc = jnp.dot(patches, w_ref[...], preferred_element_type=jnp.float32)
    acc = acc + b_ref[...]                                     # bias broadcast
    z = acc.reshape(nb, hi, wi, co)

    if pool:                                                   # 2x2 max-pool, stride 2
        z = z.reshape(nb, hi // 2, 2, wi // 2, 2, co)
        z = jnp.maximum(jnp.maximum(z[:, :, 0, :, 0, :], z[:, :, 0, :, 1, :]),
                        jnp.maximum(z[:, :, 1, :, 0, :], z[:, :, 1, :, 1, :]))
    return jnp.maximum(z, 0.0)                                 # ReLU


def _dann_kernel(x_ref, w1, b1, w2, b2, w3, b3, w4, b4, o_ref):
    """Fused conv1..conv4 for one batch tile; all intermediates stay in VMEM."""
    nb, H, W, _ = x_ref.shape
    h = _conv3x3_block(x_ref[...].astype(jnp.float32), w1, b1, pool=True)   # (nb, H/2, W/2, 32)
    h = _conv3x3_block(h, w2, b2, pool=True)   # (nb, H/4, W/4, 64)  (+Dropout: identity in eval)
    h = _conv3x3_block(h, w3, b3, pool=True)   # (nb, H/8, W/8, 64)  (+Dropout: identity in eval)
    h = _conv3x3_block(h, w4, b4, pool=False)  # (nb, H/8, W/8, 64)
    ho, wo = H // 8, W // 8
    # Lane-dense store: last dim = wo*64 (a multiple of 128 for the 16x16 input).
    o_ref[...] = h.reshape(nb, ho, wo * 64).astype(o_ref.dtype)


def _pick_batch_block(n):
    """Largest divisor of n (<= 8) that still leaves >= 2 grid steps (v7x dual-TC)."""
    if n <= 1:
        return 1
    best = 1
    for nb in range(1, min(n, 8) + 1):
        if n % nb == 0 and n // nb >= 2:
            best = nb
    return best


@functools.partial(jax.jit, static_argnames=("batch_block",))
def dann_encoder(img_nchw, params, batch_block=None):
    """img_nchw: (N, 3, H, W) float32 (PyTorch NCHW). Returns (N, 64, H/8, W/8)."""
    x = jnp.transpose(img_nchw, (0, 2, 3, 1)).astype(jnp.float32)   # NCHW -> NHWC
    N, H, W, Cin = x.shape
    assert Cin == 3 and H % 8 == 0 and W % 8 == 0, (N, H, W, Cin)
    nb = _pick_batch_block(N) if batch_block is None else batch_block
    assert N % nb == 0, (N, nb)
    Ho, Wo = H // 8, W // 8
    (w1, b1), (w2, b2), (w3, b3), (w4, b4) = params

    def _wspec(shape):
        return pl.BlockSpec(shape, lambda n: (0, 0))   # whole weight, fetched once

    out = pl.pallas_call(
        _dann_kernel,
        out_shape=jax.ShapeDtypeStruct((N, Ho, Wo * 64), jnp.float32),
        grid=(N // nb,),
        in_specs=[
            pl.BlockSpec((nb, H, W, 3), lambda n: (n, 0, 0, 0)),
            _wspec(w1.shape), _wspec(b1.shape),
            _wspec(w2.shape), _wspec(b2.shape),
            _wspec(w3.shape), _wspec(b3.shape),
            _wspec(w4.shape), _wspec(b4.shape),
        ],
        out_specs=pl.BlockSpec((nb, Ho, Wo * 64), lambda n: (n, 0, 0)),
        compiler_params=pltpu.CompilerParams(
            dimension_semantics=("parallel",)),
    )(x, w1, b1, w2, b2, w3, b3, w4, b4)

    out = out.reshape(N, Ho, Wo, 64)
    return jnp.transpose(out, (0, 3, 1, 2))             # NHWC -> NCHW


def init_params(key):
    """Deterministic parameters; shapes mirror the PyTorch module's conv layers."""
    specs = [(3, 32), (32, 64), (64, 64), (64, 64)]
    params = []
    for i, (cin, cout) in enumerate(specs):
        kw, kb = jax.random.split(jax.random.fold_in(key, i))
        bound = 1.0 / (cin * 9) ** 0.5                   # PyTorch default conv init bound
        w = jax.random.uniform(kw, (3, 3, cin, cout), jnp.float32, -bound, bound)
        b = jax.random.uniform(kb, (cout,), jnp.float32, -bound, bound)
        params.append((w.reshape(9 * cin, cout), b.reshape(1, cout)))
    return params


def _ref_block(x, w_hwio, b, pool):
    """Plain-JAX reference for correctness checking (NHWC)."""
    y = jax.lax.conv_general_dilated(
        x, w_hwio, window_strides=(1, 1), padding=((1, 1), (1, 1)),
        dimension_numbers=("NHWC", "HWIO", "NHWC"))
    y = y + b
    if pool:
        N, H, W, C = y.shape
        y = y.reshape(N, H // 2, 2, W // 2, 2, C).max(axis=(2, 4))
    return jnp.maximum(y, 0.0)


if __name__ == "__main__":
    key = jax.random.PRNGKey(0)
    params = init_params(key)
    img = jax.random.normal(jax.random.fold_in(key, 100), (2, 3, 16, 16), jnp.float32)

    out = dann_encoder(img, params)
    out = jax.block_until_ready(out)
    assert out.shape == (2, 64, 2, 2), out.shape

    # Cross-check against a plain-JAX (XLA conv) reference.
    x = jnp.transpose(img, (0, 2, 3, 1))
    for i, (w2d, b) in enumerate(params):
        cin, cout = w2d.shape[0] // 9, w2d.shape[1]
        x = _ref_block(x, w2d.reshape(3, 3, cin, cout), b.reshape(cout,), pool=(i < 3))
    ref = jnp.transpose(x, (0, 3, 1, 2))
    max_err = float(jnp.max(jnp.abs(out - ref)))
    assert jnp.allclose(out, ref, atol=1e-3, rtol=1e-3), max_err

    print("KERNEL_OK")
</pallas_src>

<mosaic_0001>
module attributes {stable_mosaic.version = 11 : i64} {
  func.func @_dann_kernel(%arg0: i32, %arg1: memref<1x16x16x3xf32, #tpu.memory_space<vmem>>, %arg2: memref<27x32xf32, #tpu.memory_space<vmem>>, %arg3: memref<1x32xf32, #tpu.memory_space<vmem>>, %arg4: memref<288x64xf32, #tpu.memory_space<vmem>>, %arg5: memref<1x64xf32, #tpu.memory_space<vmem>>, %arg6: memref<576x64xf32, #tpu.memory_space<vmem>>, %arg7: memref<1x64xf32, #tpu.memory_space<vmem>>, %arg8: memref<576x64xf32, #tpu.memory_space<vmem>>, %arg9: memref<1x64xf32, #tpu.memory_space<vmem>>, %arg10: memref<1x2x128xf32, #tpu.memory_space<vmem>>) attributes {dimension_semantics = [#tpu.dimension_semantics<parallel>], iteration_bounds = array<i64: 2>, scalar_prefetch = 0 : i64, scratch_operands = 0 : i64, tpu.core_type = #tpu.core_type<tc>, window_params = [{transform_indices = @transform_0, window_bounds = array<i64: 1, 16, 16, 3>}, {pipeline_mode = #tpu.pipeline_mode<synchronous>, transform_indices = @transform_1, window_bounds = array<i64: 27, 32>}, {pipeline_mode = #tpu.pipeline_mode<synchronous>, transform_indices = @transform_2, window_bounds = array<i64: 1, 32>}, {pipeline_mode = #tpu.pipeline_mode<synchronous>, transform_indices = @transform_3, window_bounds = array<i64: 288, 64>}, {pipeline_mode = #tpu.pipeline_mode<synchronous>, transform_indices = @transform_4, window_bounds = array<i64: 1, 64>}, {pipeline_mode = #tpu.pipeline_mode<synchronous>, transform_indices = @transform_5, window_bounds = array<i64: 576, 64>}, {pipeline_mode = #tpu.pipeline_mode<synchronous>, transform_indices = @transform_6, window_bounds = array<i64: 1, 64>}, {pipeline_mode = #tpu.pipeline_mode<synchronous>, transform_indices = @transform_7, window_bounds = array<i64: 576, 64>}, {pipeline_mode = #tpu.pipeline_mode<synchronous>, transform_indices = @transform_8, window_bounds = array<i64: 1, 64>}, {transform_indices = @transform_9, window_bounds = array<i64: 1, 2, 128>}]} {
    %c0 = arith.constant 0 : index
    %c0_0 = arith.constant 0 : index
    %c0_1 = arith.constant 0 : index
    %c0_2 = arith.constant 0 : index
    %0 = vector.load %arg1[%c0, %c0_0, %c0_1, %c0_2] : memref<1x16x16x3xf32, #tpu.memory_space<vmem>>, vector<1x16x16x3xf32>
    %cst = arith.constant 0.000000e+00 : f32
    %1 = vector.broadcast %cst : f32 to vector<1x1x16x3xf32>
    %2 = tpu.concatenate %1, %0, %1 in 1 : vector<1x1x16x3xf32>, vector<1x16x16x3xf32>, vector<1x1x16x3xf32> -> vector<1x18x16x3xf32>
    %cst_3 = arith.constant 0.000000e+00 : f32
    %3 = vector.broadcast %cst_3 : f32 to vector<1x18x1x3xf32>
    %4 = tpu.concatenate %3, %2, %3 in 2 : vector<1x18x1x3xf32>, vector<1x18x16x3xf32>, vector<1x18x1x3xf32> -> vector<1x18x18x3xf32>
    %5 = vector.extract_strided_slice %4 {offsets = [0, 0, 0, 0], sizes = [1, 16, 16, 3], strides = [1, 1, 1, 1]} : vector<1x18x18x3xf32> to vector<1x16x16x3xf32>
    %6 = vector.extract_strided_slice %4 {offsets = [0, 0, 1, 0], sizes = [1, 16, 16, 3], strides = [1, 1, 1, 1]} : vector<1x18x18x3xf32> to vector<1x16x16x3xf32>
    %7 = vector.extract_strided_slice %4 {offsets = [0, 0, 2, 0], sizes = [1, 16, 16, 3], strides = [1, 1, 1, 1]} : vector<1x18x18x3xf32> to vector<1x16x16x3xf32>
    %8 = vector.extract_strided_slice %4 {offsets = [0, 1, 0, 0], sizes = [1, 16, 16, 3], strides = [1, 1, 1, 1]} : vector<1x18x18x3xf32> to vector<1x16x16x3xf32>
    %9 = vector.extract_strided_slice %4 {offsets = [0, 1, 1, 0], sizes = [1, 16, 16, 3], strides = [1, 1, 1, 1]} : vector<1x18x18x3xf32> to vector<1x16x16x3xf32>
    %10 = vector.extract_strided_slice %4 {offsets = [0, 1, 2, 0], sizes = [1, 16, 16, 3], strides = [1, 1, 1, 1]} : vector<1x18x18x3xf32> to vector<1x16x16x3xf32>
    %11 = vector.extract_strided_slice %4 {offsets = [0, 2, 0, 0], sizes = [1, 16, 16, 3], strides = [1, 1, 1, 1]} : vector<1x18x18x3xf32> to vector<1x16x16x3xf32>
    %12 = vector.extract_strided_slice %4 {offsets = [0, 2, 1, 0], sizes = [1, 16, 16, 3], strides = [1, 1, 1, 1]} : vector<1x18x18x3xf32> to vector<1x16x16x3xf32>
    %13 = vector.extract_strided_slice %4 {offsets = [0, 2, 2, 0], sizes = [1, 16, 16, 3], strides = [1, 1, 1, 1]} : vector<1x18x18x3xf32> to vector<1x16x16x3xf32>
    %14 = tpu.concatenate %5, %6, %7, %8, %9, %10, %11, %12, %13 in 3 : vector<1x16x16x3xf32>, vector<1x16x16x3xf32>, vector<1x16x16x3xf32>, vector<1x16x16x3xf32>, vector<1x16x16x3xf32>, vector<1x16x16x3xf32>, vector<1x16x16x3xf32>, vector<1x16x16x3xf32>, vector<1x16x16x3xf32> -> vector<1x16x16x27xf32>
    %15 = vector.shape_cast %14 : vector<1x16x16x27xf32> to vector<256x27xf32>
    %c0_4 = arith.constant 0 : index
    %c0_5 = arith.constant 0 : index
    %16 = vector.load %arg2[%c0_4, %c0_5] : memref<27x32xf32, #tpu.memory_space<vmem>>, vector<27x32xf32>
    %cst_6 = arith.constant dense<0.000000e+00> : vector<256x32xf32>
    %17 = tpu.matmul %15, %16, %cst_6 {dimension_numbers = #tpu.dot_dimension_numbers<[1], [0], [0], [1], [0, 0, 1, 1], [], []>} : vector<256x27xf32>, vector<27x32xf32>, vector<256x32xf32> -> vector<256x32xf32>
    %c0_7 = arith.constant 0 : index
    %c0_8 = arith.constant 0 : index
    %18 = vector.load %arg3[%c0_7, %c0_8] : memref<1x32xf32, #tpu.memory_space<vmem>>, vector<1x32xf32>
    %19 = vector.broadcast %18 : vector<1x32xf32> to vector<256x32xf32>
    %20 = arith.addf %17, %19 : vector<256x32xf32>
    %21 = vector.shape_cast %20 : vector<256x32xf32> to vector<1x16x16x32xf32>
    %22 = vector.shape_cast %21 : vector<1x16x16x32xf32> to vector<1x8x2x8x2x32xf32>
    %23 = vector.extract_strided_slice %22 {offsets = [0, 0, 0, 0, 0, 0], sizes = [1, 8, 1, 8, 1, 32], strides = [1, 1, 1, 1, 1, 1]} : vector<1x8x2x8x2x32xf32> to vector<1x8x1x8x1x32xf32>
    %24 = vector.shape_cast %23 : vector<1x8x1x8x1x32xf32> to vector<1x8x8x32xf32>
    %25 = vector.extract_strided_slice %22 {offsets = [0, 0, 0, 0, 1, 0], sizes = [1, 8, 1, 8, 1, 32], strides = [1, 1, 1, 1, 1, 1]} : vector<1x8x2x8x2x32xf32> to vector<1x8x1x8x1x32xf32>
    %26 = vector.shape_cast %25 : vector<1x8x1x8x1x32xf32> to vector<1x8x8x32xf32>
    %27 = arith.maximumf %24, %26 : vector<1x8x8x32xf32>
    %28 = vector.extract_strided_slice %22 {offsets = [0, 0, 1, 0, 0, 0], sizes = [1, 8, 1, 8, 1, 32], strides = [1, 1, 1, 1, 1, 1]} : vector<1x8x2x8x2x32xf32> to vector<1x8x1x8x1x32xf32>
    %29 = vector.shape_cast %28 : vector<1x8x1x8x1x32xf32> to vector<1x8x8x32xf32>
    %30 = vector.extract_strided_slice %22 {offsets = [0, 0, 1, 0, 1, 0], sizes = [1, 8, 1, 8, 1, 32], strides = [1, 1, 1, 1, 1, 1]} : vector<1x8x2x8x2x32xf32> to vector<1x8x1x8x1x32xf32>
    %31 = vector.shape_cast %30 : vector<1x8x1x8x1x32xf32> to vector<1x8x8x32xf32>
    %32 = arith.maximumf %29, %31 : vector<1x8x8x32xf32>
    %33 = arith.maximumf %27, %32 : vector<1x8x8x32xf32>
    %cst_9 = arith.constant 0.000000e+00 : f32
    %34 = vector.broadcast %cst_9 : f32 to vector<1x8x8x32xf32>
    %35 = arith.maximumf %33, %34 : vector<1x8x8x32xf32>
    %cst_10 = arith.constant 0.000000e+00 : f32
    %36 = vector.broadcast %cst_10 : f32 to vector<1x1x8x32xf32>
    %37 = tpu.concatenate %36, %35, %36 in 1 : vector<1x1x8x32xf32>, vector<1x8x8x32xf32>, vector<1x1x8x32xf32> -> vector<1x10x8x32xf32>
    %cst_11 = arith.constant 0.000000e+00 : f32
    %38 = vector.broadcast %cst_11 : f32 to vector<1x10x1x32xf32>
    %39 = tpu.concatenate %38, %37, %38 in 2 : vector<1x10x1x32xf32>, vector<1x10x8x32xf32>, vector<1x10x1x32xf32> -> vector<1x10x10x32xf32>
    %40 = vector.extract_strided_slice %39 {offsets = [0, 0, 0, 0], sizes = [1, 8, 8, 32], strides = [1, 1, 1, 1]} : vector<1x10x10x32xf32> to vector<1x8x8x32xf32>
    %41 = vector.extract_strided_slice %39 {offsets = [0, 0, 1, 0], sizes = [1, 8, 8, 32], strides = [1, 1, 1, 1]} : vector<1x10x10x32xf32> to vector<1x8x8x32xf32>
    %42 = vector.extract_strided_slice %39 {offsets = [0, 0, 2, 0], sizes = [1, 8, 8, 32], strides = [1, 1, 1, 1]} : vector<1x10x10x32xf32> to vector<1x8x8x32xf32>
    %43 = vector.extract_strided_slice %39 {offsets = [0, 1, 0, 0], sizes = [1, 8, 8, 32], strides = [1, 1, 1, 1]} : vector<1x10x10x32xf32> to vector<1x8x8x32xf32>
    %44 = vector.extract_strided_slice %39 {offsets = [0, 1, 1, 0], sizes = [1, 8, 8, 32], strides = [1, 1, 1, 1]} : vector<1x10x10x32xf32> to vector<1x8x8x32xf32>
    %45 = vector.extract_strided_slice %39 {offsets = [0, 1, 2, 0], sizes = [1, 8, 8, 32], strides = [1, 1, 1, 1]} : vector<1x10x10x32xf32> to vector<1x8x8x32xf32>
    %46 = vector.extract_strided_slice %39 {offsets = [0, 2, 0, 0], sizes = [1, 8, 8, 32], strides = [1, 1, 1, 1]} : vector<1x10x10x32xf32> to vector<1x8x8x32xf32>
    %47 = vector.extract_strided_slice %39 {offsets = [0, 2, 1, 0], sizes = [1, 8, 8, 32], strides = [1, 1, 1, 1]} : vector<1x10x10x32xf32> to vector<1x8x8x32xf32>
    %48 = vector.extract_strided_slice %39 {offsets = [0, 2, 2, 0], sizes = [1, 8, 8, 32], strides = [1, 1, 1, 1]} : vector<1x10x10x32xf32> to vector<1x8x8x32xf32>
    %49 = tpu.concatenate %40, %41, %42, %43, %44, %45, %46, %47, %48 in 3 : vector<1x8x8x32xf32>, vector<1x8x8x32xf32>, vector<1x8x8x32xf32>, vector<1x8x8x32xf32>, vector<1x8x8x32xf32>, vector<1x8x8x32xf32>, vector<1x8x8x32xf32>, vector<1x8x8x32xf32>, vector<1x8x8x32xf32> -> vector<1x8x8x288xf32>
    %50 = vector.shape_cast %49 : vector<1x8x8x288xf32> to vector<64x288xf32>
    %c0_12 = arith.constant 0 : index
    %c0_13 = arith.constant 0 : index
    %51 = vector.load %arg4[%c0_12, %c0_13] : memref<288x64xf32, #tpu.memory_space<vmem>>, vector<288x64xf32>
    %cst_14 = arith.constant dense<0.000000e+00> : vector<64x64xf32>
    %52 = tpu.matmul %50, %51, %cst_14 {dimension_numbers = #tpu.dot_dimension_numbers<[1], [0], [0], [1], [0, 0, 1, 1], [], []>} : vector<64x288xf32>, vector<288x64xf32>, vector<64x64xf32> -> vector<64x64xf32>
    %c0_15 = arith.constant 0 : index
    %c0_16 = arith.constant 0 : index
    %53 = vector.load %arg5[%c0_15, %c0_16] : memref<1x64xf32, #tpu.memory_space<vmem>>, vector<1x64xf32>
    %54 = vector.broadcast %53 : vector<1x64xf32> to vector<64x64xf32>
    %55 = arith.addf %52, %54 : vector<64x64xf32>
    %56 = vector.shape_cast %55 : vector<64x64xf32> to vector<1x8x8x64xf32>
    %57 = vector.shape_cast %56 : vector<1x8x8x64xf32> to vector<1x4x2x4x2x64xf32>
    %58 = vector.extract_strided_slice %57 {offsets = [0, 0, 0, 0, 0, 0], sizes = [1, 4, 1, 4, 1, 64], strides = [1, 1, 1, 1, 1, 1]} : vector<1x4x2x4x2x64xf32> to vector<1x4x1x4x1x64xf32>
    %59 = vector.shape_cast %58 : vector<1x4x1x4x1x64xf32> to vector<1x4x4x64xf32>
    %60 = vector.extract_strided_slice %57 {offsets = [0, 0, 0, 0, 1, 0], sizes = [1, 4, 1, 4, 1, 64], strides = [1, 1, 1, 1, 1, 1]} : vector<1x4x2x4x2x64xf32> to vector<1x4x1x4x1x64xf32>
    %61 = vector.shape_cast %60 : vector<1x4x1x4x1x64xf32> to vector<1x4x4x64xf32>
    %62 = arith.maximumf %59, %61 : vector<1x4x4x64xf32>
    %63 = vector.extract_strided_slice %57 {offsets = [0, 0, 1, 0, 0, 0], sizes = [1, 4, 1, 4, 1, 64], strides = [1, 1, 1, 1, 1, 1]} : vector<1x4x2x4x2x64xf32> to vector<1x4x1x4x1x64xf32>
    %64 = vector.shape_cast %63 : vector<1x4x1x4x1x64xf32> to vector<1x4x4x64xf32>
    %65 = vector.extract_strided_slice %57 {offsets = [0, 0, 1, 0, 1, 0], sizes = [1, 4, 1, 4, 1, 64], strides = [1, 1, 1, 1, 1, 1]} : vector<1x4x2x4x2x64xf32> to vector<1x4x1x4x1x64xf32>
    %66 = vector.shape_cast %65 : vector<1x4x1x4x1x64xf32> to vector<1x4x4x64xf32>
    %67 = arith.maximumf %64, %66 : vector<1x4x4x64xf32>
    %68 = arith.maximumf %62, %67 : vector<1x4x4x64xf32>
    %cst_17 = arith.constant 0.000000e+00 : f32
    %69 = vector.broadcast %cst_17 : f32 to vector<1x4x4x64xf32>
    %70 = arith.maximumf %68, %69 : vector<1x4x4x64xf32>
    %cst_18 = arith.constant 0.000000e+00 : f32
    %71 = vector.broadcast %cst_18 : f32 to vector<1x1x4x64xf32>
    %72 = tpu.concatenate %71, %70, %71 in 1 : vector<1x1x4x64xf32>, vector<1x4x4x64xf32>, vector<1x1x4x64xf32> -> vector<1x6x4x64xf32>
    %cst_19 = arith.constant 0.000000e+00 : f32
    %73 = vector.broadcast %cst_19 : f32 to vector<1x6x1x64xf32>
    %74 = tpu.concatenate %73, %72, %73 in 2 : vector<1x6x1x64xf32>, vector<1x6x4x64xf32>, vector<1x6x1x64xf32> -> vector<1x6x6x64xf32>
    %75 = vector.extract_strided_slice %74 {offsets = [0, 0, 0, 0], sizes = [1, 4, 4, 64], strides = [1, 1, 1, 1]} : vector<1x6x6x64xf32> to vector<1x4x4x64xf32>
    %76 = vector.extract_strided_slice %74 {offsets = [0, 0, 1, 0], sizes = [1, 4, 4, 64], strides = [1, 1, 1, 1]} : vector<1x6x6x64xf32> to vector<1x4x4x64xf32>
    %77 = vector.extract_strided_slice %74 {offsets = [0, 0, 2, 0], sizes = [1, 4, 4, 64], strides = [1, 1, 1, 1]} : vector<1x6x6x64xf32> to vector<1x4x4x64xf32>
    %78 = vector.extract_strided_slice %74 {offsets = [0, 1, 0, 0], sizes = [1, 4, 4, 64], strides = [1, 1, 1, 1]} : vector<1x6x6x64xf32> to vector<1x4x4x64xf32>
    %79 = vector.extract_strided_slice %74 {offsets = [0, 1, 1, 0], sizes = [1, 4, 4, 64], strides = [1, 1, 1, 1]} : vector<1x6x6x64xf32> to vector<1x4x4x64xf32>
    %80 = vector.extract_strided_slice %74 {offsets = [0, 1, 2, 0], sizes = [1, 4, 4, 64], strides = [1, 1, 1, 1]} : vector<1x6x6x64xf32> to vector<1x4x4x64xf32>
    %81 = vector.extract_strided_slice %74 {offsets = [0, 2, 0, 0], sizes = [1, 4, 4, 64], strides = [1, 1, 1, 1]} : vector<1x6x6x64xf32> to vector<1x4x4x64xf32>
    %82 = vector.extract_strided_slice %74 {offsets = [0, 2, 1, 0], sizes = [1, 4, 4, 64], strides = [1, 1, 1, 1]} : vector<1x6x6x64xf32> to vector<1x4x4x64xf32>
    %83 = vector.extract_strided_slice %74 {offsets = [0, 2, 2, 0], sizes = [1, 4, 4, 64], strides = [1, 1, 1, 1]} : vector<1x6x6x64xf32> to vector<1x4x4x64xf32>
    %84 = tpu.concatenate %75, %76, %77, %78, %79, %80, %81, %82, %83 in 3 : vector<1x4x4x64xf32>, vector<1x4x4x64xf32>, vector<1x4x4x64xf32>, vector<1x4x4x64xf32>, vector<1x4x4x64xf32>, vector<1x4x4x64xf32>, vector<1x4x4x64xf32>, vector<1x4x4x64xf32>, vector<1x4x4x64xf32> -> vector<1x4x4x576xf32>
    %85 = vector.shape_cast %84 : vector<1x4x4x576xf32> to vector<16x576xf32>
    %c0_20 = arith.constant 0 : index
    %c0_21 = arith.constant 0 : index
    %86 = vector.load %arg6[%c0_20, %c0_21] : memref<576x64xf32, #tpu.memory_space<vmem>>, vector<576x64xf32>
    %cst_22 = arith.constant dense<0.000000e+00> : vector<16x64xf32>
    %87 = tpu.matmul %85, %86, %cst_22 {dimension_numbers = #tpu.dot_dimension_numbers<[1], [0], [0], [1], [0, 0, 1, 1], [], []>} : vector<16x576xf32>, vector<576x64xf32>, vector<16x64xf32> -> vector<16x64xf32>
    %c0_23 = arith.constant 0 : index
    %c0_24 = arith.constant 0 : index
    %88 = vector.load %arg7[%c0_23, %c0_24] : memref<1x64xf32, #tpu.memory_space<vmem>>, vector<1x64xf32>
    %89 = vector.broadcast %88 : vector<1x64xf32> to vector<16x64xf32>
    %90 = arith.addf %87, %89 : vector<16x64xf32>
    %91 = vector.shape_cast %90 : vector<16x64xf32> to vector<1x4x4x64xf32>
    %92 = vector.shape_cast %91 : vector<1x4x4x64xf32> to vector<1x2x2x2x2x64xf32>
    %93 = vector.extract_strided_slice %92 {offsets = [0, 0, 0, 0, 0, 0], sizes = [1, 2, 1, 2, 1, 64], strides = [1, 1, 1, 1, 1, 1]} : vector<1x2x2x2x2x64xf32> to vector<1x2x1x2x1x64xf32>
    %94 = vector.shape_cast %93 : vector<1x2x1x2x1x64xf32> to vector<1x2x2x64xf32>
    %95 = vector.extract_strided_slice %92 {offsets = [0, 0, 0, 0, 1, 0], sizes = [1, 2, 1, 2, 1, 64], strides = [1, 1, 1, 1, 1, 1]} : vector<1x2x2x2x2x64xf32> to vector<1x2x1x2x1x64xf32>
    %96 = vector.shape_cast %95 : vector<1x2x1x2x1x64xf32> to vector<1x2x2x64xf32>
    %97 = arith.maximumf %94, %96 : vector<1x2x2x64xf32>
    %98 = vector.extract_strided_slice %92 {offsets = [0, 0, 1, 0, 0, 0], sizes = [1, 2, 1, 2, 1, 64], strides = [1, 1, 1, 1, 1, 1]} : vector<1x2x2x2x2x64xf32> to vector<1x2x1x2x1x64xf32>
    %99 = vector.shape_cast %98 : vector<1x2x1x2x1x64xf32> to vector<1x2x2x64xf32>
    %100 = vector.extract_strided_slice %92 {offsets = [0, 0, 1, 0, 1, 0], sizes = [1, 2, 1, 2, 1, 64], strides = [1, 1, 1, 1, 1, 1]} : vector<1x2x2x2x2x64xf32> to vector<1x2x1x2x1x64xf32>
    %101 = vector.shape_cast %100 : vector<1x2x1x2x1x64xf32> to vector<1x2x2x64xf32>
    %102 = arith.maximumf %99, %101 : vector<1x2x2x64xf32>
    %103 = arith.maximumf %97, %102 : vector<1x2x2x64xf32>
    %cst_25 = arith.constant 0.000000e+00 : f32
    %104 = vector.broadcast %cst_25 : f32 to vector<1x2x2x64xf32>
    %105 = arith.maximumf %103, %104 : vector<1x2x2x64xf32>
    %cst_26 = arith.constant 0.000000e+00 : f32
    %106 = vector.broadcast %cst_26 : f32 to vector<1x1x2x64xf32>
    %107 = tpu.concatenate %106, %105, %106 in 1 : vector<1x1x2x64xf32>, vector<1x2x2x64xf32>, vector<1x1x2x64xf32> -> vector<1x4x2x64xf32>
    %cst_27 = arith.constant 0.000000e+00 : f32
    %108 = vector.broadcast %cst_27 : f32 to vector<1x4x1x64xf32>
    %109 = tpu.concatenate %108, %107, %108 in 2 : vector<1x4x1x64xf32>, vector<1x4x2x64xf32>, vector<1x4x1x64xf32> -> vector<1x4x4x64xf32>
    %110 = vector.extract_strided_slice %109 {offsets = [0, 0, 0, 0], sizes = [1, 2, 2, 64], strides = [1, 1, 1, 1]} : vector<1x4x4x64xf32> to vector<1x2x2x64xf32>
    %111 = vector.extract_strided_slice %109 {offsets = [0, 0, 1, 0], sizes = [1, 2, 2, 64], strides = [1, 1, 1, 1]} : vector<1x4x4x64xf32> to vector<1x2x2x64xf32>
    %112 = vector.extract_strided_slice %109 {offsets = [0, 0, 2, 0], sizes = [1, 2, 2, 64], strides = [1, 1, 1, 1]} : vector<1x4x4x64xf32> to vector<1x2x2x64xf32>
    %113 = vector.extract_strided_slice %109 {offsets = [0, 1, 0, 0], sizes = [1, 2, 2, 64], strides = [1, 1, 1, 1]} : vector<1x4x4x64xf32> to vector<1x2x2x64xf32>
    %114 = vector.extract_strided_slice %109 {offsets = [0, 1, 1, 0], sizes = [1, 2, 2, 64], strides = [1, 1, 1, 1]} : vector<1x4x4x64xf32> to vector<1x2x2x64xf32>
    %115 = vector.extract_strided_slice %109 {offsets = [0, 1, 2, 0], sizes = [1, 2, 2, 64], strides = [1, 1, 1, 1]} : vector<1x4x4x64xf32> to vector<1x2x2x64xf32>
    %116 = vector.extract_strided_slice %109 {offsets = [0, 2, 0, 0], sizes = [1, 2, 2, 64], strides = [1, 1, 1, 1]} : vector<1x4x4x64xf32> to vector<1x2x2x64xf32>
    %117 = vector.extract_strided_slice %109 {offsets = [0, 2, 1, 0], sizes = [1, 2, 2, 64], strides = [1, 1, 1, 1]} : vector<1x4x4x64xf32> to vector<1x2x2x64xf32>
    %118 = vector.extract_strided_slice %109 {offsets = [0, 2, 2, 0], sizes = [1, 2, 2, 64], strides = [1, 1, 1, 1]} : vector<1x4x4x64xf32> to vector<1x2x2x64xf32>
    %119 = tpu.concatenate %110, %111, %112, %113, %114, %115, %116, %117, %118 in 3 : vector<1x2x2x64xf32>, vector<1x2x2x64xf32>, vector<1x2x2x64xf32>, vector<1x2x2x64xf32>, vector<1x2x2x64xf32>, vector<1x2x2x64xf32>, vector<1x2x2x64xf32>, vector<1x2x2x64xf32>, vector<1x2x2x64xf32> -> vector<1x2x2x576xf32>
    %120 = vector.shape_cast %119 : vector<1x2x2x576xf32> to vector<4x576xf32>
    %c0_28 = arith.constant 0 : index
    %c0_29 = arith.constant 0 : index
    %121 = vector.load %arg8[%c0_28, %c0_29] : memref<576x64xf32, #tpu.memory_space<vmem>>, vector<576x64xf32>
    %cst_30 = arith.constant dense<0.000000e+00> : vector<4x64xf32>
    %122 = tpu.matmul %120, %121, %cst_30 {dimension_numbers = #tpu.dot_dimension_numbers<[1], [0], [0], [1], [0, 0, 1, 1], [], []>} : vector<4x576xf32>, vector<576x64xf32>, vector<4x64xf32> -> vector<4x64xf32>
    %c0_31 = arith.constant 0 : index
    %c0_32 = arith.constant 0 : index
    %123 = vector.load %arg9[%c0_31, %c0_32] : memref<1x64xf32, #tpu.memory_space<vmem>>, vector<1x64xf32>
    %124 = vector.broadcast %123 : vector<1x64xf32> to vector<4x64xf32>
    %125 = arith.addf %122, %124 : vector<4x64xf32>
    %126 = vector.shape_cast %125 : vector<4x64xf32> to vector<1x2x2x64xf32>
    %cst_33 = arith.constant 0.000000e+00 : f32
    %127 = vector.broadcast %cst_33 : f32 to vector<1x2x2x64xf32>
    %128 = arith.maximumf %126, %127 : vector<1x2x2x64xf32>
    %129 = vector.shape_cast %128 : vector<1x2x2x64xf32> to vector<1x2x128xf32>
    %c0_34 = arith.constant 0 : index
    %c0_35 = arith.constant 0 : index
    %c0_36 = arith.constant 0 : index
    %130 = vector.load %arg10[%c0_34, %c0_35, %c0_36] : memref<1x2x128xf32, #tpu.memory_space<vmem>>, vector<1x2x128xf32>
    tpu.vector_store %arg10[%c0_34, %c0_35, %c0_36], %129 {strides = array<i32>} : memref<1x2x128xf32, #tpu.memory_space<vmem>>, vector<1x2x128xf32>,
    return
  }
  func.func @transform_0(%arg0: i32) -> (i32, i32, i32, i32) {
    %c0_i32 = arith.constant 0 : i32
    %c0_i32_0 = arith.constant 0 : i32
    %c0_i32_1 = arith.constant 0 : i32
    %c0_i32_2 = arith.constant 0 : i32
    return %arg0, %c0_i32, %c0_i32_0, %c0_i32_1 : i32, i32, i32, i32
  }
  func.func @transform_1(%arg0: i32) -> (i32, i32) {
    %c0_i32 = arith.constant 0 : i32
    %c0_i32_0 = arith.constant 0 : i32
    %c0_i32_1 = arith.constant 0 : i32
    return %c0_i32, %c0_i32_0 : i32, i32
  }
  func.func @transform_2(%arg0: i32) -> (i32, i32) {
    %c0_i32 = arith.constant 0 : i32
    %c0_i32_0 = arith.constant 0 : i32
    %c0_i32_1 = arith.constant 0 : i32
    return %c0_i32, %c0_i32_0 : i32, i32
  }
  func.func @transform_3(%arg0: i32) -> (i32, i32) {
    %c0_i32 = arith.constant 0 : i32
    %c0_i32_0 = arith.constant 0 : i32
    %c0_i32_1 = arith.constant 0 : i32
    return %c0_i32, %c0_i32_0 : i32, i32
  }
  func.func @transform_4(%arg0: i32) -> (i32, i32) {
    %c0_i32 = arith.constant 0 : i32
    %c0_i32_0 = arith.constant 0 : i32
    %c0_i32_1 = arith.constant 0 : i32
    return %c0_i32, %c0_i32_0 : i32, i32
  }
  func.func @transform_5(%arg0: i32) -> (i32, i32) {
    %c0_i32 = arith.constant 0 : i32
    %c0_i32_0 = arith.constant 0 : i32
    %c0_i32_1 = arith.constant 0 : i32
    return %c0_i32, %c0_i32_0 : i32, i32
  }
  func.func @transform_6(%arg0: i32) -> (i32, i32) {
    %c0_i32 = arith.constant 0 : i32
    %c0_i32_0 = arith.constant 0 : i32
    %c0_i32_1 = arith.constant 0 : i32
    return %c0_i32, %c0_i32_0 : i32, i32
  }
  func.func @transform_7(%arg0: i32) -> (i32, i32) {
    %c0_i32 = arith.constant 0 : i32
    %c0_i32_0 = arith.constant 0 : i32
    %c0_i32_1 = arith.constant 0 : i32
    return %c0_i32, %c0_i32_0 : i32, i32
  }
  func.func @transform_8(%arg0: i32) -> (i32, i32) {
    %c0_i32 = arith.constant 0 : i32
    %c0_i32_0 = arith.constant 0 : i32
    %c0_i32_1 = arith.constant 0 : i32
    return %c0_i32, %c0_i32_0 : i32, i32
  }
  func.func @transform_9(%arg0: i32) -> (i32, i32, i32) {
    %c0_i32 = arith.constant 0 : i32
    %c0_i32_0 = arith.constant 0 : i32
    %c0_i32_1 = arith.constant 0 : i32
    return %arg0, %c0_i32, %c0_i32_0 : i32, i32, i32
  }
}

</mosaic_0001>

<bundles_post_ra>
// kernel: dann_encoder.1
= control target key start
LH: loop header
LB: loop body
LE: loop exit
PB: predicated region body
PF: predicated region fallthrough
CT: control target
= control target key end

     0   :  { %s6963_s30 = smov 0   ;;  %s9768_s0 = inlined_call_operand.vmem [shape: f32[2,16,16,3], index: 0, kind: input, shape index: {}]   ;;  %s9769_s1 = inlined_call_operand.vmem [shape: f32[27,32], index: 1, kind: input, shape index: {}]   ;;  %s9770_s2 = inlined_call_operand.vmem [shape: f32[1,32], index: 2, kind: input, shape index: {}]   ;;  %s9771_s3 = inlined_call_operand.vmem [shape: f32[288,64], index: 3, kind: input, shape index: {}]   ;;  %s9772_s4 = inlined_call_operand.vmem [shape: f32[1,64], index: 4, kind: input, shape index: {}]   ;;  %s9773_s5 = inlined_call_operand.vmem [shape: f32[576,64], index: 5, kind: input, shape index: {}]   ;;  %s9774_s6 = inlined_call_operand.vmem [shape: f32[1,64], index: 6, kind: input, shape index: {}]   ;;  %s9775_s7 = inlined_call_operand.vmem [shape: f32[576,64], index: 7, kind: input, shape index: {}]   ;;  %s9776_s8 = inlined_call_operand.vmem [shape: f32[1,64], index: 8, kind: input, shape index: {}]   ;;  %s9777_s9 = inlined_call_operand.vmem [shape: f32[2,2,128], index: 9, kind: output, shape index: {}]  }
   0x1 LB: > { %s5890_s10 = sadd.s32 4294967295, %s6894_s30   ;;  %p5894_p0 = scmp.ge.s32.totalorder %s6894_s30, 1  ;;  %s6894_s30 = sphi %s6963_s30, %s19_s30  }
   0x2   : > { %p287_p1 = scmp.lt.s32.totalorder %s6894_s30, 3 }
   0x4   : > { %p288_p2 = pnand %p5894_p0, %p287_p1 }
   0x6   : > { %291 = sbr.rel (%p288_p2) target bundleno = 2144 (0x860), region = 56 }
   0xd   : > { %vm396_vm0 = vcmask 1040384   ;;  %p322_p3 = scmp.lt.s32.totalorder %s5890_s10, 1  ;;  %v9778_v0 = vmov 0.0   ;;  %vm9791_vm1 = vcmask 1046528   ;;  %vm739_vm2 = vcmask 1045504   ;;  %s6897_s15 = smov 3  }
   0xe   : > { %v6972_v1 = vrot.slane %v9778_v0, 7  ;;  %s6898_s16 = smov 9   ;;  %s6899_s17 = smov 6   ;;  %v1768_v41 = vld [vmem:[%s9769_s1] sm:$0xff]  ;;  %v1769_v42 = vld [vmem:[%s9769_s1 + $0x8] sm:$0xff]  ;;  %v1770_v46 = vld [vmem:[%s9769_s1 + $0x10] sm:$0xff] }
   0xf   : > { %s9878_s10 = smov (!%p322_p3, %s5890_s10), 1  ;;  %s6900_s18 = smov 12   ;;  %v6510_v43 = vpack.c.bf16 %v1769_v42, %v1768_v41  ;;  %v1771_v47 = vld [vmem:[%s9769_s1 + $0x18] sm:$0x7]  ;;  %vm9790_vm3 = vcmask 1042432   ;;  %vm6903_vm4 = vmmov 1  }
  0x10   : > { %v6978_v2 = vsel %vm396_vm0, 0.0, %v6972_v1  ;;  %v6982_v3 = vsel %vm396_vm0, %v6972_v1, 0.0  ;;  %v564_v4 = vrot.slane %v6972_v1, 1  ;;  %v741_v5 = vrot.slane %v6972_v1, 2  ;;  %s6126_s11 = sshll.u32 %s9878_s10, 8  ;;  %s6901_s19 = smov 15   ;;  %vm6515_vm5 = vmpackc.low %vm9790_vm3, %vm6903_vm4 }
  0x11   : > { %v9782_v6 = vrot.slane %v6978_v2, 1  ;;  %v9783_v7 = vrot.slane %v6982_v3, 1  ;;  %v9781_v8 = vrot.slane %v6982_v3, 2  ;;  %v9780_v9 = vrot.slane %v6978_v2, 2  ;;  %s6994_s14 = scalar_lea.vmem %s9768_s0, %s6126_s11  ;;  %s6902_s20 = smov 18   ;;  %6511 = vmatprep.subr.bf16.mxu0 %v6510_v43 }
  0x12   : > { %v331_v12 = vld [vmem:[%s6994_s14] sm:$0xff]  ;;  %v332_v15 = vld [vmem:[%s6994_s14 + $0x8] sm:$0xff]  ;;  %v333_v31 = vld [vmem:[%s6994_s14 + $0x10] sm:$0xff]  ;;  %6513 = vmatpush3.bf16.msra.mxu0 %v6510_v43  ;;  %v6514_v48 = vpack.c.bf16 %v1771_v47, %v1770_v46  ;;  %s6904_s29 = smov 21   ;;  %s6905_s11 = smov 24   ;;  %vm1504_vm6 = vcmask 23552  }
  0x13   : > { %v565_v10 = vsel %vm9791_vm1, %v9782_v6, %v564_v4  ;;  %v567_v11 = vsel %vm9791_vm1, %v564_v4, %v9783_v7  ;;  %v742_v13 = vsel %vm739_vm2, %v9780_v9, %v741_v5  ;;  %v744_v14 = vsel %vm739_vm2, %v741_v5, %v9781_v8  ;;  %v334_v32 = vld [vmem:[%s6994_s14 + $0x18] sm:$0xff]  ;;  %v335_v56 = vld [vmem:[%s6994_s14 + $0x20] sm:$0xff]  ;;  %v336_v57 = vld [vmem:[%s6994_s14 + $0x28] sm:$0xff]  ;;  %s6907_s25 = smov 32  }
  0x14   : > { %v7010_v16 = vpack.i.bf16 %v567_v11, %v565_v10  ;;  %v399_v17 = vrot.slane %v331_v12, 7  ;;  %v7012_v18 = vpack.i.bf16 %v744_v14, %v742_v13  ;;  %v400_v19 = vrot.slane %v332_v15, 7  ;;  %6516 = vmatprep.subr.msk.bf16.mxu0 %vm6515_vm5, %v6514_v48  ;;  %v340_v41 = vld [vmem:[%s6994_s14 + $0x48] sm:$0xff] }
  0x15   : > { %v402_v34 = vrot.slane %v333_v31, 7  ;;  %v403_v35 = vrot.slane %v334_v32, 7  ;;  %v405_v58 = vrot.slane %v335_v56, 7  ;;  %v406_v59 = vrot.slane %v336_v57, 7 }
  0x16   : > { %6742 = vrot.lane.b32.xlu0 %v7010_v16, %s6897_s15  ;;  %v7017_v20 = vsel %vm396_vm0, 0.0, %v399_v17  ;;  %v7022_v21 = vsel %vm396_vm0, %v399_v17, %v400_v19  ;;  %v514_v24 = vsel %vm396_vm0, %v400_v19, 0.0  ;;  %6519 = vmatpush3.bf16.msk.msra.mxu0 %vm6515_vm5, %v6514_v48  ;;  %v337_v19 = vld [vmem:[%s6994_s14 + $0x30] sm:$0xff]  ;;  %v412_v43 = vrot.slane %v340_v41, 7 }
  0x17   : > { %917 = vrot.lane.b32.xlu1 %v7017_v20, %s6898_s16  ;;  %v568_v22 = vrot.slane %v7017_v20, 1  ;;  %v569_v23 = vrot.slane %v7022_v21, 1  ;;  %v571_v26 = vrot.slane %v514_v24, 1  ;;  %v745_v27 = vrot.slane %v7017_v20, 2 }
  0x18   : > { %v746_v28 = vrot.slane %v7022_v21, 2  ;;  %v748_v33 = vrot.slane %v514_v24, 2  ;;  %v7046_v37 = vsel %vm396_vm0, 0.0, %v402_v34  ;;  %v7049_v38 = vsel %vm396_vm0, %v402_v34, %v403_v35 }
  0x19   : > { %v570_v25 = vsel %vm9791_vm1, %v568_v22, %v569_v23  ;;  %v572_v29 = vsel %vm9791_vm1, %v569_v23, %v571_v26  ;;  %v573_v39 = vrot.slane %v7046_v37, 1  ;;  %v574_v40 = vrot.slane %v7049_v38, 1  ;;  %v338_v22 = vld [vmem:[%s6994_s14 + $0x38] sm:$0xff] }
  0x1a   : > { %6747 = vrot.lane.b32.xlu0 %v7012_v18, %s6899_s17  ;;  %v747_v30 = vsel %vm739_vm2, %v745_v27, %v746_v28  ;;  %v749_v36 = vsel %vm739_vm2, %v746_v28, %v748_v33  ;;  %v515_v45 = vsel %vm396_vm0, %v403_v35, 0.0  ;;  %v750_v50 = vrot.slane %v7046_v37, 2 }
  0x1b   : > { %919 = vrot.lane.b32.xlu1 %v7022_v21, %s6898_s16  ;;  %v575_v44 = vsel %vm9791_vm1, %v573_v39, %v574_v40  ;;  %v576_v49 = vrot.slane %v515_v45, 1  ;;  %v751_v51 = vrot.slane %v7049_v38, 2  ;;  %v753_v54 = vrot.slane %v515_v45, 2 }
  0x1c   : > { %v7096_v60 = vsel %vm396_vm0, 0.0, %v405_v58  ;;  %v7099_v61 = vsel %vm396_vm0, %v405_v58, %v406_v59  ;;  %v516_v5 = vsel %vm396_vm0, %v406_v59, 0.0  ;;  %v408_v23 = vrot.slane %v337_v19, 7 }
  0x1d   : > { %v577_v52 = vsel %vm9791_vm1, %v574_v40, %v576_v49  ;;  %v752_v53 = vsel %vm739_vm2, %v750_v50, %v751_v51  ;;  %v754_v55 = vsel %vm739_vm2, %v751_v51, %v753_v54  ;;  %v578_v62 = vrot.slane %v7096_v60, 1  ;;  %v339_v40 = vld [vmem:[%s6994_s14 + $0x40] sm:$0xff] }
  0x1e   : > { %1019 = vrot.lane.b32.xlu0 %v570_v25, %s6900_s18  ;;  %v579_v63 = vrot.slane %v7099_v61, 1  ;;  %v581_v10 = vrot.slane %v516_v5, 1  ;;  %v755_v11 = vrot.slane %v7096_v60, 2  ;;  %v756_v12 = vrot.slane %v7099_v61, 2 }
  0x1f   : > { %647 = vrot.lane.b32.xlu1 %v570_v25, %s6897_s15  ;;  %v758_v15 = vrot.slane %v516_v5, 2  ;;  %v409_v24 = vrot.slane %v338_v22, 7  ;;  %v7133_v25 = vsel %vm396_vm0, 0.0, %v408_v23  ;;  %v411_v42 = vrot.slane %v339_v40, 7 }
  0x20   : > { %v580_v4 = vsel %vm9791_vm1, %v578_v62, %v579_v63  ;;  %v582_v13 = vsel %vm9791_vm1, %v579_v63, %v581_v10  ;;  %v757_v14 = vsel %vm739_vm2, %v755_v11, %v756_v12  ;;  %v583_v27 = vrot.slane %v7133_v25, 1 }
  0x21   : > { %v759_v17 = vsel %vm739_vm2, %v756_v12, %v758_v15  ;;  %v7136_v26 = vsel %vm396_vm0, %v408_v23, %v409_v24  ;;  %v760_v32 = vrot.slane %v7133_v25, 2  ;;  %v7172_v45 = vsel %vm396_vm0, 0.0, %v411_v42  ;;  %v341_v23 = vld [vmem:[%s6994_s14 + $0x50] sm:$0xff] }
  0x22   : > { %1021 = vrot.lane.b32.xlu0 %v572_v29, %s6900_s18  ;;  %v584_v28 = vrot.slane %v7136_v26, 1  ;;  %v761_v33 = vrot.slane %v7136_v26, 2  ;;  %v7175_v47 = vsel %vm396_vm0, %v411_v42, %v412_v43  ;;  %v588_v49 = vrot.slane %v7172_v45, 1 }
  0x23   : > { %1120 = vrot.lane.b32.xlu1 %v747_v30, %s6901_s19  ;;  %v589_v50 = vrot.slane %v7175_v47, 1  ;;  %v518_v54 = vsel %vm396_vm0, %v412_v43, 0.0  ;;  %v765_v58 = vrot.slane %v7172_v45, 2  ;;  %v766_v59 = vrot.slane %v7175_v47, 2 }
  0x24   : > { %v762_v35 = vsel %vm739_vm2, %v760_v32, %v761_v33  ;;  %v591_v56 = vrot.slane %v518_v54, 1  ;;  %v768_v12 = vrot.slane %v518_v54, 2  ;;  %vm1537_vm7 = vcmask 48128  }
  0x25   : > { %v767_v5 = vsel %vm739_vm2, %v765_v58, %v766_v59  ;;  %vm1570_vm8 = vcmask 72704   ;;  %vm1603_vm9 = vcmask 97280   ;;  %vm1636_vm10 = vcmask 121856  }
  0x26   : > { %649 = vrot.lane.b32.xlu0 %v572_v29, %s6897_s15  ;;  %v585_v29 = vsel %vm9791_vm1, %v583_v27, %v584_v28  ;;  %v592_v63 = vsel %vm9791_vm1, %v589_v50, %v591_v56  ;;  %v769_v19 = vsel %vm739_vm2, %v766_v59, %v768_v12  ;;  %vm1669_vm11 = vcmask 146432  }
  0x27   : > { %824 = vrot.lane.b32.xlu1 %v747_v30, %s6899_s17  ;;  %v517_v30 = vsel %vm396_vm0, %v409_v24, 0.0  ;;  %v342_v24 = vld [vmem:[%s6994_s14 + $0x58] sm:$0xff]  ;;  %vm1702_vm12 = vcmask 171008   ;;  %vm1735_vm13 = vcmask 195584   ;;  %vm9793_vm14 = vcmask 220160  }
  0x28   : > { %v586_v31 = vrot.slane %v517_v30, 1  ;;  %v415_v32 = vrot.slane %v342_v24, 7  ;;  %vm9792_vm15 = vcmask 1041409   ;;  %vm3771_vm4 = vcmask 1042434  }
  0x29   : > { %vm3773_vm5 = vcmask 1043459   ;;  %vm3775_vm3 = vcmask 1044484  }
  0x2a   : > { %1122 = vrot.lane.b32.xlu0 %v749_v36, %s6901_s19  ;;  %v587_v34 = vsel %vm9791_vm1, %v584_v28, %v586_v31 }
  0x2b   : > { %1216 = vrot.lane.b32.xlu1 %v7046_v37, %s6902_s20 }
  0x2e   : > { %826 = vrot.lane.b32.xlu0 %v749_v36, %s6899_s17  ;;  %v763_v36 = vrot.slane %v517_v30, 2  ;;  %v414_v30 = vrot.slane %v341_v23, 7 }
  0x2f   : > { %921 = vrot.lane.b32.xlu1 %v7046_v37, %s6898_s16 }
  0x30   : > { %v764_v39 = vsel %vm739_vm2, %v761_v33, %v763_v36  ;;  %v7239_v40 = vsel %vm396_vm0, %v414_v30, %v415_v32 }
  0x32   : > { %1218 = vrot.lane.b32.xlu0 %v7049_v38, %s6902_s20 }
  0x33   : > { %1312 = vrot.lane.b32.xlu1 %v575_v44, %s6904_s29 }
  0x36   : > { %923 = vrot.lane.b32.xlu0 %v7049_v38, %s6898_s16 }
  0x37   : > { %1023 = vrot.lane.b32.xlu1 %v575_v44, %s6900_s18 }
  0x3a   : > { %1314 = vrot.lane.b32.xlu0 %v577_v52, %s6904_s29 }
  0x3b   : > { %1408 = vrot.lane.b32.xlu1 %v752_v53, %s6905_s11 }
  0x3e   : > { %651 = vrot.lane.b32.xlu0 %v575_v44, %s6897_s15 }
  0x3f   : > { %1025 = vrot.lane.b32.xlu1 %v577_v52, %s6900_s18 }
  0x42   : > { %1124 = vrot.lane.b32.xlu0 %v752_v53, %s6901_s19 }
  0x43   : > { %1410 = vrot.lane.b32.xlu1 %v754_v55, %s6905_s11 }
  0x46   : > { %653 = vrot.lane.b32.xlu0 %v577_v52, %s6897_s15 }
  0x47   : > { %828 = vrot.lane.b32.xlu1 %v752_v53, %s6899_s17  ;;  %v590_v53 = vsel %vm9791_vm1, %v588_v49, %v589_v50  ;;  %v594_v50 = vrot.slane %v7239_v40, 1 }
  0x4a   : > { %1126 = vrot.lane.b32.xlu0 %v754_v55, %s6901_s19 }
  0x4b   : > { %1220 = vrot.lane.b32.xlu1 %v7096_v60, %s6902_s20 }
  0x4e   : > { %830 = vrot.lane.b32.xlu0 %v754_v55, %s6899_s17 }
  0x4f   : > { %925 = vrot.lane.b32.xlu1 %v7096_v60, %s6898_s16 }
  0x52   : > { %1222 = vrot.lane.b32.xlu0 %v7099_v61, %s6902_s20 }
  0x53   : > { %1316 = vrot.lane.b32.xlu1 %v580_v4, %s6904_s29 }
  0x56   : > { %927 = vrot.lane.b32.xlu0 %v7099_v61, %s6898_s16 }
  0x57   : > { %1027 = vrot.lane.b32.xlu1 %v580_v4, %s6900_s18 }
  0x5a   : > { %1318 = vrot.lane.b32.xlu0 %v582_v13, %s6904_s29 }
  0x5b   : > { %1412 = vrot.lane.b32.xlu1 %v757_v14, %s6905_s11 }
  0x5e   : > { %655 = vrot.lane.b32.xlu0 %v580_v4, %s6897_s15 }
  0x5f   : > { %1029 = vrot.lane.b32.xlu1 %v582_v13, %s6900_s18 }
  0x62   : > { %1128 = vrot.lane.b32.xlu0 %v757_v14, %s6901_s19 }
  0x63   : > { %1414 = vrot.lane.b32.xlu1 %v759_v17, %s6905_s11 }
  0x66   : > { %657 = vrot.lane.b32.xlu0 %v582_v13, %s6897_s15 }
  0x67   : > { %832 = vrot.lane.b32.xlu1 %v757_v14, %s6899_s17 }
  0x6a   : > { %1130 = vrot.lane.b32.xlu0 %v759_v17, %s6901_s19 }
  0x6b   : > { %1224 = vrot.lane.b32.xlu1 %v7133_v25, %s6902_s20 }
  0x6e   : > { %834 = vrot.lane.b32.xlu0 %v759_v17, %s6899_s17 }
  0x6f   : > { %929 = vrot.lane.b32.xlu1 %v7133_v25, %s6898_s16 }
  0x72   : > { %1226 = vrot.lane.b32.xlu0 %v7136_v26, %s6902_s20 }
  0x73   : > { %1320 = vrot.lane.b32.xlu1 %v585_v29, %s6904_s29 }
  0x76   : > { %931 = vrot.lane.b32.xlu0 %v7136_v26, %s6898_s16 }
  0x77   : > { %1031 = vrot.lane.b32.xlu1 %v585_v29, %s6900_s18 }
  0x7a   : > { %1322 = vrot.lane.b32.xlu0 %v587_v34, %s6904_s29 }
  0x7b   : > { %1416 = vrot.lane.b32.xlu1 %v762_v35, %s6905_s11 }
  0x7e   : > { %659 = vrot.lane.b32.xlu0 %v585_v29, %s6897_s15 }
  0x7f   : > { %1033 = vrot.lane.b32.xlu1 %v587_v34, %s6900_s18 }
  0x82   : > { %1132 = vrot.lane.b32.xlu0 %v762_v35, %s6901_s19 }
  0x83   : > { %1418 = vrot.lane.b32.xlu1 %v764_v39, %s6905_s11 }
  0x86   : > { %661 = vrot.lane.b32.xlu0 %v587_v34, %s6897_s15 }
  0x87   : > { %836 = vrot.lane.b32.xlu1 %v762_v35, %s6899_s17  ;;  %v7233_v35 = vsel %vm396_vm0, 0.0, %v414_v30 }
  0x88   : > { %v7169_v44 = vpop.permute.xlu0 %6742  ;;  %v593_v49 = vrot.slane %v7233_v35, 1  ;;  %v770_v23 = vrot.slane %v7233_v35, 2 }
  0x89   : > { %v918_v46 = vpop.permute.xlu1 %917  ;;  %v6744_v14 = vunpack.i.l.bf16 %v7169_v44  ;;  %v6745_v36 = vunpack.i.h.bf16 %v7169_v44 }
  0x8a   : > { %1134 = vrot.lane.b32.xlu0 %v764_v39, %s6901_s19  ;;  %v595_v59 = vsel %vm9791_vm1, %v593_v49, %v594_v50 }
  0x8b   : > { %1228 = vrot.lane.b32.xlu1 %v7172_v45, %s6902_s20  ;;  %v1505_v27 = vsel %vm1504_vm6, %v6978_v2, %v6744_v14 }
  0x8c   : > { %v7180_v48 = vpop.permute.xlu0 %6747 }
  0x8d   : > { %v7184_v51 = vpop.permute.xlu1 %919  ;;  %v6749_v15 = vunpack.i.l.bf16 %v7180_v48  ;;  %v6750_v41 = vunpack.i.h.bf16 %v7180_v48  ;;  %v1506_v48 = vsel %vm1504_vm6, %v6972_v1, %v6745_v36 }
  0x8e   : > { %838 = vrot.lane.b32.xlu0 %v764_v39, %s6899_s17 }
  0x8f   : > { %933 = vrot.lane.b32.xlu1 %v7172_v45, %s6898_s16  ;;  %v1538_v28 = vsel %vm1537_vm7, %v1505_v27, %v6749_v15  ;;  %v1539_v54 = vsel %vm1537_vm7, %v1506_v48, %v6750_v41 }
  0x90   : > { %v1020_v52 = vpop.permute.xlu0 %1019  ;;  %v1571_v33 = vsel %vm1570_vm8, %v1538_v28, %v918_v46 }
  0x91   : > { %v7191_v55 = vpop.permute.xlu1 %647  ;;  %v1604_v42 = vsel %vm1603_vm9, %v1571_v33, %v1020_v52 }
  0x92   : > { %1230 = vrot.lane.b32.xlu0 %v7175_v47, %s6902_s20 }
  0x93   : > { %1324 = vrot.lane.b32.xlu1 %v590_v53, %s6904_s29 }
  0x94   : > { %v7196_v57 = vpop.permute.xlu0 %1021 }
  0x95   : > { %v1121_v62 = vpop.permute.xlu1 %1120 }
  0x96   : > { %935 = vrot.lane.b32.xlu0 %v7175_v47, %s6898_s16  ;;  %v1637_v43 = vsel %vm1636_vm10, %v1604_v42, %v1121_v62  ;;  %v519_v62 = vsel %vm396_vm0, %v415_v32, 0.0 }
  0x97   : > { %1035 = vrot.lane.b32.xlu1 %v590_v53, %s6900_s18  ;;  %v596_v14 = vrot.slane %v519_v62, 1  ;;  %v773_v32 = vrot.slane %v519_v62, 2 }
  0x98   : > { %v7204_v4 = vpop.permute.xlu0 %649 }
  0x99   : > { %v7207_v10 = vpop.permute.xlu1 %824 }
  0x9a   : > { %1326 = vrot.lane.b32.xlu0 %v592_v63, %s6904_s29 }
  0x9b   : > { %1420 = vrot.lane.b32.xlu1 %v767_v5, %s6905_s11 }
  0x9c   : > { %v1123_v11 = vpop.permute.xlu0 %1122 }
  0x9d   : > { %v1217_v13 = vpop.permute.xlu1 %1216 }
  0x9e   : > { %663 = vrot.lane.b32.xlu0 %v590_v53, %s6897_s15  ;;  %v1670_v44 = vsel %vm1669_vm11, %v1637_v43, %v1217_v13  ;;  %v343_v43 = vld [vmem:[%s6994_s14 + $0x60] sm:$0xff] }
  0x9f   : > { %1037 = vrot.lane.b32.xlu1 %v592_v63, %s6900_s18  ;;  %v417_v49 = vrot.slane %v343_v43, 7 }
  0xa0   : > { %v7215_v17 = vpop.permute.xlu0 %826 }
  0xa1   : > { %v7218_v22 = vpop.permute.xlu1 %921 }
  0xa2   : > { %1136 = vrot.lane.b32.xlu0 %v767_v5, %s6901_s19 }
  0xa3   : > { %1422 = vrot.lane.b32.xlu1 %v769_v19, %s6905_s11 }
  0xa4   : > { %v1219_v29 = vpop.permute.xlu0 %1218 }
  0xa5   : > { %v1313_v31 = vpop.permute.xlu1 %1312 }
  0xa6   : > { %665 = vrot.lane.b32.xlu0 %v592_v63, %s6897_s15  ;;  %v1703_v52 = vsel %vm1702_vm12, %v1670_v44, %v1313_v31  ;;  %v1572_v63 = vsel %vm1570_vm8, %v1539_v54, %v7184_v51  ;;  %v771_v51 = vrot.slane %v7239_v40, 2  ;;  %v344_v44 = vld [vmem:[%s6994_s14 + $0x68] sm:$0xff] }
  0xa7   : > { %840 = vrot.lane.b32.xlu1 %v767_v5, %s6899_s17  ;;  %v1605_v12 = vsel %vm1603_vm9, %v1572_v63, %v7196_v57  ;;  %v418_v48 = vrot.slane %v344_v44, 7 }
  0xa8   : > { %v7230_v34 = vpop.permute.xlu0 %923  ;;  %v1638_v13 = vsel %vm1636_vm10, %v1605_v12, %v1123_v11  ;;  %v597_v11 = vsel %vm9791_vm1, %v594_v50, %v596_v14  ;;  %v774_v41 = vsel %vm739_vm2, %v771_v51, %v773_v32 }
  0xa9   : > { %v7236_v39 = vpop.permute.xlu1 %1023  ;;  %v1671_v15 = vsel %vm1669_vm11, %v1638_v13, %v1219_v29  ;;  %v772_v29 = vsel %vm739_vm2, %v770_v23, %v771_v51  ;;  %v7318_v63 = vsel %vm396_vm0, %v417_v49, %v418_v48 }
  0xaa   : > { %1138 = vrot.lane.b32.xlu0 %v769_v19, %s6901_s19  ;;  %v599_v13 = vrot.slane %v7318_v63, 1 }
  0xab   : > { %1232 = vrot.lane.b32.xlu1 %v7233_v35, %s6902_s20 }
  0xac   : > { %v1315_v46 = vpop.permute.xlu0 %1314 }
  0xad   : > { %v1409_v53 = vpop.permute.xlu1 %1408  ;;  %v1704_v24 = vsel %vm1702_vm12, %v1671_v15, %v1315_v46 }
  0xae   : > { %842 = vrot.lane.b32.xlu0 %v769_v19, %s6899_s17  ;;  %v1736_v56 = vsel %vm1735_vm13, %v1703_v52, %v1409_v53  ;;  %v1507_v52 = vsel %vm1504_vm6, %v7017_v20, %v7191_v55 }
  0xaf   : > { %937 = vrot.lane.b32.xlu1 %v7233_v35, %s6898_s16  ;;  %6404 = vmatprep.mubr.msk.f32.mxu0 %vm9793_vm14, %v1736_v56  ;;  %v1540_v53 = vsel %vm1537_vm7, %v1507_v52, %v7207_v10  ;;  %v7311_v56 = vsel %vm396_vm0, 0.0, %v417_v49 }
  0xb0   : > { %v7259_v58 = vpop.permute.xlu0 %651 }
  0xb1   : > { %v7265_v5 = vpop.permute.xlu1 %1025 }
  0xb2   : > { %1234 = vrot.lane.b32.xlu0 %v7239_v40, %s6902_s20 }
  0xb3   : > { %1328 = vrot.lane.b32.xlu1 %v595_v59, %s6904_s29 }
  0xb4   : > { %v1125_v19 = vpop.permute.xlu0 %1124 }
  0xb5   : > { %v1411_v27 = vpop.permute.xlu1 %1410 }
  0xb6   : > { %v1737_v57 = vsel %vm1735_vm13, %v1704_v24, %v1411_v27  ;;  %939 = vrot.lane.b32.xlu0 %v7239_v40, %s6898_s16  ;;  %v520_v27 = vsel %vm396_vm0, %v418_v48, 0.0 }
  0xb7   : > { %1039 = vrot.lane.b32.xlu1 %v595_v59, %s6900_s18  ;;  %6405 = vmatmul.mubr.msk.f32.vlgmr.msra.gmra.mrb[0].mxu0 %vm9793_vm14, %v1737_v57  ;;  %v778_v48 = vrot.slane %v520_v27, 2 }
  0xb8   : > { %v7283_v28 = vpop.permute.xlu0 %653 }
  0xb9   : > { %v7286_v30 = vpop.permute.xlu1 %828 }
  0xba   : > { %1330 = vrot.lane.b32.xlu0 %v597_v11, %s6904_s29 }
  0xbb   : > { %1424 = vrot.lane.b32.xlu1 %v772_v29, %s6905_s11 }
  0xbc   : > { %v1127_v31 = vpop.permute.xlu0 %1126 }
  0xbd   : > { %v1221_v33 = vpop.permute.xlu1 %1220 }
  0xbe   : > { %667 = vrot.lane.b32.xlu0 %v595_v59, %s6897_s15  ;;  %v1573_v59 = vsel %vm1570_vm8, %v1540_v53, %v7218_v22  ;;  %v598_v22 = vrot.slane %v7311_v56, 1 }
  0xbf   : > { %1041 = vrot.lane.b32.xlu1 %v597_v11, %s6900_s18  ;;  %v1606_v20 = vsel %vm1603_vm9, %v1573_v59, %v7236_v39  ;;  %v1508_v39 = vsel %vm1504_vm6, %v7022_v21, %v7204_v4 }
  0xc0   : > { %v7292_v36 = vpop.permute.xlu0 %830  ;;  %v1639_v55 = vsel %vm1636_vm10, %v1606_v20, %v1125_v19  ;;  %v1541_v19 = vsel %vm1537_vm7, %v1508_v39, %v7215_v17  ;;  %v600_v24 = vsel %vm9791_vm1, %v598_v22, %v599_v13  ;;  %v601_v17 = vrot.slane %v520_v27, 1 }
  0xc1   : > { %v7295_v42 = vpop.permute.xlu1 %925  ;;  %v1672_v10 = vsel %vm1669_vm11, %v1639_v55, %v1221_v33  ;;  %v1574_v57 = vsel %vm1570_vm8, %v1541_v19, %v7230_v34  ;;  %v775_v33 = vrot.slane %v7311_v56, 2  ;;  %v776_v34 = vrot.slane %v7318_v63, 2  ;;  %v345_v55 = vld [vmem:[%s6994_s14 + $0x70] sm:$0xff] }
  0xc2   : > { %1140 = vrot.lane.b32.xlu0 %v772_v29, %s6901_s19  ;;  %v1607_v21 = vsel %vm1603_vm9, %v1574_v57, %v7265_v5  ;;  %v420_v22 = vrot.slane %v345_v55, 7 }
  0xc3   : > { %1426 = vrot.lane.b32.xlu1 %v774_v41, %s6905_s11  ;;  %v1640_v4 = vsel %vm1636_vm10, %v1607_v21, %v1127_v31  ;;  %v602_v31 = vsel %vm9791_vm1, %v599_v13, %v601_v17  ;;  %v779_v59 = vsel %vm739_vm2, %v776_v34, %v778_v48 }
  0xc4   : > { %v1223_v46 = vpop.permute.xlu0 %1222  ;;  %v7392_v19 = vsel %vm396_vm0, 0.0, %v420_v22 }
  0xc5   : > { %v1317_v50 = vpop.permute.xlu1 %1316 }
  0xc6   : > { %669 = vrot.lane.b32.xlu0 %v597_v11, %s6897_s15  ;;  %v1705_v14 = vsel %vm1702_vm12, %v1672_v10, %v1317_v50  ;;  %v346_v10 = vld [vmem:[%s6994_s14 + $0x78] sm:$0xff] }
  0xc7   : > { %844 = vrot.lane.b32.xlu1 %v772_v29, %s6899_s17  ;;  %v1673_v29 = vsel %vm1669_vm11, %v1640_v4, %v1223_v46  ;;  %v777_v46 = vsel %vm739_vm2, %v775_v33, %v776_v34 }
  0xc8   : > { %v7308_v54 = vpop.permute.xlu0 %927 }
  0xc9   : > { %v7315_v62 = vpop.permute.xlu1 %1027 }
  0xca   : > { %1142 = vrot.lane.b32.xlu0 %v774_v41, %s6901_s19 }
  0xcb   : > { %1236 = vrot.lane.b32.xlu1 %v7311_v56, %s6902_s20 }
  0xcc   : > { %v1319_v12 = vpop.permute.xlu0 %1318 }
  0xcd   : > { %v1413_v15 = vpop.permute.xlu1 %1412 }
  0xce   : > { %v1738_v23 = vsel %vm1735_vm13, %v1705_v14, %v1413_v15  ;;  %846 = vrot.lane.b32.xlu0 %v774_v41, %s6899_s17  ;;  %v1706_v41 = vsel %vm1702_vm12, %v1673_v29, %v1319_v12  ;;  %v421_v14 = vrot.slane %v346_v10, 7  ;;  %v1509_v15 = vsel %vm1504_vm6, %v7046_v37, %v7259_v58 }
  0xcf   : > { %941 = vrot.lane.b32.xlu1 %v7311_v56, %s6898_s16  ;;  %6407 = vmatprep.mubr.msk.f32.mxu0 %vm9793_vm14, %v1738_v23  ;;  %v1542_v23 = vsel %vm1537_vm7, %v1509_v15, %v7286_v30 }
  0xd0   : > { %v7340_v51 = vpop.permute.xlu0 %655  ;;  %v7399_v57 = vsel %vm396_vm0, %v420_v22, %v421_v14 }
  0xd1   : > { %v7346_v11 = vpop.permute.xlu1 %1029  ;;  %v604_v4 = vrot.slane %v7399_v57, 1 }
  0xd2   : > { %1238 = vrot.lane.b32.xlu0 %v7318_v63, %s6902_s20 }
  0xd3   : > { %1332 = vrot.lane.b32.xlu1 %v600_v24, %s6904_s29 }
  0xd4   : > { %v1129_v32 = vpop.permute.xlu0 %1128 }
  0xd5   : > { %v1415_v43 = vpop.permute.xlu1 %1414 }
  0xd6   : > { %v1739_v5 = vsel %vm1735_vm13, %v1706_v41, %v1415_v43  ;;  %943 = vrot.lane.b32.xlu0 %v7318_v63, %s6898_s16  ;;  %v521_v43 = vsel %vm396_vm0, %v421_v14, 0.0 }
  0xd7   : > { %1043 = vrot.lane.b32.xlu1 %v600_v24, %s6900_s18  ;;  %6408 = vmatmul.mubr.msk.f32.gmra.mrb[2].mxu0 %vm9793_vm14, %v1739_v5  ;;  %v783_v14 = vrot.slane %v521_v43, 2 }
  0xd8   : > { %v7364_v44 = vpop.permute.xlu0 %657 }
  0xd9   : > { %v7367_v49 = vpop.permute.xlu1 %832 }
  0xda   : > { %1334 = vrot.lane.b32.xlu0 %v602_v31, %s6904_s29 }
  0xdb   : > { %1428 = vrot.lane.b32.xlu1 %v777_v46, %s6905_s11 }
  0xdc   : > { %v1131_v50 = vpop.permute.xlu0 %1130 }
  0xdd   : > { %v1225_v52 = vpop.permute.xlu1 %1224 }
  0xde   : > { %671 = vrot.lane.b32.xlu0 %v600_v24, %s6897_s15  ;;  %v1575_v24 = vsel %vm1570_vm8, %v1542_v23, %v7295_v42  ;;  %v603_v42 = vrot.slane %v7392_v19, 1 }
  0xdf   : > { %1045 = vrot.lane.b32.xlu1 %v602_v31, %s6900_s18  ;;  %v1608_v37 = vsel %vm1603_vm9, %v1575_v24, %v7315_v62  ;;  %v1510_v62 = vsel %vm1504_vm6, %v7049_v38, %v7283_v28 }
  0xe0   : > { %v7373_v53 = vpop.permute.xlu0 %834  ;;  %v1641_v58 = vsel %vm1636_vm10, %v1608_v37, %v1129_v32  ;;  %v1543_v32 = vsel %vm1537_vm7, %v1510_v62, %v7292_v36  ;;  %v605_v41 = vsel %vm9791_vm1, %v603_v42, %v604_v4  ;;  %v606_v36 = vrot.slane %v521_v43, 1 }
  0xe1   : > { %v7376_v20 = vpop.permute.xlu1 %929  ;;  %v1674_v30 = vsel %vm1669_vm11, %v1641_v58, %v1225_v52  ;;  %v1576_v5 = vsel %vm1570_vm8, %v1543_v32, %v7308_v54  ;;  %v780_v52 = vrot.slane %v7392_v19, 2  ;;  %v781_v54 = vrot.slane %v7399_v57, 2  ;;  %v347_v58 = vld [vmem:[%s6994_s14 + $0x80] sm:$0xff] }
  0xe2   : > { %1144 = vrot.lane.b32.xlu0 %v777_v46, %s6901_s19  ;;  %v1609_v38 = vsel %vm1603_vm9, %v1576_v5, %v7346_v11  ;;  %v423_v42 = vrot.slane %v347_v58, 7 }
  0xe3   : > { %1430 = vrot.lane.b32.xlu1 %v779_v59, %s6905_s11  ;;  %v1642_v28 = vsel %vm1636_vm10, %v1609_v38, %v1131_v50  ;;  %v607_v50 = vsel %vm9791_vm1, %v604_v4, %v606_v36  ;;  %v784_v24 = vsel %vm739_vm2, %v781_v54, %v783_v14 }
  0xe4   : > { %v1227_v12 = vpop.permute.xlu0 %1226  ;;  %v7473_v32 = vsel %vm396_vm0, 0.0, %v423_v42 }
  0xe5   : > { %v1321_v13 = vpop.permute.xlu1 %1320 }
  0xe6   : > { %673 = vrot.lane.b32.xlu0 %v602_v31, %s6897_s15  ;;  %v1707_v17 = vsel %vm1702_vm12, %v1674_v30, %v1321_v13  ;;  %v348_v30 = vld [vmem:[%s6994_s14 + $0x88] sm:$0xff] }
  0xe7   : > { %848 = vrot.lane.b32.xlu1 %v777_v46, %s6899_s17  ;;  %v1675_v46 = vsel %vm1669_vm11, %v1642_v28, %v1227_v12  ;;  %v782_v12 = vsel %vm739_vm2, %v780_v52, %v781_v54 }
  0xe8   : > { %v7389_v39 = vpop.permute.xlu0 %931 }
  0xe9   : > { %v7396_v27 = vpop.permute.xlu1 %1031 }
  0xea   : > { %1146 = vrot.lane.b32.xlu0 %v779_v59, %s6901_s19 }
  0xeb   : > { %1240 = vrot.lane.b32.xlu1 %v7392_v19, %s6902_s20 }
  0xec   : > { %v1323_v21 = vpop.permute.xlu0 %1322 }
  0xed   : > { %v1417_v29 = vpop.permute.xlu1 %1416 }
  0xee   : > { %v1740_v33 = vsel %vm1735_vm13, %v1707_v17, %v1417_v29  ;;  %850 = vrot.lane.b32.xlu0 %v779_v59, %s6899_s17  ;;  %v1708_v59 = vsel %vm1702_vm12, %v1675_v46, %v1323_v21  ;;  %v424_v17 = vrot.slane %v348_v30, 7  ;;  %v1511_v29 = vsel %vm1504_vm6, %v7096_v60, %v7340_v51 }
  0xef   : > { %945 = vrot.lane.b32.xlu1 %v7392_v19, %s6898_s16  ;;  %6410 = vmatprep.mubr.msk.f32.mxu0 %vm9793_vm14, %v1740_v33  ;;  %v1544_v33 = vsel %vm1537_vm7, %v1511_v29, %v7367_v49 }
  0xf0   : > { %v7421_v34 = vpop.permute.xlu0 %659  ;;  %v7480_v5 = vsel %vm396_vm0, %v423_v42, %v424_v17 }
  0xf1   : > { %v7427_v31 = vpop.permute.xlu1 %1033  ;;  %v609_v28 = vrot.slane %v7480_v5, 1 }
  0xf2   : > { %1242 = vrot.lane.b32.xlu0 %v7399_v57, %s6902_s20 }
  0xf3   : > { %1336 = vrot.lane.b32.xlu1 %v605_v41, %s6904_s29 }
  0xf4   : > { %v1133_v48 = vpop.permute.xlu0 %1132 }
  0xf5   : > { %v1419_v55 = vpop.permute.xlu1 %1418 }
  0xf6   : > { %v1741_v11 = vsel %vm1735_vm13, %v1708_v59, %v1419_v55  ;;  %947 = vrot.lane.b32.xlu0 %v7399_v57, %s6898_s16  ;;  %v522_v55 = vsel %vm396_vm0, %v424_v17, 0.0 }
  0xf7   : > { %1047 = vrot.lane.b32.xlu1 %v605_v41, %s6900_s18  ;;  %6411 = vmatmul.mubr.msk.f32.gmra.mrb[4].mxu0 %vm9793_vm14, %v1741_v11  ;;  %v788_v17 = vrot.slane %v522_v55, 2 }
  0xf8   : > { %v7445_v10 = vpop.permute.xlu0 %661 }
  0xf9   : > { %v7448_v22 = vpop.permute.xlu1 %836 }
  0xfa   : > { %1338 = vrot.lane.b32.xlu0 %v607_v50, %s6904_s29 }
  0xfb   : > { %1432 = vrot.lane.b32.xlu1 %v782_v12, %s6905_s11 }
  0xfc   : > { %v1135_v13 = vpop.permute.xlu0 %1134 }
  0xfd   : > { %v1229_v15 = vpop.permute.xlu1 %1228 }
  0xfe   : > { %675 = vrot.lane.b32.xlu0 %v605_v41, %s6897_s15  ;;  %v1577_v41 = vsel %vm1570_vm8, %v1544_v33, %v7376_v20  ;;  %v608_v20 = vrot.slane %v7473_v32, 1 }
  0xff   : > { %1049 = vrot.lane.b32.xlu1 %v607_v50, %s6900_s18  ;;  %v1610_v60 = vsel %vm1603_vm9, %v1577_v41, %v7396_v27  ;;  %v1512_v27 = vsel %vm1504_vm6, %v7099_v61, %v7364_v44 }
 0x100   : > { %v7454_v23 = vpop.permute.xlu0 %838  ;;  %v1643_v51 = vsel %vm1636_vm10, %v1610_v60, %v1133_v48  ;;  %v1545_v48 = vsel %vm1537_vm7, %v1512_v27, %v7373_v53  ;;  %v610_v59 = vsel %vm9791_vm1, %v608_v20, %v609_v28  ;;  %v611_v53 = vrot.slane %v522_v55, 1 }
 0x101   : > { %v7457_v37 = vpop.permute.xlu1 %933  ;;  %v1676_v49 = vsel %vm1669_vm11, %v1643_v51, %v1229_v15  ;;  %v1578_v11 = vsel %vm1570_vm8, %v1545_v48, %v7389_v39  ;;  %v785_v15 = vrot.slane %v7473_v32, 2  ;;  %v786_v39 = vrot.slane %v7480_v5, 2  ;;  %v349_v51 = vld [vmem:[%s6994_s14 + $0x90] sm:$0xff] }
 0x102   : > { %1148 = vrot.lane.b32.xlu0 %v782_v12, %s6901_s19  ;;  %v1611_v61 = vsel %vm1603_vm9, %v1578_v11, %v7427_v31  ;;  %v426_v20 = vrot.slane %v349_v51, 7 }
 0x103   : > { %1434 = vrot.lane.b32.xlu1 %v784_v24, %s6905_s11  ;;  %v1644_v44 = vsel %vm1636_vm10, %v1611_v61, %v1135_v13  ;;  %v612_v13 = vsel %vm9791_vm1, %v609_v28, %v611_v53  ;;  %v789_v41 = vsel %vm739_vm2, %v786_v39, %v788_v17 }
 0x104   : > { %v1231_v21 = vpop.permute.xlu0 %1230  ;;  %v7554_v48 = vsel %vm396_vm0, 0.0, %v426_v20 }
 0x105   : > { %v1325_v4 = vpop.permute.xlu1 %1324 }
 0x106   : > { %677 = vrot.lane.b32.xlu0 %v607_v50, %s6897_s15  ;;  %v1709_v36 = vsel %vm1702_vm12, %v1676_v49, %v1325_v4  ;;  %v350_v49 = vld [vmem:[%s6994_s14 + $0x98] sm:$0xff] }
 0x107   : > { %852 = vrot.lane.b32.xlu1 %v782_v12, %s6899_s17  ;;  %v1677_v12 = vsel %vm1669_vm11, %v1644_v44, %v1231_v21  ;;  %v787_v21 = vsel %vm739_vm2, %v785_v15, %v786_v39 }
 0x108   : > { %v7470_v62 = vpop.permute.xlu0 %935 }
 0x109   : > { %v7477_v43 = vpop.permute.xlu1 %1035 }
 0x10a   : > { %1150 = vrot.lane.b32.xlu0 %v784_v24, %s6901_s19 }
 0x10b   : > { %1244 = vrot.lane.b32.xlu1 %v7473_v32, %s6902_s20 }
 0x10c   : > { %v1327_v38 = vpop.permute.xlu0 %1326 }
 0x10d   : > { %v1421_v46 = vpop.permute.xlu1 %1420 }
 0x10e   : > { %v1742_v52 = vsel %vm1735_vm13, %v1709_v36, %v1421_v46  ;;  %854 = vrot.lane.b32.xlu0 %v784_v24, %s6899_s17  ;;  %v1710_v24 = vsel %vm1702_vm12, %v1677_v12, %v1327_v38  ;;  %v427_v36 = vrot.slane %v350_v49, 7  ;;  %v1513_v46 = vsel %vm1504_vm6, %v7133_v25, %v7421_v34 }
 0x10f   : > { %949 = vrot.lane.b32.xlu1 %v7473_v32, %s6898_s16  ;;  %6413 = vmatprep.mubr.msk.f32.mxu0 %vm9793_vm14, %v1742_v52  ;;  %v1546_v52 = vsel %vm1537_vm7, %v1513_v46, %v7448_v22 }
 0x110   : > { %v7502_v54 = vpop.permute.xlu0 %663  ;;  %v7561_v11 = vsel %vm396_vm0, %v426_v20, %v427_v36 }
 0x111   : > { %v7508_v50 = vpop.permute.xlu1 %1037  ;;  %v614_v44 = vrot.slane %v7561_v11, 1 }
 0x112   : > { %1246 = vrot.lane.b32.xlu0 %v7480_v5, %s6902_s20 }
 0x113   : > { %1340 = vrot.lane.b32.xlu1 %v610_v59, %s6904_s29 }
 0x114   : > { %v1137_v14 = vpop.permute.xlu0 %1136 }
 0x115   : > { %v1423_v58 = vpop.permute.xlu1 %1422 }
 0x116   : > { %v1743_v31 = vsel %vm1735_vm13, %v1710_v24, %v1423_v58  ;;  %951 = vrot.lane.b32.xlu0 %v7480_v5, %s6898_s16  ;;  %v523_v58 = vsel %vm396_vm0, %v427_v36, 0.0 }
 0x117   : > { %1051 = vrot.lane.b32.xlu1 %v610_v59, %s6900_s18  ;;  %6414 = vmatmul.mubr.msk.f32.gmra.mrb[6].mxu0 %vm9793_vm14, %v1743_v31  ;;  %v793_v36 = vrot.slane %v523_v58, 2 }
 0x118   : > { %v7526_v30 = vpop.permute.xlu0 %665 }
 0x119   : > { %v7529_v42 = vpop.permute.xlu1 %840 }
 0x11a   : > { %1342 = vrot.lane.b32.xlu0 %v612_v13, %s6904_s29 }
 0x11b   : > { %1436 = vrot.lane.b32.xlu1 %v787_v21, %s6905_s11 }
 0x11c   : > { %v1139_v4 = vpop.permute.xlu0 %1138 }
 0x11d   : > { %v1233_v29 = vpop.permute.xlu1 %1232 }
 0x11e   : > { %679 = vrot.lane.b32.xlu0 %v610_v59, %s6897_s15  ;;  %v1579_v59 = vsel %vm1570_vm8, %v1546_v52, %v7457_v37  ;;  %v613_v37 = vrot.slane %v7554_v48, 1 }
 0x11f   : > { %1053 = vrot.lane.b32.xlu1 %v612_v13, %s6900_s18  ;;  %v1612_v25 = vsel %vm1603_vm9, %v1579_v59, %v7477_v43  ;;  %v1514_v43 = vsel %vm1504_vm6, %v7136_v26, %v7445_v10 }
 0x120   : > { %v7535_v33 = vpop.permute.xlu0 %842  ;;  %v1645_v34 = vsel %vm1636_vm10, %v1612_v25, %v1137_v14  ;;  %v1547_v14 = vsel %vm1537_vm7, %v1514_v43, %v7454_v23  ;;  %v615_v24 = vsel %vm9791_vm1, %v613_v37, %v614_v44  ;;  %v616_v23 = vrot.slane %v523_v58, 1 }
 0x121   : > { %v7538_v60 = vpop.permute.xlu1 %937  ;;  %v1678_v22 = vsel %vm1669_vm11, %v1645_v34, %v1233_v29  ;;  %v1580_v31 = vsel %vm1570_vm8, %v1547_v14, %v7470_v62  ;;  %v790_v29 = vrot.slane %v7554_v48, 2  ;;  %v791_v62 = vrot.slane %v7561_v11, 2  ;;  %v351_v34 = vld [vmem:[%s6994_s14 + $0xa0] sm:$0xff] }
 0x122   : > { %1152 = vrot.lane.b32.xlu0 %v787_v21, %s6901_s19  ;;  %v1613_v26 = vsel %vm1603_vm9, %v1580_v31, %v7508_v50  ;;  %v429_v37 = vrot.slane %v351_v34, 7 }
 0x123   : > { %1438 = vrot.lane.b32.xlu1 %v789_v41, %s6905_s11  ;;  %v1646_v10 = vsel %vm1636_vm10, %v1613_v26, %v1139_v4  ;;  %v617_v4 = vsel %vm9791_vm1, %v614_v44, %v616_v23  ;;  %v794_v59 = vsel %vm739_vm2, %v791_v62, %v793_v36 }
 0x124   : > { %v1235_v38 = vpop.permute.xlu0 %1234  ;;  %v7635_v14 = vsel %vm396_vm0, 0.0, %v429_v37 }
 0x125   : > { %v1329_v28 = vpop.permute.xlu1 %1328 }
 0x126   : > { %681 = vrot.lane.b32.xlu0 %v612_v13, %s6897_s15  ;;  %v1711_v53 = vsel %vm1702_vm12, %v1678_v22, %v1329_v28  ;;  %v352_v22 = vld [vmem:[%s6994_s14 + $0xa8] sm:$0xff] }
 0x127   : > { %856 = vrot.lane.b32.xlu1 %v787_v21, %s6899_s17  ;;  %v1679_v21 = vsel %vm1669_vm11, %v1646_v10, %v1235_v38  ;;  %v792_v38 = vsel %vm739_vm2, %v790_v29, %v791_v62 }
 0x128   : > { %v7551_v27 = vpop.permute.xlu0 %939 }
 0x129   : > { %v7558_v55 = vpop.permute.xlu1 %1039 }
 0x12a   : > { %1154 = vrot.lane.b32.xlu0 %v789_v41, %s6901_s19 }
 0x12b   : > { %1248 = vrot.lane.b32.xlu1 %v7554_v48, %s6902_s20 }
 0x12c   : > { %v1331_v61 = vpop.permute.xlu0 %1330 }
 0x12d   : > { %v1425_v12 = vpop.permute.xlu1 %1424 }
 0x12e   : > { %v1744_v15 = vsel %vm1735_vm13, %v1711_v53, %v1425_v12  ;;  %858 = vrot.lane.b32.xlu0 %v789_v41, %s6899_s17  ;;  %v1712_v41 = vsel %vm1702_vm12, %v1679_v21, %v1331_v61  ;;  %v430_v53 = vrot.slane %v352_v22, 7  ;;  %v1515_v12 = vsel %vm1504_vm6, %v7172_v45, %v7502_v54 }
 0x12f   : > { %953 = vrot.lane.b32.xlu1 %v7554_v48, %s6898_s16  ;;  %6416 = vmatprep.mubr.msk.f32.mxu0 %vm9793_vm14, %v1744_v15  ;;  %v1548_v15 = vsel %vm1537_vm7, %v1515_v12, %v7529_v42 }
 0x130   : > { %v7583_v39 = vpop.permute.xlu0 %667  ;;  %v7642_v31 = vsel %vm396_vm0, %v429_v37, %v430_v53 }
 0x131   : > { %v7589_v13 = vpop.permute.xlu1 %1041  ;;  %v619_v10 = vrot.slane %v7642_v31, 1 }
 0x132   : > { %1250 = vrot.lane.b32.xlu0 %v7561_v11, %s6902_s20 }
 0x133   : > { %1344 = vrot.lane.b32.xlu1 %v615_v24, %s6904_s29 }
 0x134   : > { %v1141_v17 = vpop.permute.xlu0 %1140 }
 0x135   : > { %v1427_v51 = vpop.permute.xlu1 %1426 }
 0x136   : > { %v1745_v50 = vsel %vm1735_vm13, %v1712_v41, %v1427_v51  ;;  %955 = vrot.lane.b32.xlu0 %v7561_v11, %s6898_s16  ;;  %v524_v51 = vsel %vm396_vm0, %v430_v53, 0.0 }
 0x137   : > { %1055 = vrot.lane.b32.xlu1 %v615_v24, %s6900_s18  ;;  %6417 = vmatmul.mubr.msk.f32.gmra.mrb[8].mxu0 %vm9793_vm14, %v1745_v50  ;;  %v798_v53 = vrot.slane %v524_v51, 2 }
 0x138   : > { %v7607_v49 = vpop.permute.xlu0 %669 }
 0x139   : > { %v7610_v20 = vpop.permute.xlu1 %844 }
 0x13a   : > { %1346 = vrot.lane.b32.xlu0 %v617_v4, %s6904_s29 }
 0x13b   : > { %1440 = vrot.lane.b32.xlu1 %v792_v38, %s6905_s11 }
 0x13c   : > { %v1143_v28 = vpop.permute.xlu0 %1142 }
 0x13d   : > { %v1237_v46 = vpop.permute.xlu1 %1236 }
 0x13e   : > { %683 = vrot.lane.b32.xlu0 %v615_v24, %s6897_s15  ;;  %v1581_v24 = vsel %vm1570_vm8, %v1548_v15, %v7538_v60  ;;  %v618_v60 = vrot.slane %v7635_v14, 1 }
 0x13f   : > { %1057 = vrot.lane.b32.xlu1 %v617_v4, %s6900_s18  ;;  %v1614_v45 = vsel %vm1603_vm9, %v1581_v24, %v7558_v55  ;;  %v1516_v55 = vsel %vm1504_vm6, %v7175_v47, %v7526_v30 }
 0x140   : > { %v7616_v52 = vpop.permute.xlu0 %846  ;;  %v1647_v54 = vsel %vm1636_vm10, %v1614_v45, %v1141_v17  ;;  %v1549_v17 = vsel %vm1537_vm7, %v1516_v55, %v7535_v33  ;;  %v620_v41 = vsel %vm9791_vm1, %v618_v60, %v619_v10  ;;  %v621_v33 = vrot.slane %v524_v51, 1 }
 0x141   : > { %v7619_v25 = vpop.permute.xlu1 %941  ;;  %v1680_v42 = vsel %vm1669_vm11, %v1647_v54, %v1237_v46  ;;  %v1582_v50 = vsel %vm1570_vm8, %v1549_v17, %v7551_v27  ;;  %v795_v46 = vrot.slane %v7635_v14, 2  ;;  %v796_v27 = vrot.slane %v7642_v31, 2  ;;  %v353_v54 = vld [vmem:[%s6994_s14 + $0xb0] sm:$0xff] }
 0x142   : > { %1156 = vrot.lane.b32.xlu0 %v792_v38, %s6901_s19  ;;  %v1615_v47 = vsel %vm1603_vm9, %v1582_v50, %v7589_v13  ;;  %v432_v60 = vrot.slane %v353_v54, 7 }
 0x143   : > { %1442 = vrot.lane.b32.xlu1 %v794_v59, %s6905_s11  ;;  %v1648_v30 = vsel %vm1636_vm10, %v1615_v47, %v1143_v28  ;;  %v622_v28 = vsel %vm9791_vm1, %v619_v10, %v621_v33  ;;  %v799_v24 = vsel %vm739_vm2, %v796_v27, %v798_v53 }
 0x144   : > { %v1239_v61 = vpop.permute.xlu0 %1238  ;;  %v7716_v17 = vsel %vm396_vm0, 0.0, %v432_v60 }
 0x145   : > { %v1333_v44 = vpop.permute.xlu1 %1332  ;;  %9799 = vst [vmem:[#allocation2_spill] sm:$0xff] %v7716_v17 }
 0x146   : > { %685 = vrot.lane.b32.xlu0 %v617_v4, %s6897_s15  ;;  %v1713_v23 = vsel %vm1702_vm12, %v1680_v42, %v1333_v44  ;;  %v354_v42 = vld [vmem:[%s6994_s14 + $0xb8] sm:$0xff] }
 0x147   : > { %860 = vrot.lane.b32.xlu1 %v792_v38, %s6899_s17  ;;  %v1681_v38 = vsel %vm1669_vm11, %v1648_v30, %v1239_v61  ;;  %v797_v61 = vsel %vm739_vm2, %v795_v46, %v796_v27 }
 0x148   : > { %v7632_v43 = vpop.permute.xlu0 %943 }
 0x149   : > { %v7639_v58 = vpop.permute.xlu1 %1043 }
 0x14a   : > { %1158 = vrot.lane.b32.xlu0 %v794_v59, %s6901_s19 }
 0x14b   : > { %1252 = vrot.lane.b32.xlu1 %v7635_v14, %s6902_s20 }
 0x14c   : > { %v1335_v26 = vpop.permute.xlu0 %1334 }
 0x14d   : > { %v1429_v21 = vpop.permute.xlu1 %1428 }
 0x14e   : > { %v1746_v29 = vsel %vm1735_vm13, %v1713_v23, %v1429_v21  ;;  %862 = vrot.lane.b32.xlu0 %v794_v59, %s6899_s17  ;;  %v1714_v59 = vsel %vm1702_vm12, %v1681_v38, %v1335_v26  ;;  %v433_v23 = vrot.slane %v354_v42, 7  ;;  %v1517_v21 = vsel %vm1504_vm6, %v7233_v35, %v7583_v39 }
 0x14f   : > { %957 = vrot.lane.b32.xlu1 %v7635_v14, %s6898_s16  ;;  %6419 = vmatprep.mubr.msk.f32.mxu0 %vm9793_vm14, %v1746_v29  ;;  %v1550_v29 = vsel %vm1537_vm7, %v1517_v21, %v7610_v20 }
 0x150   : > { %v7664_v62 = vpop.permute.xlu0 %671  ;;  %v7723_v50 = vsel %vm396_vm0, %v432_v60, %v433_v23 }
 0x151   : > { %v7670_v4 = vpop.permute.xlu1 %1045  ;;  %9800 = vst [vmem:[#allocation3_spill] sm:$0xff] %v7723_v50  ;;  %v624_v30 = vrot.slane %v7723_v50, 1 }
 0x152   : > { %1254 = vrot.lane.b32.xlu0 %v7642_v31, %s6902_s20 }
 0x153   : > { %1348 = vrot.lane.b32.xlu1 %v620_v41, %s6904_s29 }
 0x154   : > { %v1145_v36 = vpop.permute.xlu0 %1144 }
 0x155   : > { %v1431_v34 = vpop.permute.xlu1 %1430 }
 0x156   : > { %v1747_v13 = vsel %vm1735_vm13, %v1714_v59, %v1431_v34  ;;  %959 = vrot.lane.b32.xlu0 %v7642_v31, %s6898_s16  ;;  %v525_v34 = vsel %vm396_vm0, %v433_v23, 0.0 }
 0x157   : > { %1059 = vrot.lane.b32.xlu1 %v620_v41, %s6900_s18  ;;  %6420 = vmatmul.mubr.msk.f32.gmra.mrb[10].mxu0 %vm9793_vm14, %v1747_v13  ;;  %v803_v23 = vrot.slane %v525_v34, 2 }
 0x158   : > { %v7688_v22 = vpop.permute.xlu0 %673 }
 0x159   : > { %v7691_v37 = vpop.permute.xlu1 %848 }
 0x15a   : > { %1350 = vrot.lane.b32.xlu0 %v622_v28, %s6904_s29 }
 0x15b   : > { %1444 = vrot.lane.b32.xlu1 %v797_v61, %s6905_s11 }
 0x15c   : > { %v1147_v44 = vpop.permute.xlu0 %1146 }
 0x15d   : > { %v1241_v12 = vpop.permute.xlu1 %1240 }
 0x15e   : > { %687 = vrot.lane.b32.xlu0 %v620_v41, %s6897_s15  ;;  %v1583_v41 = vsel %vm1570_vm8, %v1550_v29, %v7619_v25  ;;  %v623_v25 = vrot.slane %v7716_v17, 1 }
 0x15f   : > { %1061 = vrot.lane.b32.xlu1 %v622_v28, %s6900_s18  ;;  %v1616_v35 = vsel %vm1603_vm9, %v1583_v41, %v7639_v58  ;;  %v1518_v58 = vsel %vm1504_vm6, %v7239_v40, %v7607_v49 }
 0x160   : > { %v7697_v15 = vpop.permute.xlu0 %850  ;;  %v1649_v39 = vsel %vm1636_vm10, %v1616_v35, %v1145_v36  ;;  %v1551_v36 = vsel %vm1537_vm7, %v1518_v58, %v7616_v52  ;;  %v625_v59 = vsel %vm9791_vm1, %v623_v25, %v624_v30  ;;  %v626_v52 = vrot.slane %v525_v34, 1 }
 0x161   : > { %v7700_v45 = vpop.permute.xlu1 %945  ;;  %v1682_v20 = vsel %vm1669_vm11, %v1649_v39, %v1241_v12  ;;  %v1584_v13 = vsel %vm1570_vm8, %v1551_v36, %v7632_v43  ;;  %v800_v12 = vrot.slane %v7716_v17, 2  ;;  %v801_v43 = vrot.slane %v7723_v50, 2  ;;  %v355_v39 = vld [vmem:[%s6994_s14 + $0xc0] sm:$0xff] }
 0x162   : > { %1160 = vrot.lane.b32.xlu0 %v797_v61, %s6901_s19  ;;  %v1617_v40 = vsel %vm1603_vm9, %v1584_v13, %v7670_v4  ;;  %v435_v25 = vrot.slane %v355_v39, 7 }
 0x163   : > { %1446 = vrot.lane.b32.xlu1 %v799_v24, %s6905_s11  ;;  %v1650_v49 = vsel %vm1636_vm10, %v1617_v40, %v1147_v44  ;;  %v627_v44 = vsel %vm9791_vm1, %v624_v30, %v626_v52  ;;  %v804_v41 = vsel %vm739_vm2, %v801_v43, %v803_v23 }
 0x164   : > { %v1243_v26 = vpop.permute.xlu0 %1242  ;;  %v7797_v36 = vsel %vm396_vm0, 0.0, %v435_v25 }
 0x165   : > { %v1337_v10 = vpop.permute.xlu1 %1336  ;;  %9801 = vst [vmem:[#allocation4_spill] sm:$0xff] %v7797_v36  ;;  %v628_v52 = vrot.slane %v7797_v36, 1 }
 0x166   : > { %689 = vrot.lane.b32.xlu0 %v622_v28, %s6897_s15  ;;  %v1715_v33 = vsel %vm1702_vm12, %v1682_v20, %v1337_v10  ;;  %v356_v20 = vld [vmem:[%s6994_s14 + $0xc8] sm:$0xff] }
 0x167   : > { %864 = vrot.lane.b32.xlu1 %v797_v61, %s6899_s17  ;;  %v1683_v61 = vsel %vm1669_vm11, %v1650_v49, %v1243_v26  ;;  %v802_v26 = vsel %vm739_vm2, %v800_v12, %v801_v43 }
 0x168   : > { %v7713_v55 = vpop.permute.xlu0 %947 }
 0x169   : > { %v7720_v51 = vpop.permute.xlu1 %1047 }
 0x16a   : > { %1162 = vrot.lane.b32.xlu0 %v799_v24, %s6901_s19 }
 0x16b   : > { %1256 = vrot.lane.b32.xlu1 %v7716_v17, %s6902_s20 }
 0x16c   : > { %v1339_v47 = vpop.permute.xlu0 %1338 }
 0x16d   : > { %v1433_v38 = vpop.permute.xlu1 %1432 }
 0x16e   : > { %v1748_v46 = vsel %vm1735_vm13, %v1715_v33, %v1433_v38  ;;  %866 = vrot.lane.b32.xlu0 %v799_v24, %s6899_s17  ;;  %v1716_v24 = vsel %vm1702_vm12, %v1683_v61, %v1339_v47  ;;  %v436_v33 = vrot.slane %v356_v20, 7  ;;  %v1519_v38 = vsel %vm1504_vm6, %v7311_v56, %v7664_v62 }
 0x16f   : > { %961 = vrot.lane.b32.xlu1 %v7716_v17, %s6898_s16  ;;  %6422 = vmatprep.mubr.msk.f32.mxu0 %vm9793_vm14, %v1748_v46  ;;  %v1552_v46 = vsel %vm1537_vm7, %v1519_v38, %v7691_v37 }
 0x170   : > { %v7745_v27 = vpop.permute.xlu0 %675  ;;  %v7804_v13 = vsel %vm396_vm0, %v435_v25, %v436_v33  ;;  %v805_v25 = vrot.slane %v7797_v36, 2 }
 0x171   : > { %v7751_v28 = vpop.permute.xlu1 %1049  ;;  %9802 = vst [vmem:[#allocation5_spill] sm:$0xff] %v7804_v13  ;;  %v629_v61 = vrot.slane %v7804_v13, 1 }
 0x172   : > { %1258 = vrot.lane.b32.xlu0 %v7723_v50, %s6902_s20 }
 0x173   : > { %1352 = vrot.lane.b32.xlu1 %v625_v59, %s6904_s29 }
 0x174   : > { %v1149_v53 = vpop.permute.xlu0 %1148 }
 0x175   : > { %v1435_v54 = vpop.permute.xlu1 %1434 }
 0x176   : > { %v1749_v4 = vsel %vm1735_vm13, %v1716_v24, %v1435_v54  ;;  %963 = vrot.lane.b32.xlu0 %v7723_v50, %s6898_s16 }
 0x177   : > { %1063 = vrot.lane.b32.xlu1 %v625_v59, %s6900_s18  ;;  %6423 = vmatmul.mubr.msk.f32.gmra.mrb[12].mxu0 %vm9793_vm14, %v1749_v4  ;;  %v630_v4 = vsel %vm9791_vm1, %v628_v52, %v629_v61  ;;  %v357_v52 = vld [vmem:[%s6994_s14 + $0xd0] sm:$0xff] }
 0x178   : > { %v7769_v42 = vpop.permute.xlu0 %677 }
 0x179   : > { %v7772_v60 = vpop.permute.xlu1 %852  ;;  %v1522_v0 = vsel %vm1504_vm6, %v7399_v57, %v7769_v42 }
 0x17a   : > { %1354 = vrot.lane.b32.xlu0 %v627_v44, %s6904_s29 }
 0x17b   : > { %1448 = vrot.lane.b32.xlu1 %v802_v26, %s6905_s11 }
 0x17c   : > { %v1151_v10 = vpop.permute.xlu0 %1150 }
 0x17d   : > { %v1245_v21 = vpop.permute.xlu1 %1244 }
 0x17e   : > { %691 = vrot.lane.b32.xlu0 %v625_v59, %s6897_s15  ;;  %v1585_v59 = vsel %vm1570_vm8, %v1552_v46, %v7700_v45 }
 0x17f   : > { %1065 = vrot.lane.b32.xlu1 %v627_v44, %s6900_s18  ;;  %v1618_v56 = vsel %vm1603_vm9, %v1585_v59, %v7720_v51  ;;  %v358_v59 = vld [vmem:[%s6994_s14 + $0xd8] sm:$0xff] }
 0x180   : > { %v7778_v29 = vpop.permute.xlu0 %854  ;;  %v1651_v37 = vsel %vm1636_vm10, %v1618_v56, %v1149_v53  ;;  %v1520_v53 = vsel %vm1504_vm6, %v7318_v63, %v7688_v22  ;;  %v7858_v56 = vld [vmem:[%s9770_s2] ss:$0 sm:$0xff] }
 0x181   : > { %v7781_v35 = vpop.permute.xlu1 %949  ;;  %v1684_v49 = vsel %vm1669_vm11, %v1651_v37, %v1245_v21  ;;  %v1553_v24 = vsel %vm1537_vm7, %v1520_v53, %v7697_v15  ;;  %v6906_v15 = vmov 1983009808  }
 0x182   : > { %1164 = vrot.lane.b32.xlu0 %v802_v26, %s6901_s19  ;;  %v2139_v21 = vunpack.c.l.s4 %v6906_v15 }
 0x183   : > { %1450 = vrot.lane.b32.xlu1 %v804_v41, %s6905_s11 }
 0x184   : > { %v1247_v47 = vpop.permute.xlu0 %1246  ;;  %v2140_v38 = vunpack.c.0.s8 %v2139_v21 }
 0x185   : > { %v1341_v30 = vpop.permute.xlu1 %1340 }
 0x186   : > { %693 = vrot.lane.b32.xlu0 %v627_v44, %s6897_s15  ;;  %v1717_v12 = vsel %vm1702_vm12, %v1684_v49, %v1341_v30  ;;  %v526_v44 = vsel %vm396_vm0, %v436_v33, 0.0 }
 0x187   : > { %868 = vrot.lane.b32.xlu1 %v802_v26, %s6899_s17  ;;  %v1586_v26 = vsel %vm1570_vm8, %v1553_v24, %v7713_v55  ;;  %v631_v39 = vrot.slane %v526_v44, 1  ;;  %v808_v24 = vrot.slane %v526_v44, 2 }
 0x188   : > { %v7794_v58 = vpop.permute.xlu0 %951  ;;  %v1619_v63 = vsel %vm1603_vm9, %v1586_v26, %v7751_v28  ;;  %v806_v28 = vrot.slane %v7804_v13, 2  ;;  %v438_v26 = vrot.slane %v357_v52, 7 }
 0x189   : > { %v7801_v34 = vpop.permute.xlu1 %1051  ;;  %v1652_v22 = vsel %vm1636_vm10, %v1619_v63, %v1151_v10 }
 0x18a   : > { %v6406_v62 = vpop.f32.mrb[0].mxu0  ;;  %1166 = vrot.lane.b32.xlu0 %v804_v41, %s6901_s19  ;;  %v1685_v20 = vsel %vm1669_vm11, %v1652_v22, %v1247_v47  ;;  %v632_v47 = vsel %vm9791_vm1, %v629_v61, %v631_v39  ;;  %v807_v49 = vsel %vm739_vm2, %v805_v25, %v806_v28  ;;  %v7887_v44 = vsel %vm396_vm0, 0.0, %v438_v26 }
 0x18b   : > { %1260 = vrot.lane.b32.xlu1 %v7797_v36, %s6902_s20  ;;  %v1946_v40 = vpop.f32.mrb[1].mxu0 }
 0x18c   : > { %v1343_v45 = vpop.permute.xlu0 %1342 }
 0x18d   : > { %v1437_v43 = vpop.permute.xlu1 %1436  ;;  %v1718_v30 = vsel %vm1702_vm12, %v1685_v20, %v1343_v45  ;;  %v633_v20 = vrot.slane %v7887_v44, 1 }
 0x18e   : > { %v1750_v51 = vsel %vm1735_vm13, %v1717_v12, %v1437_v43  ;;  %870 = vrot.lane.b32.xlu0 %v804_v41, %s6899_s17  ;;  %v2141_v41 = vlaneseq  ;;  %v439_v12 = vrot.slane %v358_v59, 7  ;;  %v1952_v43 = vadd.f32 %v6406_v62, %v7858_v56 }
 0x18f   : > { %965 = vrot.lane.b32.xlu1 %v7797_v36, %s6898_s16  ;;  %6425 = vmatprep.mubr.msk.f32.mxu0 %vm9793_vm14, %v1750_v51  ;;  %v1947_v51 = vadd.f32 %v7858_v56, %v1946_v40  ;;  %v7884_v40 = vsel %vm739_vm2, %v806_v28, %v808_v24 }
 0x190   : > { %v7826_v54 = vpop.permute.xlu0 %679  ;;  %v7849_v46 = vshrl.u32 %v2141_v41, 7  ;;  %v7877_v22 = vsel %vm396_vm0, %v438_v26, %v439_v12  ;;  %v2154_v15 = vcombine.high %v1952_v43, %v1952_v43  ;;  %v7899_v28 = vsel %vm396_vm0, %v439_v12, 0.0 }
 0x191   : > { %v7832_v23 = vpop.permute.xlu1 %1053  ;;  %v2137_v21 = vcombine.high %v1947_v51, %v1947_v51  ;;  %v9784_v25 = vrot.slane %v7877_v22, 1 }
 0x192   : > { %1262 = vrot.lane.b32.xlu0 %v7804_v13, %s6902_s20  ;;  %9803 = vst [vmem:[#allocation6_spill] sm:$0xff] %v7849_v46  ;;  %v7869_v61 = vsub.s32 %v2140_v38, %v7849_v46 }
 0x193   : > { %1356 = vrot.lane.b32.xlu1 %v630_v4, %s6904_s29 }
 0x194   : > { %v7841_v55 = vpop.permute.xlu0 %1152  ;;  %v2161_v62 = vrot.slane %v1952_v43, %v7869_v61  ;;  %v2144_v39 = vrot.slane %v1947_v51, %v7869_v61  ;;  %v7905_v43 = vsub.s32 0, %v7849_v46  ;;  %v7910_v51 = vsel %vm9791_vm1, %v633_v20, %v9784_v25 }
 0x195   : > { %v1439_v33 = vpop.permute.xlu1 %1438 }
 0x196   : > { %v1751_v10 = vsel %vm1735_vm13, %v1718_v30, %v1439_v33  ;;  %967 = vrot.lane.b32.xlu0 %v7804_v13, %s6898_s16  ;;  %v2168_v30 = vrot.slane %v2154_v15, %v7869_v61  ;;  %v2169_v33 = vcombine.high %v2161_v62, %v2161_v62  ;;  %v2152_v59 = vcombine.high %v2144_v39, %v2144_v39 }
 0x197   : > { %1067 = vrot.lane.b32.xlu1 %v630_v4, %s6900_s18  ;;  %6426 = vmatmul.mubr.msk.f32.gmra.mrb[14].mxu0 %vm9793_vm14, %v1751_v10  ;;  %v2151_v10 = vrot.slane %v2137_v21, %v7869_v61  ;;  %v5936_v24 = vrot.slane %v2161_v62, 9  ;;  %v5932_v26 = vrot.slane %v2144_v39, 9  ;;  %v1521_v21 = vsel %vm1504_vm6, %v7392_v19, %v7745_v27 }
 0x198   : > { %v7860_v37 = vpop.permute.xlu0 %681  ;;  %v2170_v9 = vcombine.high %v2168_v30, %v2168_v30  ;;  %v5937_v8 = vrot.slane %v2169_v33, 9  ;;  %v1554_v20 = vsel %vm1537_vm7, %v1521_v21, %v7772_v60  ;;  %v5938_v6 = vrot.slane %v2168_v30, 9 }
 0x199   : > { %v7863_v45 = vpop.permute.xlu1 %856  ;;  %v7926_v7 = vcombine.high %v2151_v10, %v2151_v10  ;;  %v1587_v19 = vsel %vm1570_vm8, %v1554_v20, %v7781_v35  ;;  %v5933_v27 = vrot.slane %v2152_v59, 9  ;;  %v7941_v21 = vmax.f32 %v2144_v39, %v5932_v26 }
 0x19a   : > { %1358 = vrot.lane.b32.xlu0 %v632_v47, %s6904_s29  ;;  %v1620_v60 = vsel %vm1603_vm9, %v1587_v19, %v7801_v34  ;;  %v5939_v35 = vrot.slane %v2170_v9, 9  ;;  %v7945_v20 = vmax.f32 %v2169_v33, %v5937_v8 }
 0x19b   : > { %1452 = vrot.lane.b32.xlu1 %v807_v49, %s6905_s11  ;;  %v5935_v39 = vrot.slane %v7926_v7, 9  ;;  %v3002_v8 = vmax.f32 %v2152_v59, %v5933_v27 }
 0x19c   : > { %v7873_v53 = vpop.permute.xlu0 %1154 }
 0x19d   : > { %v1249_v63 = vpop.permute.xlu1 %1248 }
 0x19e   : > { %695 = vrot.lane.b32.xlu0 %v630_v4, %s6897_s15 }
 0x19f   : > { %1069 = vrot.lane.b32.xlu1 %v632_v47, %s6900_s18 }
 0x1a0   : > { %v7881_v41 = vpop.permute.xlu0 %858 }
 0x1a1   : > { %v7890_v4 = vpop.permute.xlu1 %953 }
 0x1a2   : > { %1168 = vrot.lane.b32.xlu0 %v807_v49, %s6901_s19 }
 0x1a3   : > { %1454 = vrot.lane.b32.xlu1 %v7884_v40, %s6905_s11 }
 0x1a4   : > { %v7902_v38 = vpop.permute.xlu0 %1250 }
 0x1a5   : > { %v1345_v52 = vpop.permute.xlu1 %1344 }
 0x1a6   : > { %697 = vrot.lane.b32.xlu0 %v632_v47, %s6897_s15  ;;  %v1555_v47 = vsel %vm1537_vm7, %v1522_v0, %v7778_v29  ;;  %v7939_v0 = vmax.f32 %v2161_v62, %v5936_v24  ;;  %v5934_v29 = vrot.slane %v2151_v10, 9  ;;  %v7952_v62 = vmax.f32 %v2168_v30, %v5938_v6 }
 0x1a7   : > { %872 = vrot.lane.b32.xlu1 %v807_v49, %s6899_s17  ;;  %v1588_v57 = vsel %vm1570_vm8, %v1555_v47, %v7794_v58  ;;  %v1653_v58 = vsel %vm1636_vm10, %v1620_v60, %v7841_v55 }
 0x1a8   : > { %v7928_v15 = vpop.permute.xlu0 %955  ;;  %v1686_v24 = vsel %vm1669_vm11, %v1653_v58, %v1249_v63  ;;  %v3003_v49 = vmax.f32 %v2151_v10, %v5934_v29  ;;  %v1621_v63 = vsel %vm1603_vm9, %v1588_v57, %v7832_v23  ;;  %v3008_v10 = vmax.f32 %v2170_v9, %v5939_v35 }
 0x1a9   : > { %v7934_v42 = vpop.permute.xlu1 %1055  ;;  %v1719_v33 = vsel %vm1702_vm12, %v1686_v24, %v1345_v52 }
 0x1aa   : > { %v6409_v25 = vpop.f32.mrb[2].mxu0  ;;  %1170 = vrot.lane.b32.xlu0 %v7884_v40, %s6901_s19 }
 0x1ab   : > { %v1962_v47 = vadd.f32 %v6409_v25, %v7858_v56  ;;  %1264 = vrot.lane.b32.xlu1 %v7887_v44, %s6902_s20  ;;  %v1956_v34 = vpop.f32.mrb[3].mxu0 }
 0x1ac   : > { %v1957_v26 = vadd.f32 %v7858_v56, %v1956_v34  ;;  %v7957_v19 = vpop.permute.xlu0 %1346 }
 0x1ad   : > { %v2188_v55 = vcombine.high %v1962_v47, %v1962_v47  ;;  %v2195_v25 = vrot.slane %v1962_v47, %v7869_v61  ;;  %v1441_v60 = vpop.permute.xlu1 %1440 }
 0x1ae   : > { %v2171_v12 = vcombine.high %v1957_v26, %v1957_v26  ;;  %v2178_v6 = vrot.slane %v1957_v26, %v7869_v61  ;;  %v1752_v30 = vsel %vm1735_vm13, %v1719_v33, %v1441_v60  ;;  %874 = vrot.lane.b32.xlu0 %v7884_v40, %s6899_s17 }
 0x1af   : > { %v2202_v59 = vrot.slane %v2188_v55, %v7869_v61  ;;  %v2203_v27 = vcombine.high %v2195_v25, %v2195_v25  ;;  %v6000_v52 = vrot.slane %v2195_v25, 9  ;;  %969 = vrot.lane.b32.xlu1 %v7887_v44, %s6898_s16  ;;  %6428 = vmatprep.mubr.msk.f32.mxu0 %vm9793_vm14, %v1752_v30 }
 0x1b0   : > { %v2185_v29 = vrot.slane %v2171_v12, %v7869_v61  ;;  %v2186_v58 = vcombine.high %v2178_v6, %v2178_v6  ;;  %v5996_v47 = vrot.slane %v2178_v6, 9  ;;  %v7972_v34 = vpop.permute.xlu0 %683 }
 0x1b1   : > { %v2204_v40 = vcombine.high %v2202_v59, %v2202_v59  ;;  %v6001_v24 = vrot.slane %v2203_v27, 9  ;;  %v6002_v26 = vrot.slane %v2202_v59, 9  ;;  %v3261_v23 = vmax.f32 %v2195_v25, %v6000_v52  ;;  %v7974_v57 = vpop.permute.xlu1 %1057 }
 0x1b2   : > { %v2187_v33 = vcombine.high %v2185_v29, %v2185_v29  ;;  %v5997_v55 = vrot.slane %v2186_v58, 9  ;;  %v5998_v60 = vrot.slane %v2185_v29, 9  ;;  %v3257_v46 = vmax.f32 %v2178_v6, %v5996_v47  ;;  %1266 = vrot.lane.b32.xlu0 %v7877_v22, %s6902_s20 }
 0x1b3   : > { %v6003_v9 = vrot.slane %v2204_v40, 9  ;;  %v3262_v12 = vmax.f32 %v2203_v27, %v6001_v24  ;;  %v3263_v35 = vmax.f32 %v2202_v59, %v6002_v26  ;;  %v3325_v30 = vmax.f32 %v7939_v0, %v3261_v23  ;;  %1360 = vrot.lane.b32.xlu1 %v7910_v51, %s6904_s29 }
 0x1b4   : > { %v5999_v13 = vrot.slane %v2187_v33, 9  ;;  %v3258_v25 = vmax.f32 %v2186_v58, %v5997_v55  ;;  %v3259_v52 = vmax.f32 %v2185_v29, %v5998_v60  ;;  %v3321_v36 = vmax.f32 %v7941_v21, %v3257_v46  ;;  %v7982_v50 = vpop.permute.xlu0 %1156 }
 0x1b5   : > { %v3004_v6 = vmax.f32 %v7926_v7, %v5935_v39  ;;  %v3264_v47 = vmax.f32 %v2204_v40, %v6003_v9  ;;  %v3326_v17 = vmax.f32 %v7945_v20, %v3262_v12  ;;  %v3327_v27 = vmax.f32 %v7952_v62, %v3263_v35  ;;  %v1443_v59 = vpop.permute.xlu1 %1442 }
 0x1b6   : > { %v3260_v24 = vmax.f32 %v2187_v33, %v5999_v13  ;;  %v3322_v0 = vmax.f32 %v3002_v8, %v3258_v25  ;;  %v3323_v26 = vmax.f32 %v3003_v49, %v3259_v52  ;;  %v3385_v23 = vmax.f32 %v3321_v36, 0.0  ;;  %971 = vrot.lane.b32.xlu0 %v7877_v22, %s6898_s16 }
 0x1b7   : > { %v1654_v46 = vsel %vm1636_vm10, %v1621_v63, %v7873_v53  ;;  %v3328_v21 = vmax.f32 %v3008_v10, %v3264_v47  ;;  %1071 = vrot.lane.b32.xlu1 %v7910_v51, %s6900_s18  ;;  %v9804_v7 = vrot.slane %v7899_v28, 1  ;;  %v9805_v20 = vrot.slane %v7877_v22, 1 }
 0x1b8   : > { %v9806_v13 = vrot.slane %v7877_v22, 2  ;;  %v9807_v36 = vrot.slane %v7887_v44, 2  ;;  %v1687_v39 = vsel %vm1669_vm11, %v1654_v46, %v7902_v38  ;;  %v3324_v53 = vmax.f32 %v3004_v6, %v3260_v24  ;;  %v8005_v10 = vpop.permute.xlu0 %685 }
 0x1b9   : > { %v637_v62 = vsel %vm9791_vm1, %v9805_v20, %v9804_v7  ;;  %v3386_v8 = vmax.f32 %v3322_v0, 0.0  ;;  %v3387_v63 = vmax.f32 %v3323_v26, 0.0  ;;  %v3389_v29 = vmax.f32 %v3325_v30, 0.0  ;;  %v8009_v33 = vpop.permute.xlu1 %860 }
 0x1ba   : > { %v812_v49 = vsel %vm739_vm2, %v9807_v36, %v9806_v13  ;;  %v3390_v58 = vmax.f32 %v3326_v17, 0.0  ;;  %v1720_v40 = vsel %vm1702_vm12, %v1687_v39, %v7957_v19  ;;  %v3388_v55 = vmax.f32 %v3324_v53, 0.0  ;;  %1362 = vrot.lane.b32.xlu0 %v637_v62, %s6904_s29  ;;  %v360_v36 = vld [vmem:[%s6994_s14 + $0xe8] sm:$0xff] }
 0x1bb   : > { %v3516_v60 = vrot.slane %v3385_v23, %v7905_v43  ;;  %v3520_v9 = vrot.slane %v3386_v8, %v7905_v43  ;;  %v3524_v38 = vrot.slane %v3387_v63, %v7905_v43  ;;  %v3391_v12 = vmax.f32 %v3327_v27, 0.0  ;;  %1456 = vrot.lane.b32.xlu1 %v812_v49, %s6905_s11 }
 0x1bc   : > { %v1753_v17 = vsel %vm1735_vm13, %v1720_v40, %v1443_v59  ;;  %v3392_v35 = vmax.f32 %v3328_v21, 0.0  ;;  %v3528_v19 = vrot.slane %v3388_v55, %v7905_v43  ;;  %v8020_v25 = vpop.permute.xlu0 %1158  ;;  %v813_v52 = vrot.slane %v7899_v28, 2 }
 0x1bd   : > { %v3770_v30 = vsel %vm9792_vm15, %v3520_v9, %v3516_v60  ;;  %6429 = vmatmul.mubr.msk.f32.gmra.mrb[16].mxu0 %vm9793_vm14, %v1753_v17  ;;  %v3532_v6 = vrot.slane %v3389_v29, %v7905_v43  ;;  %v1253_v27 = vpop.permute.xlu1 %1252  ;;  %vm3777_vm1 = vcmask 1045509   ;;  %v3536_v59 = vrot.slane %v3390_v58, %v7905_v43 }
 0x1be   : > { %v3772_v47 = vsel %vm3771_vm4, %v3524_v38, %v3770_v30  ;;  %699 = vrot.lane.b32.xlu0 %v7910_v51, %s6897_s15  ;;  %vm9795_vm15 = vcmask 1046534   ;;  %v3540_v0 = vrot.slane %v3391_v12, %v7905_v43  ;;  %vm9794_vm14 = vcmask 1047559   ;;  %v359_v51 = vld [vmem:[%s6994_s14 + $0xe0] sm:$0xff] }
 0x1bf   : > { %v3774_v24 = vsel %vm3773_vm5, %v3528_v19, %v3772_v47  ;;  %1073 = vrot.lane.b32.xlu1 %v637_v62, %s6900_s18  ;;  %v3544_v26 = vrot.slane %v3392_v35, %v7905_v43  ;;  %v9808_v46 = vmov %v9806_v13  ;;  %v441_v8 = vrot.slane %v359_v51, 7 }
 0x1c0   : > { %v3776_v28 = vsel %vm3775_vm3, %v3532_v6, %v3774_v24  ;;  %v8033_v23 = vpop.permute.xlu0 %862  ;;  %v814_v21 = vsel %vm739_vm2, %v9808_v46, %v813_v52  ;;  %v442_v29 = vrot.slane %v360_v36, 7  ;;  %v1523_v58 = vsel %vm1504_vm6, %v7473_v32, %v7826_v54  ;;  %v361_v36 = vld [vmem:[%s6994_s14 + $0xf0] sm:$0xff] }
 0x1c1   : > { %v3778_v7 = vsel %vm3777_vm1, %v3536_v59, %v3776_v28  ;;  %v8039_v20 = vpop.permute.xlu1 %957  ;;  %v1556_v40 = vsel %vm1537_vm7, %v1523_v58, %v7863_v45  ;;  %v8059_v60 = vsel %vm396_vm0, 0.0, %v441_v8  ;;  %v444_v58 = vrot.slane %v361_v36, 7 }
 0x1c2   : > { %v3780_v13 = vsel %vm9795_vm15, %v3540_v0, %v3778_v7  ;;  %1172 = vrot.lane.b32.xlu0 %v812_v49, %s6901_s19  ;;  %v1589_v9 = vsel %vm1570_vm8, %v1556_v40, %v7890_v4  ;;  %v638_v17 = vrot.slane %v8059_v60, 1  ;;  %vm9811_vm15 = vcmask 1046528  }
 0x1c3   : > { %v8046_v39 = vsel %vm9794_vm14, %v3544_v26, %v3780_v13  ;;  %1458 = vrot.lane.b32.xlu1 %v814_v21, %s6905_s11  ;;  %v1622_v32 = vsel %vm1603_vm9, %v1589_v9, %v7934_v42  ;;  %vm9810_vm14 = vcmask 220160  }
 0x1c4   : > { %v1255_v53 = vpop.permute.xlu0 %1254  ;;  %v1655_v45 = vsel %vm1636_vm10, %v1622_v32, %v7982_v50  ;;  %v1524_v50 = vsel %vm1504_vm6, %v7480_v5, %v7860_v37 }
 0x1c5   : > { %v1349_v63 = vpop.permute.xlu1 %1348  ;;  %v1688_v4 = vsel %vm1669_vm11, %v1655_v45, %v1253_v27  ;;  %v1557_v52 = vsel %vm1537_vm7, %v1524_v50, %v7881_v41  ;;  %v528_v27 = vsel %vm396_vm0, %v442_v29, 0.0 }
 0x1c6   : > { %701 = vrot.lane.b32.xlu0 %v637_v62, %s6897_s15  ;;  %v8066_v62 = vsel %vm396_vm0, %v441_v8, %v442_v29  ;;  %v1721_v19 = vsel %vm1702_vm12, %v1688_v4, %v1349_v63  ;;  %v1590_v59 = vsel %vm1570_vm8, %v1557_v52, %v7928_v15  ;;  %v641_v41 = vrot.slane %v528_v27, 1 }
 0x1c7   : > { %876 = vrot.lane.b32.xlu1 %v812_v49, %s6899_s17  ;;  %9809 = vst [vmem:[#allocation7_spill] sm:$0xff] %v8066_v62  ;;  %v639_v35 = vrot.slane %v8066_v62, 1  ;;  %v1623_v5 = vsel %vm1603_vm9, %v1590_v59, %v7974_v57  ;;  %v815_v15 = vrot.slane %v8059_v60, 2  ;;  %v816_v26 = vrot.slane %v8066_v62, 2 }
 0x1c8   : > { %v8056_v55 = vpop.permute.xlu0 %959  ;;  %v1656_v37 = vsel %vm1636_vm10, %v1623_v5, %v8020_v25  ;;  %v362_v25 = vld [vmem:[%s6994_s14 + $0xf8] sm:$0xff]  ;;  %v818_v29 = vrot.slane %v528_v27, 2  ;;  %s6909_s14 = smov 96  }
 0x1c9   : > { %v8063_v38 = vpop.permute.xlu1 %1059  ;;  %v640_v47 = vsel %vm9811_vm15, %v638_v17, %v639_v35  ;;  %v1689_v0 = vsel %vm1669_vm11, %v1656_v37, %v1255_v53  ;;  %v642_v7 = vsel %vm9811_vm15, %v639_v35, %v641_v41  ;;  %v817_v13 = vsel %vm739_vm2, %v815_v15, %v816_v26 }
 0x1ca   : > { %v6412_v54 = vpop.f32.mrb[4].mxu0  ;;  %1174 = vrot.lane.b32.xlu0 %v814_v21, %s6901_s19  ;;  %v445_v8 = vrot.slane %v362_v25, 7  ;;  %v8141_v17 = vsel %vm396_vm0, 0.0, %v444_v58 }
 0x1cb   : > { %1268 = vrot.lane.b32.xlu1 %v8059_v60, %s6902_s20  ;;  %v1966_v49 = vpop.f32.mrb[5].mxu0  ;;  %v1972_v63 = vadd.f32 %v6412_v54, %v7858_v56 }
 0x1cc   : > { %v1351_v12 = vpop.permute.xlu0 %1350  ;;  %v1967_v40 = vadd.f32 %v7858_v56, %v1966_v49  ;;  %v8132_v45 = vsel %vm396_vm0, %v444_v58, %v445_v8  ;;  %v4134_v58 = vld [vmem:[%s9771_s3 + $0x8] sm:$0xff] }
 0x1cd   : > { %v1445_v42 = vpop.permute.xlu1 %1444  ;;  %v1722_v57 = vsel %vm1702_vm12, %v1689_v0, %v1351_v12  ;;  %v2222_v4 = vcombine.high %v1972_v63, %v1972_v63  ;;  %v2229_v54 = vrot.slane %v1972_v63, %v7869_v61  ;;  %v8138_v12 = vsel %vm739_vm2, %v816_v26, %v818_v29  ;;  %v4133_v63 = vld [vmem:[%s9771_s3] sm:$0xff] }
 0x1ce   : > { %v1754_v30 = vsel %vm1735_vm13, %v1721_v19, %v1445_v42  ;;  %878 = vrot.lane.b32.xlu0 %v814_v21, %s6899_s17  ;;  %v2205_v49 = vcombine.high %v1967_v40, %v1967_v40  ;;  %v2212_v35 = vrot.slane %v1967_v40, %v7869_v61  ;;  %v1014_v42 = vrot.slane %v8141_v17, 1 }
 0x1cf   : > { %973 = vrot.lane.b32.xlu1 %v8059_v60, %s6898_s16  ;;  %6431 = vmatprep.mubr.msk.f32.mxu0 %vm9810_vm14, %v1754_v30  ;;  %v1015_v30 = vrot.slane %v8132_v45, 1  ;;  %v2236_v52 = vrot.slane %v2222_v4, %v7869_v61  ;;  %v2237_v27 = vcombine.high %v2229_v54, %v2229_v54  ;;  %v1525_v0 = vsel %vm1504_vm6, %v7554_v48, %v7972_v34  ;;  %v4149_v48 = vld [vmem:[%s9771_s3 + $0x80] sm:$0xff]  ;;  %v4150_v34 = vld [vmem:[%s9771_s3 + $0x88] sm:$0xff] }
 0x1d0   : > { %v8089_v6 = vpop.permute.xlu0 %687  ;;  %v2219_v59 = vrot.slane %v2205_v49, %v7869_v61  ;;  %v2220_v5 = vcombine.high %v2212_v35, %v2212_v35  ;;  %v5944_v36 = vrot.slane %v2229_v54, 9  ;;  %v6522_v26 = vpack.c.bf16 %v4134_v58, %v4133_v63 }
 0x1d1   : > { %v8095_v24 = vpop.permute.xlu1 %1061  ;;  %v2238_v25 = vcombine.high %v2236_v52, %v2236_v52  ;;  %v5946_v29 = vrot.slane %v2236_v52, 9 }
 0x1d2   : > { %1270 = vrot.lane.b32.xlu0 %v8066_v62, %s6902_s20  ;;  %v8190_v4 = vcombine.high %v2219_v59, %v2219_v59  ;;  %v5941_v49 = vrot.slane %v2220_v5, 9 }
 0x1d3   : > { %1364 = vrot.lane.b32.xlu1 %v640_v47, %s6904_s29 }
 0x1d4   : > { %v8105_v28 = vpop.permute.xlu0 %1160 }
 0x1d5   : > { %v1447_v46 = vpop.permute.xlu1 %1446 }
 0x1d6   : > { %v1755_v21 = vsel %vm1735_vm13, %v1722_v57, %v1447_v46  ;;  %975 = vrot.lane.b32.xlu0 %v8066_v62, %s6898_s16  ;;  %v8205_v57 = vmax.f32 %v2229_v54, %v5944_v36  ;;  %v5943_v54 = vrot.slane %v8190_v4, 9 }
 0x1d7   : > { %1075 = vrot.lane.b32.xlu1 %v640_v47, %s6900_s18  ;;  %6432 = vmatmul.mubr.msk.f32.gmra.mrb[18].mxu0 %vm9810_vm14, %v1755_v21  ;;  %vm9812_vm14 = vmmov %vm9811_vm15  ;;  %v1526_v21 = vsel %vm1504_vm6, %v7561_v11, %v8005_v10  ;;  %v1558_v11 = vsel %vm1537_vm7, %v1525_v0, %v8009_v33  ;;  %v5945_v10 = vrot.slane %v2237_v27, 9  ;;  %v5942_v0 = vrot.slane %v2219_v59, 9 }
 0x1d8   : > { %v8117_v51 = vpop.permute.xlu0 %689  ;;  %v8161_v41 = vsel %vm9812_vm14, %v1014_v42, %v1015_v30  ;;  %v1559_v40 = vsel %vm1537_vm7, %v1526_v21, %v8033_v23  ;;  %v1591_v33 = vsel %vm1570_vm8, %v1558_v11, %v8039_v20  ;;  %vm9813_vm15 = vmmov %vm9812_vm14  ;;  %v5947_v21 = vrot.slane %v2238_v25, 9 }
 0x1d9   : > { %v8121_v53 = vpop.permute.xlu1 %864  ;;  %v1624_v23 = vsel %vm1603_vm9, %v1591_v33, %v8063_v38  ;;  %v8211_v20 = vmax.f32 %v2237_v27, %v5945_v10  ;;  %v3011_v36 = vmax.f32 %v2219_v59, %v5942_v0  ;;  %vm9814_vm14 = vcmask 220160  }
 0x1da   : > { %1366 = vrot.lane.b32.xlu0 %v642_v7, %s6904_s29 }
 0x1db   : > { %1460 = vrot.lane.b32.xlu1 %v817_v13, %s6905_s11 }
 0x1dc   : > { %v8127_v9 = vpop.permute.xlu0 %1162 }
 0x1dd   : > { %v8129_v32 = vpop.permute.xlu1 %1256 }
 0x1de   : > { %703 = vrot.lane.b32.xlu0 %v640_v47, %s6897_s15  ;;  %v8153_v47 = vsel %vm396_vm0, %v445_v8, 0.0  ;;  %v5940_v8 = vrot.slane %v2212_v35, 9 }
 0x1df   : > { %1077 = vrot.lane.b32.xlu1 %v642_v7, %s6900_s18  ;;  %v1017_v46 = vrot.slane %v8153_v47, 1 }
 0x1e0   : > { %v8144_v19 = vpop.permute.xlu0 %866  ;;  %v8207_v63 = vmax.f32 %v2212_v35, %v5940_v8  ;;  %v8221_v35 = vmax.f32 %v2220_v5, %v5941_v49  ;;  %v4152_v49 = vld [vmem:[%s9771_s3 + $0x98] sm:$0xff] }
 0x1e1   : > { %v8148_v50 = vpop.permute.xlu1 %961 }
 0x1e2   : > { %1176 = vrot.lane.b32.xlu0 %v817_v13, %s6901_s19 }
 0x1e3   : > { %1462 = vrot.lane.b32.xlu1 %v8138_v12, %s6905_s11 }
 0x1e4   : > { %v8158_v37 = vpop.permute.xlu0 %1258 }
 0x1e5   : > { %v1353_v15 = vpop.permute.xlu1 %1352 }
 0x1e6   : > { %705 = vrot.lane.b32.xlu0 %v642_v7, %s6897_s15  ;;  %v6520_v7 = vpack.c.bf16 %v4150_v34, %v4149_v48  ;;  %v8201_v34 = vsel %vm9813_vm15, %v1015_v30, %v1017_v46  ;;  %v1657_v30 = vsel %vm1636_vm10, %v1624_v23, %v8105_v28  ;;  %vm9817_vm15 = vcmask 1041409  }
 0x1e7   : > { %880 = vrot.lane.b32.xlu1 %v817_v13, %s6899_s17  ;;  %v1592_v13 = vsel %vm1570_vm8, %v1559_v40, %v8056_v55  ;;  %v8213_v55 = vmax.f32 %v2236_v52, %v5946_v29 }
 0x1e8   : > { %v8192_v42 = vpop.permute.xlu0 %963  ;;  %6521 = vmatprep.subr.bf16.mxu1 %v6520_v7  ;;  %v1625_v29 = vsel %vm1603_vm9, %v1592_v13, %v8095_v24  ;;  %v4151_v24 = vld [vmem:[%s9771_s3 + $0x90] sm:$0xff] }
 0x1e9   : > { %v8198_v48 = vpop.permute.xlu1 %1063  ;;  %6523 = vmatpush3.bf16.msra.mxu1 %v6522_v26  ;;  %v1690_v26 = vsel %vm1669_vm11, %v1657_v30, %v8129_v32  ;;  %v6524_v0 = vpack.c.bf16 %v4152_v49, %v4151_v24 }
 0x1ea   : > { %v6415_v58 = vpop.f32.mrb[6].mxu0  ;;  %1178 = vrot.lane.b32.xlu0 %v8138_v12, %s6901_s19  ;;  %v1723_v28 = vsel %vm1702_vm12, %v1690_v26, %v1353_v15 }
 0x1eb   : > { %v1982_v46 = vadd.f32 %v6415_v58, %v7858_v56  ;;  %1272 = vrot.lane.b32.xlu1 %v8141_v17, %s6902_s20  ;;  %v1976_v38 = vpop.f32.mrb[7].mxu0  ;;  %6525 = vmatprep.subr.bf16.mxu1 %v6524_v0 }
 0x1ec   : > { %v1977_v27 = vadd.f32 %v7858_v56, %v1976_v38  ;;  %v8226_v52 = vpop.permute.xlu0 %1354  ;;  %v8236_v56 = vmax.f32 %v2238_v25, %v5947_v21 }
 0x1ed   : > { %v2256_v8 = vcombine.high %v1982_v46, %v1982_v46  ;;  %v2263_v11 = vrot.slane %v1982_v46, %v7869_v61  ;;  %v1449_v10 = vpop.permute.xlu1 %1448 }
 0x1ee   : > { %v2239_v7 = vcombine.high %v1977_v27, %v1977_v27  ;;  %v2246_v5 = vrot.slane %v1977_v27, %v7869_v61  ;;  %v1756_v40 = vsel %vm1735_vm13, %v1723_v28, %v1449_v10  ;;  %882 = vrot.lane.b32.xlu0 %v8138_v12, %s6899_s17  ;;  %s6908_s17 = smov 64  }
 0x1ef   : > { %v2270_v32 = vrot.slane %v2256_v8, %v7869_v61  ;;  %v2271_v59 = vcombine.high %v2263_v11, %v2263_v11  ;;  %v6008_v15 = vrot.slane %v2263_v11, 9  ;;  %977 = vrot.lane.b32.xlu1 %v8141_v17, %s6898_s16  ;;  %6434 = vmatprep.mubr.msk.f32.mxu0 %vm9814_vm14, %v1756_v40 }
 0x1f0   : > { %v2253_v12 = vrot.slane %v2239_v7, %v7869_v61  ;;  %v2254_v25 = vcombine.high %v2246_v5, %v2246_v5  ;;  %v6004_v33 = vrot.slane %v2246_v5, 9  ;;  %v8249_v13 = vpop.permute.xlu0 %691 }
 0x1f1   : > { %v2272_v23 = vcombine.high %v2270_v32, %v2270_v32  ;;  %v6009_v21 = vrot.slane %v2271_v59, 9  ;;  %v6010_v58 = vrot.slane %v2270_v32, 9  ;;  %v3269_v30 = vmax.f32 %v2263_v11, %v6008_v15  ;;  %v8251_v46 = vpop.permute.xlu1 %1065 }
 0x1f2   : > { %v2255_v38 = vcombine.high %v2253_v12, %v2253_v12  ;;  %v6005_v26 = vrot.slane %v2254_v25, 9  ;;  %v6006_v27 = vrot.slane %v2253_v12, 9  ;;  %v3265_v28 = vmax.f32 %v2246_v5, %v6004_v33  ;;  %1274 = vrot.lane.b32.xlu0 %v8132_v45, %s6902_s20 }
 0x1f3   : > { %v6011_v8 = vrot.slane %v2272_v23, 9  ;;  %v3270_v10 = vmax.f32 %v2271_v59, %v6009_v21  ;;  %v3271_v7 = vmax.f32 %v2270_v32, %v6010_v58  ;;  %v3333_v40 = vmax.f32 %v8205_v57, %v3269_v30  ;;  %1368 = vrot.lane.b32.xlu1 %v8161_v41, %s6904_s29 }
 0x1f4   : > { %v6007_v24 = vrot.slane %v2255_v38, 9  ;;  %v3266_v11 = vmax.f32 %v2254_v25, %v6005_v26  ;;  %v3267_v15 = vmax.f32 %v2253_v12, %v6006_v27  ;;  %v3329_v49 = vmax.f32 %v8207_v63, %v3265_v28  ;;  %v8259_v62 = vpop.permute.xlu0 %1164 }
 0x1f5   : > { %v3012_v5 = vmax.f32 %v8190_v4, %v5943_v54  ;;  %v3272_v33 = vmax.f32 %v2272_v23, %v6011_v8  ;;  %v3334_v0 = vmax.f32 %v8211_v20, %v3270_v10  ;;  %v3335_v59 = vmax.f32 %v8213_v55, %v3271_v7  ;;  %v1451_v32 = vpop.permute.xlu1 %1450 }
 0x1f6   : > { %v3268_v21 = vmax.f32 %v2255_v38, %v6007_v24  ;;  %v3330_v57 = vmax.f32 %v8221_v35, %v3266_v11  ;;  %v3331_v58 = vmax.f32 %v3011_v36, %v3267_v15  ;;  %v3393_v30 = vmax.f32 %v3329_v49, 0.0  ;;  %979 = vrot.lane.b32.xlu0 %v8132_v45, %s6898_s16  ;;  %v4138_v24 = vld [vmem:[%s9771_s3 + $0x28] sm:$0xff] }
 0x1f7   : > { %v1658_v63 = vsel %vm1636_vm10, %v1625_v29, %v8127_v9  ;;  %v3336_v12 = vmax.f32 %v8236_v56, %v3272_v33  ;;  %1079 = vrot.lane.b32.xlu1 %v8161_v41, %s6900_s18  ;;  %v9815_v4 = vrot.slane %v8132_v45, 2  ;;  %v9816_v20 = vrot.slane %v8141_v17, 2 }
 0x1f8   : > { %v1118_v54 = vrot.slane %v8153_v47, 2  ;;  %v1691_v35 = vsel %vm1669_vm11, %v1658_v63, %v8158_v37  ;;  %v3332_v36 = vmax.f32 %v3012_v5, %v3268_v21  ;;  %v3394_v25 = vmax.f32 %v3330_v57, 0.0  ;;  %v8280_v9 = vpop.permute.xlu0 %693  ;;  %v4135_v47 = vld [vmem:[%s9771_s3 + $0x10] sm:$0xff]  ;;  %v4136_v37 = vld [vmem:[%s9771_s3 + $0x18] sm:$0xff] }
 0x1f9   : > { %v1117_v55 = vsel %vm739_vm2, %v9816_v20, %v9815_v4  ;;  %v3395_v23 = vmax.f32 %v3331_v58, 0.0  ;;  %v3397_v29 = vmax.f32 %v3333_v40, 0.0  ;;  %v3398_v56 = vmax.f32 %v3334_v0, 0.0  ;;  %v8284_v38 = vpop.permute.xlu1 %868  ;;  %v4137_v40 = vld [vmem:[%s9771_s3 + $0x20] sm:$0xff]  ;;  %v4155_v0 = vld [vmem:[%s9771_s3 + $0xb0] sm:$0xff] }
 0x1fa   : > { %v1724_v41 = vsel %vm1702_vm12, %v1691_v35, %v8226_v52  ;;  %v3832_v17 = vrot.slane %v8046_v39, 7  ;;  %v3396_v26 = vmax.f32 %v3332_v36, 0.0  ;;  %v3548_v27 = vrot.slane %v3393_v30, %v7905_v43  ;;  %1370 = vrot.lane.b32.xlu0 %v8201_v34, %s6904_s29  ;;  %v4153_v39 = vld [vmem:[%s9771_s3 + $0xa0] sm:$0xff]  ;;  %v4154_v52 = vld [vmem:[%s9771_s3 + $0xa8] sm:$0xff] }
 0x1fb   : > { %v3552_v28 = vrot.slane %v3394_v25, %v7905_v43  ;;  %v3556_v8 = vrot.slane %v3395_v23, %v7905_v43  ;;  %v3399_v10 = vmax.f32 %v3335_v59, 0.0  ;;  %v1757_v7 = vsel %vm1735_vm13, %v1724_v41, %v1451_v32  ;;  %1464 = vrot.lane.b32.xlu1 %v1117_v55, %s6905_s11  ;;  %v4156_v59 = vld [vmem:[%s9771_s3 + $0xb8] sm:$0xff] }
 0x1fc   : > { %v3400_v11 = vmax.f32 %v3336_v12, 0.0  ;;  %v3560_v15 = vrot.slane %v3396_v26, %v7905_v43  ;;  %6435 = vmatmul.mubr.msk.f32.gmra.mrb[20].mxu0 %vm9814_vm14, %v1757_v7  ;;  %v8315_v5 = vpop.permute.xlu0 %1166  ;;  %v6526_v33 = vpack.c.bf16 %v4136_v37, %v4135_v47  ;;  %v3564_v32 = vrot.slane %v3397_v29, %v7905_v43  ;;  %v4140_v23 = vld [vmem:[%s9771_s3 + $0x38] sm:$0xff]  ;;  %v4142_v7 = vld [vmem:[%s9771_s3 + $0x48] sm:$0xff] }
 0x1fd   : > { %v3783_v49 = vsel %vm9817_vm15, %v3552_v28, %v3548_v27  ;;  %v8325_v57 = vpop.permute.xlu1 %1260  ;;  %v9818_v58 = vmov %v9815_v4  ;;  %v6528_v63 = vpack.c.bf16 %v4154_v52, %v4153_v39  ;;  %v3568_v12 = vrot.slane %v3398_v56, %v7905_v43 }
 0x1fe   : > { %v3784_v21 = vsel %vm3771_vm4, %v3556_v8, %v3783_v49  ;;  %v1119_v30 = vsel %vm739_vm2, %v9818_v58, %v1118_v54  ;;  %1081 = vrot.lane.b32.xlu0 %v8201_v34, %s6900_s18  ;;  %v8335_v20 = vsel %vm396_vm0, 0.0, %v3832_v17  ;;  %6527 = vmatpush3.bf16.msra.mxu1 %v6526_v33  ;;  %v6530_v35 = vpack.c.bf16 %v4138_v24, %v4137_v40  ;;  %v4139_v34 = vld [vmem:[%s9771_s3 + $0x30] sm:$0xff] }
 0x1ff   : > { %v3785_v4 = vsel %vm3773_vm5, %v3560_v15, %v3784_v21  ;;  %v3572_v36 = vrot.slane %v3399_v10, %v7905_v43  ;;  %1180 = vrot.lane.b32.xlu1 %v1117_v55, %s6901_s19  ;;  %v8341_v45 = vsel %vm396_vm0, %v3832_v17, 0.0  ;;  %6529 = vmatprep.subr.bf16.mxu1 %v6528_v63  ;;  %v6532_v54 = vpack.c.bf16 %v4156_v59, %v4155_v0  ;;  %v4157_v55 = vld [vmem:[%s9771_s3 + $0xc0] sm:$0xff]  ;;  %v4158_v17 = vld [vmem:[%s9771_s3 + $0xc8] sm:$0xff]  ;;  %v4159_v24 = vld [vmem:[%s9771_s3 + $0xd0] sm:$0xff] }
 0x200   : > { %v3786_v25 = vsel %vm3775_vm3, %v3564_v32, %v3785_v4  ;;  %v3576_v29 = vrot.slane %v3400_v11, %v7905_v43  ;;  %v8350_v56 = vpop.permute.xlu0 %870  ;;  %v6751_v37 = vpack.i.bf16 %v6972_v1, %v6978_v2  ;;  %vm9819_vm15 = vcmask 1046534   ;;  %v4141_v1 = vld [vmem:[%s9771_s3 + $0x40] sm:$0xff]  ;;  %v4160_v11 = vld [vmem:[%s9771_s3 + $0xd8] sm:$0xff] }
 0x201   : > { %v3787_v41 = vsel %vm3777_vm1, %v3568_v12, %v3786_v25  ;;  %v8359_v47 = vpop.permute.xlu1 %965  ;;  %v3925_v27 = vrot.slane %v8335_v20, 2  ;;  %v3926_v28 = vrot.slane %v8341_v45, 2  ;;  %vm9820_vm14 = vcmask 1047559  }
 0x202   : > { %v3788_v26 = vsel %vm9819_vm15, %v3572_v36, %v3787_v41  ;;  %1466 = vrot.lane.b32.xlu0 %v1119_v30, %s6905_s11  ;;  %6531 = vmatpush3.bf16.msra.mxu1 %v6530_v35  ;;  %v6534_v39 = vpack.c.bf16 %v4140_v23, %v4139_v34  ;;  %v6536_v10 = vpack.c.bf16 %v4158_v17, %v4157_v55  ;;  %v9821_v49 = vrot.slane %v6982_v3, 1  ;;  %v4143_v35 = vld [vmem:[%s9771_s3 + $0x50] sm:$0xff]  ;;  %v4144_v36 = vld [vmem:[%s9771_s3 + $0x58] sm:$0xff]  ;;  %v4162_v55 = vld [vmem:[%s9771_s3 + $0xe8] sm:$0xff] }
 0x203   : > { %v3789_v8 = vsel %vm9820_vm14, %v3576_v29, %v3788_v26  ;;  %1182 = vrot.lane.b32.xlu1 %v1119_v30, %s6901_s19  ;;  %6533 = vmatprep.subr.bf16.mxu1 %v6532_v54  ;;  %v9822_v33 = vrot.slane %v6978_v2, 1  ;;  %vm9823_vm15 = vcmask 1046528   ;;  %v8396_v21 = vsel %vm739_vm2, %v3925_v27, %v3926_v28 }
 0x204   : > { %v3833_v52 = vrot.slane %v3789_v8, 7  ;;  %v8375_v40 = vpop.permute.xlu0 %1262  ;;  %v6538_v63 = vpack.c.bf16 %v4142_v7, %v4141_v1  ;;  %v1527_v12 = vsel %vm1504_vm6, %v7635_v14, %v8089_v6  ;;  %v6540_v4 = vpack.c.bf16 %v4160_v11, %v4159_v24  ;;  %vm9828_vm14 = vmmov %vm9823_vm15  ;;  %v4164_v7 = vld [vmem:[%s9771_s3 + $0xf8] sm:$0xff] }
 0x205   : > { %v1357_v15 = vpop.permute.xlu1 %1356  ;;  %v8388_v0 = vsel %vm9823_vm15, %v9822_v33, %v9821_v49  ;;  %v1560_v25 = vsel %vm1537_vm7, %v1527_v12, %v8121_v53  ;;  %v9825_v14 = vrot.slane %v6982_v3, 2  ;;  %v9826_v6 = vrot.slane %v6978_v2, 2  ;;  %v4161_v3 = vld [vmem:[%s9771_s3 + $0xe0] sm:$0xff]  ;;  %v4148_v12 = vld [vmem:[%s9771_s3 + $0x78] sm:$0xff] }
 0x206   : > { %9824 = vst [vmem:[#allocation8_spill] sm:$0xff] %v8388_v0  ;;  %v8391_v59 = vsel %vm396_vm0, 0.0, %v3833_v52  ;;  %v3857_v32 = vsel %vm396_vm0, %v3833_v52, 0.0  ;;  %6752 = vrot.lane.b32.xlu0 %v6751_v37, %s6902_s20  ;;  %6535 = vmatpush3.bf16.msra.mxu1 %v6534_v39  ;;  %v1593_v34 = vsel %vm1570_vm8, %v1560_v25, %v8148_v50  ;;  %v6766_v29 = vpack.i.bf16 %v8388_v0, %v8396_v21  ;;  %v4146_v39 = vld [vmem:[%s9771_s3 + $0x68] sm:$0xff] }
 0x207   : > { %v3882_v58 = vrot.slane %v8391_v59, 1  ;;  %v3883_v30 = vrot.slane %v3857_v32, 1  ;;  %6757 = vrot.lane.b32.xlu1 %v7010_v16, %s6904_s29  ;;  %6537 = vmatprep.subr.bf16.mxu1 %v6536_v10  ;;  %v8419_v16 = vsel %vm739_vm2, %v9826_v6, %v9825_v14  ;;  %v3928_v41 = vrot.slane %v8391_v59, 2  ;;  %s5897_s29 = sshll.u32 %s9878_s10, 1 }
 0x208   : > { %v8412_v54 = vpop.permute.xlu0 %967  ;;  %9827 = vst [vmem:[#allocation9_spill] sm:$0xff] %v8419_v16  ;;  %v3929_v53 = vrot.slane %v3857_v32, 2  ;;  %v1626_v17 = vsel %vm1603_vm9, %v1593_v34, %v8198_v48  ;;  %v6542_v26 = vpack.c.bf16 %v4144_v36, %v4143_v35  ;;  %v3879_v8 = vrot.slane %v8335_v20, 1  ;;  %s330_s24 = scalar_lea.vmem %s9777_s9, %s5897_s29 }
 0x209   : > { %v8423_v23 = vpop.permute.xlu1 %1067  ;;  %v8439_v37 = vsel %vm9828_vm14, %v3882_v58, %v3883_v30  ;;  %v1659_v27 = vsel %vm1636_vm10, %v1626_v17, %v8259_v62  ;;  %v3880_v48 = vrot.slane %v8341_v45, 1  ;;  %v6771_v10 = vpack.i.bf16 %v8419_v16, %v8391_v59  ;;  %v4163_v45 = vld [vmem:[%s9771_s3 + $0xf0] sm:$0xff] }
 0x20a   : > { %v6418_v50 = vpop.f32.mrb[8].mxu0  ;;  %6762 = vrot.lane.b32.xlu0 %v7012_v18, %s6905_s11  ;;  %6539 = vmatpush3.bf16.msra.mxu1 %v6538_v63  ;;  %v4145_v18 = vld [vmem:[%s9771_s3 + $0x60] sm:$0xff]  ;;  %v1692_v62 = vsel %vm1669_vm11, %v1659_v27, %v8325_v57  ;;  %v6544_v1 = vpack.c.bf16 %v4162_v55, %v4161_v3  ;;  %v6776_v49 = vpack.i.bf16 %v8335_v20, %v8439_v37  ;;  %vm9829_vm15 = vcmask 220160   ;;  %v4147_v63 = vld [vmem:[%s9771_s3 + $0x70] sm:$0xff] }
 0x20b   : > { %6767 = vrot.lane.b32.xlu1 %v6766_v29, %s6907_s25  ;;  %v1986_v28 = vpop.f32.mrb[9].mxu0  ;;  %6541 = vmatprep.subr.bf16.mxu1 %v6540_v4  ;;  %v1725_v24 = vsel %vm1702_vm12, %v1692_v62, %v1357_v15  ;;  %v8466_v57 = vsel %vm739_vm2, %v3928_v41, %v3929_v53  ;;  %v6546_v32 = vpack.c.bf16 %v4146_v39, %v4145_v18 }
 0x20c   : > { %v1359_v52 = vpop.permute.xlu0 %1358  ;;  %v1528_v58 = vsel %vm1504_vm6, %v7642_v31, %v8117_v51  ;;  %v8476_v15 = vsel %vm9828_vm14, %v3879_v8, %v3880_v48  ;;  %v6548_v30 = vpack.c.bf16 %v4164_v7, %v4163_v45  ;;  %v6550_v14 = vpack.c.bf16 %v4148_v12, %v4147_v63  ;;  %vm9832_vm14 = vmmov %vm9829_vm15 }
 0x20d   : > { %v1453_v11 = vpop.permute.xlu1 %1452  ;;  %v1561_v31 = vsel %vm1537_vm7, %v1528_v58, %v8144_v19  ;;  %v6781_v4 = vpack.i.bf16 %v8476_v15, %v8466_v57 }
 0x20e   : > { %v1758_v33 = vsel %vm1735_vm13, %v1725_v24, %v1453_v11  ;;  %6772 = vrot.lane.b32.xlu0 %v6771_v10, %s6908_s17  ;;  %6543 = vmatpush3.bf16.msra.mxu1 %v6542_v26  ;;  %v1594_v35 = vsel %vm1570_vm8, %v1561_v31, %v8192_v42  ;;  %v9830_v24 = vld [vmem:[#allocation2_spill] sm:$0xff] }
 0x20f   : > { %6777 = vrot.lane.b32.xlu1 %v6776_v49, %s6909_s14  ;;  %6437 = vmatprep.mubr.msk.f32.mxu0 %vm9829_vm15, %v1758_v33  ;;  %v1627_v25 = vsel %vm1603_vm9, %v1594_v35, %v8251_v46  ;;  %v1529_v11 = vsel %vm1504_vm6, %v9830_v24, %v8249_v13  ;;  %v9831_v49 = vld [vmem:[#allocation3_spill] sm:$0xff] }
 0x210   : > { %v8486_v51 = vpop.permute.xlu0 %695  ;;  %6545 = vmatprep.subr.bf16.mxu1 %v6544_v1  ;;  %v1660_v19 = vsel %vm1636_vm10, %v1627_v25, %v8315_v5  ;;  %v8511_v5 = vld [vmem:[%s9770_s2] ss:$0 sm:$0xff]  ;;  %v1530_v33 = vsel %vm1504_vm6, %v9831_v49, %v8280_v9 }
 0x211   : > { %v8492_v36 = vpop.permute.xlu1 %1069  ;;  %v1693_v6 = vsel %vm1669_vm11, %v1660_v19, %v8375_v40  ;;  %v1992_v40 = vadd.f32 %v8511_v5, %v6418_v50  ;;  %v1987_v3 = vadd.f32 %v8511_v5, %v1986_v28  ;;  %v1563_v63 = vsel %vm1537_vm7, %v1530_v33, %v8350_v56 }
 0x212   : > { %6782 = vrot.lane.b32.xlu0 %v6781_v4, %s6907_s25  ;;  %6547 = vmatpush3.bf16.msra.mxu1 %v6546_v32  ;;  %v1726_v29 = vsel %vm1702_vm12, %v1693_v6, %v1359_v52  ;;  %v1596_v13 = vsel %vm1570_vm8, %v1563_v63, %v8412_v54 }
 0x213   : > { %6549 = vmatprep.subr.bf16.mxu1 %v6548_v30  ;;  %v2290_v26 = vcombine.high %v1992_v40, %v1992_v40  ;;  %v2297_v27 = vrot.slane %v1992_v40, %v7869_v61  ;;  %v2273_v8 = vcombine.high %v1987_v3, %v1987_v3  ;;  %v2280_v18 = vrot.slane %v1987_v3, %v7869_v61 }
 0x214   : > { %v1169_v34 = vpop.permute.xlu0 %1168  ;;  %v1562_v30 = vsel %vm1537_vm7, %v1529_v11, %v8284_v38  ;;  %v1629_v49 = vsel %vm1603_vm9, %v1596_v13, %v8492_v36 }
 0x215   : > { %v1455_v42 = vpop.permute.xlu1 %1454  ;;  %v2304_v62 = vrot.slane %v2290_v26, %v7869_v61  ;;  %v2305_v52 = vcombine.high %v2297_v27, %v2297_v27  ;;  %v2287_v50 = vrot.slane %v2273_v8, %v7869_v61  ;;  %v2288_v28 = vcombine.high %v2280_v18, %v2280_v18 }
 0x216   : > { %v1759_v41 = vsel %vm1735_vm13, %v1726_v29, %v1455_v42  ;;  %6551 = vmatpush3.bf16.msra.mxu1 %v6550_v14  ;;  %v5952_v45 = vrot.slane %v2297_v27, 9  ;;  %v5948_v7 = vrot.slane %v2280_v18, 9  ;;  %v1595_v35 = vsel %vm1570_vm8, %v1562_v30, %v8359_v47 }
 0x217   : > { %6438 = vmatmul.mubr.msk.f32.gmra.mrb[22].mxu0 %vm9829_vm15, %v1759_v41  ;;  %v2306_v32 = vcombine.high %v2304_v62, %v2304_v62  ;;  %v5953_v58 = vrot.slane %v2305_v52, 9  ;;  %v5954_v12 = vrot.slane %v2304_v62, 9  ;;  %v2289_v31 = vcombine.high %v2287_v50, %v2287_v50 }
 0x218   : > { %v8504_v46 = vpop.permute.xlu0 %697  ;;  %v5949_v25 = vrot.slane %v2288_v28, 9  ;;  %v1628_v14 = vsel %vm1603_vm9, %v1595_v35, %v8423_v23  ;;  %v8547_v38 = vmax.f32 %v2297_v27, %v5952_v45  ;;  %v5950_v19 = vrot.slane %v2287_v50, 9 }
 0x219   : > { %v8506_v53 = vpop.permute.xlu1 %872  ;;  %v3017_v56 = vmax.f32 %v2280_v18, %v5948_v7  ;;  %v5955_v29 = vrot.slane %v2306_v32, 9  ;;  %v8549_v42 = vmax.f32 %v2305_v52, %v5953_v58  ;;  %v1661_v41 = vsel %vm1636_vm10, %v1628_v14, %v1169_v34 }
 0x21a   : > { %v8553_v54 = vmax.f32 %v2304_v62, %v5954_v12  ;;  %v5951_v3 = vrot.slane %v2289_v31, 9  ;;  %v3018_v8 = vmax.f32 %v2288_v28, %v5949_v25  ;;  %v3019_v24 = vmax.f32 %v2287_v50, %v5950_v19 }
 0x21b   : > { %v3024_v28 = vmax.f32 %v2306_v32, %v5955_v29  ;;  %vm9833_vm15 = vcmask 1041409  }
 0x21c   : > { %v8515_v55 = vpop.permute.xlu0 %1170 }
 0x21d   : > { %v1265_v17 = vpop.permute.xlu1 %1264 }
 0x21e   : > { %v1694_v26 = vsel %vm1669_vm11, %v1661_v41, %v1265_v17 }
 0x220   : > { %v8518_v48 = vpop.permute.xlu0 %874 }
 0x221   : > { %v8521_v39 = vpop.permute.xlu1 %969 }
 0x224   : > { %v8525_v10 = vpop.permute.xlu0 %1266 }
 0x225   : > { %v1361_v1 = vpop.permute.xlu1 %1360 }
 0x226   : > { %v1727_v18 = vsel %vm1702_vm12, %v1694_v26, %v1361_v1 }
 0x228   : > { %v8537_v4 = vpop.permute.xlu0 %971 }
 0x229   : > { %v8543_v9 = vpop.permute.xlu1 %1071 }
 0x22a   : > { %v6421_v6 = vpop.f32.mrb[10].mxu0 }
 0x22b   : > { %v2002_v47 = vadd.f32 %v8511_v5, %v6421_v6  ;;  %v1996_v40 = vpop.f32.mrb[11].mxu0 }
 0x22c   : > { %v1997_v23 = vadd.f32 %v8511_v5, %v1996_v40  ;;  %v1363_v27 = vpop.permute.xlu0 %1362 }
 0x22d   : > { %v2324_v45 = vcombine.high %v2002_v47, %v2002_v47  ;;  %v2331_v52 = vrot.slane %v2002_v47, %v7869_v61  ;;  %v1457_v7 = vpop.permute.xlu1 %1456 }
 0x22e   : > { %v2307_v34 = vcombine.high %v1997_v23, %v1997_v23  ;;  %v2314_v11 = vrot.slane %v1997_v23, %v7869_v61  ;;  %v1760_v62 = vsel %vm1735_vm13, %v1727_v18, %v1457_v7 }
 0x22f   : > { %v2338_v17 = vrot.slane %v2324_v45, %v7869_v61  ;;  %v2339_v33 = vcombine.high %v2331_v52, %v2331_v52  ;;  %v6016_v58 = vrot.slane %v2331_v52, 9  ;;  %6440 = vmatprep.mubr.msk.f32.mxu0 %vm9832_vm14, %v1760_v62 }
 0x230   : > { %v2321_v1 = vrot.slane %v2307_v34, %v7869_v61  ;;  %v2322_v30 = vcombine.high %v2314_v11, %v2314_v11  ;;  %v6012_v63 = vrot.slane %v2314_v11, 9  ;;  %v8566_v50 = vpop.permute.xlu0 %699  ;;  %v3020_v34 = vmax.f32 %v2289_v31, %v5951_v3 }
 0x231   : > { %v2340_v12 = vcombine.high %v2338_v17, %v2338_v17  ;;  %v6017_v35 = vrot.slane %v2339_v33, 9  ;;  %v6018_v25 = vrot.slane %v2338_v17, 9  ;;  %v3277_v14 = vmax.f32 %v2331_v52, %v6016_v58  ;;  %v8568_v19 = vpop.permute.xlu1 %1073 }
 0x232   : > { %v2323_v36 = vcombine.high %v2321_v1, %v2321_v1  ;;  %v6013_v13 = vrot.slane %v2322_v30, 9  ;;  %v6014_v6 = vrot.slane %v2321_v1, 9  ;;  %v3273_v41 = vmax.f32 %v2314_v11, %v6012_v63 }
 0x233   : > { %v6019_v47 = vrot.slane %v2340_v12, 9  ;;  %v3278_v40 = vmax.f32 %v2339_v33, %v6017_v35  ;;  %v3279_v26 = vmax.f32 %v2338_v17, %v6018_v25  ;;  %v3341_v32 = vmax.f32 %v8547_v38, %v3277_v14 }
 0x234   : > { %v6015_v29 = vrot.slane %v2323_v36, 9  ;;  %v3274_v23 = vmax.f32 %v2322_v30, %v6013_v13  ;;  %v3275_v18 = vmax.f32 %v2321_v1, %v6014_v6  ;;  %v3337_v45 = vmax.f32 %v3017_v56, %v3273_v41  ;;  %v8571_v7 = vpop.permute.xlu0 %1172 }
 0x235   : > { %v3280_v62 = vmax.f32 %v2340_v12, %v6019_v47  ;;  %v3342_v52 = vmax.f32 %v8549_v42, %v3278_v40  ;;  %v3343_v58 = vmax.f32 %v8553_v54, %v3279_v26  ;;  %v1459_v16 = vpop.permute.xlu1 %1458  ;;  %v1662_v38 = vsel %vm1636_vm10, %v1629_v49, %v8515_v55 }
 0x236   : > { %v3276_v0 = vmax.f32 %v2323_v36, %v6015_v29  ;;  %v3338_v11 = vmax.f32 %v3018_v8, %v3274_v23  ;;  %v3339_v63 = vmax.f32 %v3019_v24, %v3275_v18  ;;  %v3401_v33 = vmax.f32 %v3337_v45, 0.0 }
 0x237   : > { %v3344_v17 = vmax.f32 %v3024_v28, %v3280_v62  ;;  %v1695_v56 = vsel %vm1669_vm11, %v1662_v38, %v8525_v10  ;;  %v3405_v42 = vmax.f32 %v3341_v32, 0.0  ;;  %v3406_v12 = vmax.f32 %v3342_v52, 0.0 }
 0x238   : > { %v3340_v1 = vmax.f32 %v3020_v34, %v3276_v0  ;;  %v3402_v30 = vmax.f32 %v3338_v11, 0.0  ;;  %v3403_v31 = vmax.f32 %v3339_v63, 0.0  ;;  %v8579_v3 = vpop.permute.xlu0 %701  ;;  %v1728_v54 = vsel %vm1702_vm12, %v1695_v56, %v1363_v27 }
 0x239   : > { %v8582_v35 = vpop.permute.xlu1 %876  ;;  %v3580_v24 = vrot.slane %v3401_v33, %v7905_v43  ;;  %v3407_v28 = vmax.f32 %v3343_v58, 0.0  ;;  %v1761_v0 = vsel %vm1735_vm13, %v1728_v54, %v1459_v16  ;;  %v3408_v10 = vmax.f32 %v3344_v17, 0.0  ;;  %v9836_v17 = vld [vmem:[#allocation4_spill] sm:$0xff] }
 0x23a   : > { %v3404_v8 = vmax.f32 %v3340_v1, 0.0  ;;  %v3584_v55 = vrot.slane %v3402_v30, %v7905_v43  ;;  %v3588_v49 = vrot.slane %v3403_v31, %v7905_v43  ;;  %6441 = vmatmul.mubr.msk.f32.gmra.mrb[24].mxu0 %vm9832_vm14, %v1761_v0  ;;  %v3596_v36 = vrot.slane %v3405_v42, %v7905_v43 }
 0x23b   : > { %v3600_v41 = vrot.slane %v3406_v12, %v7905_v43  ;;  %v3604_v40 = vrot.slane %v3407_v28, %v7905_v43  ;;  %v3608_v26 = vrot.slane %v3408_v10, %v7905_v43  ;;  %vm9835_vm14 = vcmask 1047559  }
 0x23c   : > { %v3592_v25 = vrot.slane %v3404_v8, %v7905_v43  ;;  %v3790_v14 = vsel %vm9833_vm15, %v3584_v55, %v3580_v24  ;;  %v1175_v27 = vpop.permute.xlu0 %1174  ;;  %vm9834_vm15 = vcmask 1046534   ;;  %v1531_v56 = vsel %vm1504_vm6, %v9836_v17, %v8486_v51 }
 0x23d   : > { %v3791_v13 = vsel %vm3771_vm4, %v3588_v49, %v3790_v14  ;;  %v1269_v6 = vpop.permute.xlu1 %1268  ;;  %v1564_v31 = vsel %vm1537_vm7, %v1531_v56, %v8506_v53  ;;  %v9838_v14 = vld [vmem:[#allocation5_spill] sm:$0xff] }
 0x23e   : > { %v3792_v47 = vsel %vm3773_vm5, %v3592_v25, %v3791_v13 }
 0x23f   : > { %v3793_v16 = vsel %vm3775_vm3, %v3596_v36, %v3792_v47  ;;  %v1532_v36 = vsel %vm1504_vm6, %v9838_v14, %v8504_v46 }
 0x240   : > { %v8598_v32 = vpop.permute.xlu0 %878  ;;  %v3794_v29 = vsel %vm3777_vm1, %v3600_v41, %v3793_v16 }
 0x241   : > { %v8601_v23 = vpop.permute.xlu1 %973  ;;  %v3795_v18 = vsel %vm9834_vm15, %v3604_v40, %v3794_v29  ;;  %vm9837_vm15 = vcmask 1046528  }
 0x242   : > { %v3796_v45 = vsel %vm9835_vm14, %v3608_v26, %v3795_v18  ;;  %vm9839_vm14 = vcmask 220160  }
 0x243   : > { %v3834_v34 = vrot.slane %v3796_v45, 7 }
 0x244   : > { %v1271_v62 = vpop.permute.xlu0 %1270 }
 0x245   : > { %v1365_v52 = vpop.permute.xlu1 %1364  ;;  %v8606_v58 = vsel %vm396_vm0, 0.0, %v3834_v34  ;;  %v3858_v11 = vsel %vm396_vm0, %v3834_v34, 0.0 }
 0x246   : > { %v6786_v63 = vpack.i.bf16 %v8396_v21, %v8606_v58  ;;  %v3885_v33 = vrot.slane %v8606_v58, 1  ;;  %v3886_v38 = vrot.slane %v3858_v11, 1  ;;  %v3931_v1 = vrot.slane %v8606_v58, 2 }
 0x247   : > { %v3932_v30 = vrot.slane %v3858_v11, 2  ;;  %v1597_v21 = vsel %vm1570_vm8, %v1564_v31, %v8521_v39 }
 0x248   : > { %6787 = vrot.lane.b32.xlu1 %v6786_v63, %s6908_s17  ;;  %v8619_v42 = vpop.permute.xlu0 %975  ;;  %v8622_v12 = vsel %vm9837_vm15, %v3885_v33, %v3886_v38  ;;  %v1630_v53 = vsel %vm1603_vm9, %v1597_v21, %v8543_v9  ;;  %vm9840_vm15 = vmmov %vm9839_vm14 }
 0x249   : > { %v8626_v54 = vpop.permute.xlu1 %1075  ;;  %v6791_v51 = vpack.i.bf16 %v8391_v59, %v8622_v12  ;;  %v8631_v8 = vsel %vm739_vm2, %v3931_v1, %v3932_v30  ;;  %v1663_v49 = vsel %vm1636_vm10, %v1630_v53, %v8571_v7  ;;  %v1565_v7 = vsel %vm1537_vm7, %v1532_v36, %v8518_v48 }
 0x24a   : > { %v6424_v24 = vpop.f32.mrb[12].mxu0  ;;  %v6796_v55 = vpack.i.bf16 %v8439_v37, %v8631_v8  ;;  %v1696_v39 = vsel %vm1669_vm11, %v1663_v49, %v1269_v6  ;;  %v1598_v6 = vsel %vm1570_vm8, %v1565_v7, %v8537_v4 }
 0x24b   : > { %v2006_v28 = vpop.f32.mrb[13].mxu0  ;;  %6792 = vrot.lane.b32.xlu0 %v6791_v51, %s6909_s14  ;;  %v1729_v10 = vsel %vm1702_vm12, %v1696_v39, %v1365_v52  ;;  %v1631_v47 = vsel %vm1603_vm9, %v1598_v6, %v8568_v19  ;;  %v2012_v18 = vadd.f32 %v8511_v5, %v6424_v24 }
 0x24c   : > { %6797 = vrot.lane.b32.xlu1 %v6796_v55, %s6907_s25  ;;  %v1367_v0 = vpop.permute.xlu0 %1366  ;;  %v1664_v40 = vsel %vm1636_vm10, %v1631_v47, %v1175_v27  ;;  %v2007_v45 = vadd.f32 %v8511_v5, %v2006_v28  ;;  %v1533_v55 = vsel %vm1504_vm6, %v7887_v44, %v8566_v50 }
 0x24d   : > { %v1461_v25 = vpop.permute.xlu1 %1460  ;;  %v1697_v16 = vsel %vm1669_vm11, %v1664_v40, %v1271_v62  ;;  %v2358_v52 = vcombine.high %v2012_v18, %v2012_v18  ;;  %v2365_v27 = vrot.slane %v2012_v18, %v7869_v61 }
 0x24e   : > { %v1762_v9 = vsel %vm1735_vm13, %v1729_v10, %v1461_v25  ;;  %v1730_v46 = vsel %vm1702_vm12, %v1697_v16, %v1367_v0  ;;  %v2341_v19 = vcombine.high %v2007_v45, %v2007_v45  ;;  %v2348_v62 = vrot.slane %v2007_v45, %v7869_v61  ;;  %v9841_v45 = vld [vmem:[#allocation7_spill] sm:$0xff] }
 0x24f   : > { %6443 = vmatprep.mubr.msk.f32.mxu0 %vm9839_vm14, %v1762_v9  ;;  %v2372_v33 = vrot.slane %v2358_v52, %v7869_v61  ;;  %v2373_v56 = vcombine.high %v2365_v27, %v2365_v27  ;;  %v5960_v51 = vrot.slane %v2365_v27, 9  ;;  %v1534_v10 = vsel %vm1504_vm6, %v7877_v22, %v8579_v3 }
 0x250   : > { %v704_v13 = vpop.permute.xlu0 %703  ;;  %v2355_v38 = vrot.slane %v2341_v19, %v7869_v61  ;;  %v2356_v1 = vcombine.high %v2348_v62, %v2348_v62  ;;  %v5956_v53 = vrot.slane %v2348_v62, 9  ;;  %v1566_v25 = vsel %vm1537_vm7, %v1533_v55, %v8582_v35 }
 0x251   : > { %v1078_v41 = vpop.permute.xlu1 %1077  ;;  %v2374_v31 = vcombine.high %v2372_v33, %v2372_v33  ;;  %v5961_v49 = vrot.slane %v2373_v56, 9  ;;  %v5962_v28 = vrot.slane %v2372_v33, 9  ;;  %v1567_v36 = vsel %vm1537_vm7, %v1534_v10, %v8598_v32 }
 0x252   : > { %v2357_v21 = vcombine.high %v2355_v38, %v2355_v38  ;;  %v5957_v39 = vrot.slane %v2356_v1, 9  ;;  %v5958_v14 = vrot.slane %v2355_v38, 9  ;;  %v1599_v7 = vsel %vm1570_vm8, %v1566_v25, %v8601_v23 }
 0x253   : > { %v5963_v9 = vrot.slane %v2374_v31, 9  ;;  %v1600_v50 = vsel %vm1570_vm8, %v1567_v36, %v8619_v42  ;;  %v1632_v6 = vsel %vm1603_vm9, %v1599_v7, %v8626_v54  ;;  %v8681_v47 = vmax.f32 %v2365_v27, %v5960_v51 }
 0x254   : > { %v1177_v26 = vpop.permute.xlu0 %1176  ;;  %v5959_v44 = vrot.slane %v2357_v21, 9  ;;  %v8683_v22 = vmax.f32 %v2348_v62, %v5956_v53  ;;  %v8685_v35 = vmax.f32 %v2373_v56, %v5961_v49  ;;  %v8687_v40 = vmax.f32 %v2372_v33, %v5962_v28 }
 0x255   : > { %v1463_v29 = vpop.permute.xlu1 %1462  ;;  %v8689_v32 = vmax.f32 %v2356_v1, %v5957_v39  ;;  %v1535_v23 = vsel %vm1504_vm6, %v8059_v60, %v704_v13  ;;  %v8695_v42 = vmax.f32 %v2355_v38, %v5958_v14  ;;  %v1633_v54 = vsel %vm1603_vm9, %v1600_v50, %v1078_v41 }
 0x256   : > { %v1763_v48 = vsel %vm1735_vm13, %v1730_v46, %v1463_v29  ;;  %v8693_v46 = vmax.f32 %v2374_v31, %v5963_v9  ;;  %v1665_v29 = vsel %vm1636_vm10, %v1632_v6, %v1177_v26 }
 0x257   : > { %6444 = vmatmul.mubr.msk.f32.gmra.mrb[26].mxu0 %vm9840_vm15, %v1763_v48  ;;  %v8699_v48 = vmax.f32 %v2357_v21, %v5959_v44  ;;  %vm9843_vm15 = vcmask 1041409  }
 0x258   : > { %v706_v4 = vpop.permute.xlu0 %705 }
 0x259   : > { %v881_v34 = vpop.permute.xlu1 %880  ;;  %v1536_v52 = vsel %vm1504_vm6, %v9841_v45, %v706_v4  ;;  %vm9842_vm6 = vmmov %vm9839_vm14  ;;  %vm4100_vm14 = vcmask 785408  }
 0x25a   : > { %v1568_v19 = vsel %vm1537_vm7, %v1535_v23, %v881_v34 }
 0x25c   : > { %v1179_v11 = vpop.permute.xlu0 %1178 }
 0x25d   : > { %v1273_v63 = vpop.permute.xlu1 %1272  ;;  %v1666_v13 = vsel %vm1636_vm10, %v1633_v54, %v1179_v11 }
 0x25e   : > { %v1698_v62 = vsel %vm1669_vm11, %v1665_v29, %v1273_v63 }
 0x260   : > { %v883_v17 = vpop.permute.xlu0 %882 }
 0x261   : > { %v978_v30 = vpop.permute.xlu1 %977  ;;  %v1569_v33 = vsel %vm1537_vm7, %v1536_v52, %v883_v17  ;;  %vm4082_vm7 = vcmask 261120  }
 0x262   : > { %v1601_v38 = vsel %vm1570_vm8, %v1568_v19, %v978_v30 }
 0x264   : > { %v1275_v24 = vpop.permute.xlu0 %1274 }
 0x265   : > { %v1369_v0 = vpop.permute.xlu1 %1368  ;;  %v1699_v31 = vsel %vm1669_vm11, %v1666_v13, %v1275_v24 }
 0x266   : > { %v1731_v56 = vsel %vm1702_vm12, %v1698_v62, %v1369_v0 }
 0x268   : > { %v980_v3 = vpop.permute.xlu0 %979 }
 0x269   : > { %v1080_v16 = vpop.permute.xlu1 %1079  ;;  %v1602_v17 = vsel %vm1570_vm8, %v1569_v33, %v980_v3  ;;  %vm4091_vm8 = vcmask 523264  }
 0x26a   : > { %v6427_v18 = vpop.f32.mrb[14].mxu0  ;;  %v1634_v30 = vsel %vm1603_vm9, %v1601_v38, %v1080_v16 }
 0x26b   : > { %v2022_v27 = vadd.f32 %v8511_v5, %v6427_v18  ;;  %v2016_v60 = vpop.f32.mrb[15].mxu0 }
 0x26c   : > { %v2017_v41 = vadd.f32 %v8511_v5, %v2016_v60  ;;  %v1371_v26 = vpop.permute.xlu0 %1370 }
 0x26d   : > { %v2392_v1 = vcombine.high %v2022_v27, %v2022_v27  ;;  %v2399_v4 = vrot.slane %v2022_v27, %v7869_v61  ;;  %v1465_v34 = vpop.permute.xlu1 %1464 }
 0x26e   : > { %v2375_v21 = vcombine.high %v2017_v41, %v2017_v41  ;;  %v2382_v11 = vrot.slane %v2017_v41, %v7869_v61  ;;  %v1764_v63 = vsel %vm1735_vm13, %v1731_v56, %v1465_v34 }
 0x26f   : > { %v2406_v51 = vrot.slane %v2392_v1, %v7869_v61  ;;  %v2407_v53 = vcombine.high %v2399_v4, %v2399_v4  ;;  %v6024_v55 = vrot.slane %v2399_v4, 9  ;;  %6446 = vmatprep.mubr.msk.f32.mxu0 %vm9842_vm6, %v1764_v63 }
 0x270   : > { %v2389_v49 = vrot.slane %v2375_v21, %v7869_v61  ;;  %v2390_v28 = vcombine.high %v2382_v11, %v2382_v11  ;;  %v6020_v39 = vrot.slane %v2382_v11, 9  ;;  %v1082_v24 = vpop.permute.xlu0 %1081 }
 0x271   : > { %v2408_v0 = vcombine.high %v2406_v51, %v2406_v51  ;;  %v6025_v10 = vrot.slane %v2407_v53, 9  ;;  %v6026_v25 = vrot.slane %v2406_v51, 9  ;;  %v3285_v9 = vmax.f32 %v2399_v4, %v6024_v55  ;;  %v1181_v14 = vpop.permute.xlu1 %1180 }
 0x272   : > { %v2391_v36 = vcombine.high %v2389_v49, %v2389_v49  ;;  %v6021_v7 = vrot.slane %v2390_v28, 9  ;;  %v6022_v44 = vrot.slane %v2389_v49, 9  ;;  %v3281_v50 = vmax.f32 %v2382_v11, %v6020_v39 }
 0x273   : > { %v6027_v6 = vrot.slane %v2408_v0, 9  ;;  %v3286_v3 = vmax.f32 %v2407_v53, %v6025_v10  ;;  %v3287_v23 = vmax.f32 %v2406_v51, %v6026_v25  ;;  %v3349_v54 = vmax.f32 %v8681_v47, %v3285_v9 }
 0x274   : > { %v6023_v16 = vrot.slane %v2391_v36, 9  ;;  %v3282_v29 = vmax.f32 %v2390_v28, %v6021_v7  ;;  %v3283_v18 = vmax.f32 %v2389_v49, %v6022_v44  ;;  %v3345_v45 = vmax.f32 %v8683_v22, %v3281_v50  ;;  %v1467_v52 = vpop.permute.xlu0 %1466 }
 0x275   : > { %v3288_v19 = vmax.f32 %v2408_v0, %v6027_v6  ;;  %v3350_v27 = vmax.f32 %v8685_v35, %v3286_v3  ;;  %v3351_v60 = vmax.f32 %v8687_v40, %v3287_v23  ;;  %v3413_v13 = vmax.f32 %v3349_v54, 0.0  ;;  %v1183_v62 = vpop.permute.xlu1 %1182 }
 0x276   : > { %v3284_v33 = vmax.f32 %v2391_v36, %v6023_v16  ;;  %v3346_v41 = vmax.f32 %v8689_v32, %v3282_v29  ;;  %v3347_v38 = vmax.f32 %v8695_v42, %v3283_v18  ;;  %v3409_v56 = vmax.f32 %v3345_v45, 0.0 }
 0x277   : > { %v3352_v47 = vmax.f32 %v8693_v46, %v3288_v19  ;;  %v3414_v1 = vmax.f32 %v3350_v27, 0.0  ;;  %v3415_v4 = vmax.f32 %v3351_v60, 0.0  ;;  %v1732_v22 = vsel %vm1702_vm12, %v1699_v31, %v1371_v26 }
 0x278   : > { %v3628_v34 = vrot.slane %v3413_v13, %v7905_v43  ;;  %v3348_v35 = vmax.f32 %v8699_v48, %v3284_v33  ;;  %v3410_v40 = vmax.f32 %v3346_v41, 0.0  ;;  %v3411_v21 = vmax.f32 %v3347_v38, 0.0  ;;  %v6753_v11 = vpop.permute.xlu0 %6752 }
 0x279   : > { %v3416_v63 = vmax.f32 %v3352_v47, 0.0  ;;  %v3632_v32 = vrot.slane %v3414_v1, %v7905_v43  ;;  %v3636_v42 = vrot.slane %v3415_v4, %v7905_v43  ;;  %v3612_v51 = vrot.slane %v3409_v56, %v7905_v43  ;;  %v6758_v46 = vpop.permute.xlu1 %6757 }
 0x27a   : > { %v3412_v53 = vmax.f32 %v3348_v35, 0.0  ;;  %v3616_v26 = vrot.slane %v3410_v40, %v7905_v43  ;;  %v3620_v31 = vrot.slane %v3411_v21, %v7905_v43  ;;  %v1635_v48 = vsel %vm1603_vm9, %v1602_v17, %v1082_v24  ;;  %vm9844_vm9 = vmmov %vm9842_vm6 }
 0x27b   : > { %v1667_v55 = vsel %vm1636_vm10, %v1634_v30, %v1181_v14  ;;  %v1765_v49 = vsel %vm1735_vm13, %v1732_v22, %v1467_v52  ;;  %v1668_v28 = vsel %vm1636_vm10, %v1635_v48, %v1183_v62  ;;  %v6755_v39 = vunpack.i.h.bf16 %v6753_v11 }
 0x27c   : > { %v3624_v0 = vrot.slane %v3412_v53, %v7905_v43  ;;  %v3797_v10 = vsel %vm9843_vm15, %v3616_v26, %v3612_v51  ;;  %6447 = vmatmul.mubr.msk.f32.gmra.mrb[28].mxu0 %vm9842_vm6, %v1765_v49  ;;  %v6754_v25 = vunpack.i.l.bf16 %v6753_v11  ;;  %v6760_v9 = vunpack.i.h.bf16 %v6758_v46  ;;  %v6763_v36 = vpop.permute.xlu0 %6762 }
 0x27d   : > { %v3798_v7 = vsel %vm3771_vm4, %v3620_v31, %v3797_v10  ;;  %v1701_v17 = vsel %vm1669_vm11, %v1668_v28, %v6755_v39  ;;  %v6759_v24 = vunpack.i.l.bf16 %v6758_v46  ;;  %v6765_v30 = vunpack.i.h.bf16 %v6763_v36  ;;  %v6768_v14 = vpop.permute.xlu1 %6767 }
 0x27e   : > { %v3799_v44 = vsel %vm3773_vm5, %v3624_v0, %v3798_v7  ;;  %v1700_v50 = vsel %vm1669_vm11, %v1667_v55, %v6754_v25  ;;  %v6764_v6 = vunpack.i.l.bf16 %v6763_v36  ;;  %v6770_v3 = vunpack.i.h.bf16 %v6768_v14  ;;  %vm9846_vm11 = vmmov %vm9842_vm6 }
 0x27f   : > { %v3800_v23 = vsel %vm3775_vm3, %v3628_v34, %v3799_v44  ;;  %v6769_v54 = vunpack.i.l.bf16 %v6768_v14  ;;  %v1733_v16 = vsel %vm1702_vm12, %v1700_v50, %v6759_v24  ;;  %v1734_v29 = vsel %vm1702_vm12, %v1701_v17, %v6760_v9 }
 0x280   : > { %v3640_v18 = vrot.slane %v3416_v63, %v7905_v43  ;;  %v6773_v45 = vpop.permute.xlu0 %6772  ;;  %v1766_v52 = vsel %vm1735_vm13, %v1733_v16, %v6764_v6  ;;  %v1767_v19 = vsel %vm1735_vm13, %v1734_v29, %v6765_v30  ;;  %v3801_v27 = vsel %vm3777_vm1, %v3632_v32, %v3800_v23 }
 0x281   : > { %v6775_v60 = vunpack.i.h.bf16 %v6773_v45  ;;  %v6774_v13 = vunpack.i.l.bf16 %v6773_v45  ;;  %6449 = vmatprep.mubr.msk.f32.mxu0 %vm9844_vm9, %v1766_v52  ;;  %v6778_v62 = vpop.permute.xlu1 %6777  ;;  %v4083_v33 = vsel %vm4082_vm7, %v6978_v2, %v6770_v3  ;;  %vm9845_vm10 = vcmask 1046534  }
 0x282   : > { %v3802_v41 = vsel %vm9845_vm10, %v3636_v42, %v3801_v27  ;;  %v6780_v38 = vunpack.i.h.bf16 %v6778_v62  ;;  %v6779_v56 = vunpack.i.l.bf16 %v6778_v62  ;;  %6450 = vmatmul.mubr.msk.f32.gmra.mrb[30].mxu0 %vm9846_vm11, %v1767_v19  ;;  %v4109_v47 = vsel %vm4082_vm7, %v8476_v15, %v6769_v54  ;;  %vm9849_vm6 = vmmov %vm9845_vm10 }
 0x283   : > { %vm9847_vm12 = vcmask 1047559   ;;  %v4117_v4 = vsel %vm4091_vm8, %v4109_v47, %v6774_v13  ;;  %v4092_v22 = vsel %vm4091_vm8, %v4083_v33, %v6775_v60  ;;  %vm9848_vm13 = vcmask 1046528   ;;  %vm9852_vm11 = vmmov %vm9843_vm15 }
 0x284   : > { %v3803_v1 = vsel %vm9847_vm12, %v3640_v18, %v3802_v41  ;;  %v4125_v35 = vsel %vm4100_vm14, %v4117_v4, %v6779_v56  ;;  %v4101_v40 = vsel %vm4100_vm14, %v4092_v22, %v6780_v38  ;;  %vm9850_vm9 = vmmov %vm9847_vm12 }
 0x285   : > { %v3835_v34 = vrot.slane %v3803_v1, 7  ;;  %4256 = vmatprep.mubr.f32.mxu1 %v4125_v35  ;;  %vm9851_vm10 = vmmov %vm9848_vm13 }
 0x286   : > { %4257 = vmatmul.mubr.f32.vlgmr.msra.gmra.mrb[0].mxu1 %v4101_v40  ;;  %vm9853_vm12 = vmmov %vm9849_vm6 }
 0x287   : > { %v8766_v21 = vsel %vm396_vm0, 0.0, %v3835_v34  ;;  %v3859_v11 = vsel %vm396_vm0, %v3835_v34, 0.0 }
 0x288   : > { %v6801_v15 = vpack.i.bf16 %v8466_v57, %v8766_v21  ;;  %v3888_v63 = vrot.slane %v8766_v21, 1  ;;  %v3889_v32 = vrot.slane %v3859_v11, 1  ;;  %v3934_v42 = vrot.slane %v8766_v21, 2 }
 0x289   : > { %v3935_v51 = vrot.slane %v3859_v11, 2 }
 0x28a   : > { %6802 = vrot.lane.b32.xlu0 %v6801_v15, %s6908_s17  ;;  %v8775_v46 = vsel %vm9848_vm13, %v3888_v63, %v3889_v32  ;;  %vm9854_vm13 = vmmov %vm9850_vm9 }
 0x28b   : > { %v6806_v53 = vpack.i.bf16 %v8606_v58, %v8775_v46  ;;  %v8780_v26 = vsel %vm739_vm2, %v3934_v42, %v3935_v51 }
 0x28c   : > { %v6811_v31 = vpack.i.bf16 %v8622_v12, %v8780_v26 }
 0x28d   : > { %6807 = vrot.lane.b32.xlu1 %v6806_v53, %s6909_s14 }
 0x28e   : > { %6812 = vrot.lane.b32.xlu0 %v6811_v31, %s6907_s25 }
 0x290   : > { %v6430_v48 = vpop.f32.mrb[16].mxu0 }
 0x291   : > { %v2026_v55 = vpop.f32.mrb[17].mxu0  ;;  %v2032_v49 = vadd.f32 %v8511_v5, %v6430_v48 }
 0x292   : > { %v2027_v28 = vadd.f32 %v8511_v5, %v2026_v55 }
 0x293   : > { %v2426_v39 = vcombine.high %v2032_v49, %v2032_v49  ;;  %v2433_v0 = vrot.slane %v2032_v49, %v7869_v61 }
 0x294   : > { %v2409_v10 = vcombine.high %v2027_v28, %v2027_v28  ;;  %v2416_v25 = vrot.slane %v2027_v28, %v7869_v61 }
 0x295   : > { %v2440_v9 = vrot.slane %v2426_v39, %v7869_v61  ;;  %v2441_v36 = vcombine.high %v2433_v0, %v2433_v0  ;;  %v5968_v30 = vrot.slane %v2433_v0, 9 }
 0x296   : > { %v2423_v7 = vrot.slane %v2409_v10, %v7869_v61  ;;  %v2424_v17 = vcombine.high %v2416_v25, %v2416_v25  ;;  %v5964_v14 = vrot.slane %v2416_v25, 9 }
 0x297   : > { %v2442_v24 = vcombine.high %v2440_v9, %v2440_v9  ;;  %v5969_v44 = vrot.slane %v2441_v36, 9  ;;  %v5970_v50 = vrot.slane %v2440_v9, 9  ;;  %v3037_v45 = vmax.f32 %v2433_v0, %v5968_v30  ;;  %v6783_v30 = vpop.permute.xlu0 %6782 }
 0x298   : > { %v2425_v6 = vcombine.high %v2423_v7, %v2423_v7  ;;  %v5965_v3 = vrot.slane %v2424_v17, 9  ;;  %v5966_v54 = vrot.slane %v2423_v7, 9  ;;  %v3033_v52 = vmax.f32 %v2416_v25, %v5964_v14 }
 0x299   : > { %v5971_v18 = vrot.slane %v2442_v24, 9  ;;  %v3038_v27 = vmax.f32 %v2441_v36, %v5969_v44  ;;  %v3039_v60 = vmax.f32 %v2440_v9, %v5970_v50 }
 0x29a   : > { %v5967_v33 = vrot.slane %v2425_v6, 9  ;;  %v3034_v41 = vmax.f32 %v2424_v17, %v5965_v3  ;;  %v3035_v47 = vmax.f32 %v2423_v7, %v5966_v54 }
 0x29b   : > { %v3040_v34 = vmax.f32 %v2442_v24, %v5971_v18  ;;  %v6785_v18 = vunpack.i.h.bf16 %v6783_v30 }
 0x29c   : > { %v3036_v36 = vmax.f32 %v2425_v6, %v5967_v33 }
 0x2aa   : > { %v6433_v23 = vpop.f32.mrb[18].mxu0 }
 0x2ab   : > { %v2042_v16 = vadd.f32 %v8511_v5, %v6433_v23  ;;  %v2036_v29 = vpop.f32.mrb[19].mxu0 }
 0x2ac   : > { %v2037_v19 = vadd.f32 %v8511_v5, %v2036_v29 }
 0x2ad   : > { %v2460_v13 = vcombine.high %v2042_v16, %v2042_v16  ;;  %v2467_v62 = vrot.slane %v2042_v16, %v7869_v61 }
 0x2ae   : > { %v2443_v38 = vcombine.high %v2037_v19, %v2037_v19  ;;  %v2450_v56 = vrot.slane %v2037_v19, %v7869_v61  ;;  %v6784_v19 = vunpack.i.l.bf16 %v6783_v30 }
 0x2af   : > { %v2474_v1 = vrot.slane %v2460_v13, %v7869_v61  ;;  %v2475_v4 = vcombine.high %v2467_v62, %v2467_v62  ;;  %v6032_v22 = vrot.slane %v2467_v62, 9 }
 0x2b0   : > { %v2457_v35 = vrot.slane %v2443_v38, %v7869_v61  ;;  %v2458_v40 = vcombine.high %v2450_v56, %v2450_v56  ;;  %v6028_v11 = vrot.slane %v2450_v56, 9 }
 0x2b1   : > { %v2476_v15 = vcombine.high %v2474_v1, %v2474_v1  ;;  %v6033_v63 = vrot.slane %v2475_v4, 9  ;;  %v6034_v32 = vrot.slane %v2474_v1, 9  ;;  %v3293_v42 = vmax.f32 %v2467_v62, %v6032_v22 }
 0x2b2   : > { %v2459_v51 = vcombine.high %v2457_v35, %v2457_v35  ;;  %v6029_v53 = vrot.slane %v2458_v40, 9  ;;  %v6030_v31 = vrot.slane %v2457_v35, 9  ;;  %v3289_v48 = vmax.f32 %v2450_v56, %v6028_v11 }
 0x2b3   : > { %v6035_v55 = vrot.slane %v2476_v15, 9  ;;  %v3294_v49 = vmax.f32 %v2475_v4, %v6033_v63  ;;  %v3295_v28 = vmax.f32 %v2474_v1, %v6034_v32  ;;  %v3357_v39 = vmax.f32 %v3037_v45, %v3293_v42 }
 0x2b4   : > { %v6031_v0 = vrot.slane %v2459_v51, 9  ;;  %v3290_v10 = vmax.f32 %v2458_v40, %v6029_v53  ;;  %v3291_v25 = vmax.f32 %v2457_v35, %v6030_v31  ;;  %v3353_v9 = vmax.f32 %v3033_v52, %v3289_v48 }
 0x2b5   : > { %v3296_v7 = vmax.f32 %v2476_v15, %v6035_v55  ;;  %v3358_v17 = vmax.f32 %v3038_v27, %v3294_v49  ;;  %v3359_v24 = vmax.f32 %v3039_v60, %v3295_v28  ;;  %v3421_v45 = vmax.f32 %v3357_v39, 0.0 }
 0x2b6   : > { %v3292_v14 = vmax.f32 %v2459_v51, %v6031_v0  ;;  %v3354_v44 = vmax.f32 %v3034_v41, %v3290_v10  ;;  %v3355_v50 = vmax.f32 %v3035_v47, %v3291_v25  ;;  %v3417_v3 = vmax.f32 %v3353_v9, 0.0 }
 0x2b7   : > { %v3360_v23 = vmax.f32 %v3040_v34, %v3296_v7  ;;  %v3422_v13 = vmax.f32 %v3358_v17, 0.0  ;;  %v3423_v33 = vmax.f32 %v3359_v24, 0.0  ;;  %v3660_v4 = vrot.slane %v3421_v45, %v7905_v43 }
 0x2b8   : > { %v3356_v54 = vmax.f32 %v3036_v36, %v3292_v14  ;;  %v3418_v16 = vmax.f32 %v3354_v44, 0.0  ;;  %v3419_v29 = vmax.f32 %v3355_v50, 0.0  ;;  %v3644_v52 = vrot.slane %v3417_v3, %v7905_v43 }
 0x2b9   : > { %v3424_v56 = vmax.f32 %v3360_v23, 0.0  ;;  %v4110_v35 = vsel %vm4082_vm7, %v8439_v37, %v6784_v19  ;;  %v4084_v40 = vsel %vm4082_vm7, %v8335_v20, %v6785_v18  ;;  %v3664_v11 = vrot.slane %v3422_v13, %v7905_v43 }
 0x2ba   : > { %v3420_v62 = vmax.f32 %v3356_v54, 0.0  ;;  %v3648_v6 = vrot.slane %v3418_v16, %v7905_v43  ;;  %v3652_v27 = vrot.slane %v3419_v29, %v7905_v43  ;;  %v6788_v60 = vpop.permute.xlu1 %6787  ;;  %v3668_v42 = vrot.slane %v3423_v33, %v7905_v43 }
 0x2bb   : > { %v6790_v41 = vunpack.i.h.bf16 %v6788_v60  ;;  %v6789_v38 = vunpack.i.l.bf16 %v6788_v60  ;;  %v3672_v48 = vrot.slane %v3424_v56, %v7905_v43 }
 0x2bc   : > { %v3656_v47 = vrot.slane %v3420_v62, %v7905_v43  ;;  %v3804_v1 = vsel %vm9843_vm15, %v3648_v6, %v3644_v52  ;;  %vm9855_vm15 = vmmov %vm9851_vm10 }
 0x2bd   : > { %v3805_v22 = vsel %vm3771_vm4, %v3652_v27, %v3804_v1  ;;  %v6793_v34 = vpop.permute.xlu0 %6792  ;;  %v4118_v53 = vsel %vm4091_vm8, %v4110_v35, %v6789_v38  ;;  %v4093_v31 = vsel %vm4091_vm8, %v4084_v40, %v6790_v41 }
 0x2be   : > { %v3806_v15 = vsel %vm3773_vm5, %v3656_v47, %v3805_v22  ;;  %v6795_v63 = vunpack.i.h.bf16 %v6793_v34  ;;  %v6794_v32 = vunpack.i.l.bf16 %v6793_v34 }
 0x2bf   : > { %v3807_v51 = vsel %vm3775_vm3, %v3660_v4, %v3806_v15 }
 0x2c0   : > { %v4126_v37 = vsel %vm4100_vm14, %v4118_v53, %v6794_v32  ;;  %v4102_v20 = vsel %vm4100_vm14, %v4093_v31, %v6795_v63  ;;  %v3808_v55 = vsel %vm3777_vm1, %v3664_v11, %v3807_v51 }
 0x2c1   : > { %4261 = vmatprep.mubr.f32.mxu1 %v4126_v37  ;;  %v3809_v49 = vsel %vm9849_vm6, %v3668_v42, %v3808_v55  ;;  %vm9856_vm6 = vmmov %vm9852_vm11 }
 0x2c2   : > { %4262 = vmatmul.mubr.f32.gmra.mrb[2].mxu1 %v4102_v20  ;;  %v3810_v28 = vsel %vm9850_vm9, %v3672_v48, %v3809_v49  ;;  %vm9857_vm9 = vmmov %vm9853_vm12 }
 0x2c3   : > { %v3836_v39 = vrot.slane %v3810_v28, 7 }
 0x2c5   : > { %v8822_v0 = vsel %vm396_vm0, 0.0, %v3836_v39  ;;  %v3860_v10 = vsel %vm396_vm0, %v3836_v39, 0.0 }
 0x2c6   : > { %v6816_v25 = vpack.i.bf16 %v8631_v8, %v8822_v0  ;;  %v3891_v9 = vrot.slane %v8822_v0, 1  ;;  %v3892_v36 = vrot.slane %v3860_v10, 1  ;;  %v3937_v7 = vrot.slane %v8822_v0, 2 }
 0x2c7   : > { %v3938_v17 = vrot.slane %v3860_v10, 2 }
 0x2c8   : > { %6817 = vrot.lane.b32.xlu1 %v6816_v25, %s6908_s17  ;;  %v8831_v24 = vsel %vm9851_vm10, %v3891_v9, %v3892_v36  ;;  %vm9858_vm10 = vmmov %vm9854_vm13 }
 0x2c9   : > { %v6821_v30 = vpack.i.bf16 %v8766_v21, %v8831_v24  ;;  %v8836_v14 = vsel %vm739_vm2, %v3937_v7, %v3938_v17 }
 0x2ca   : > { %v6826_v44 = vpack.i.bf16 %v8775_v46, %v8836_v14 }
 0x2cb   : > { %6822 = vrot.lane.b32.xlu0 %v6821_v30, %s6909_s14 }
 0x2cc   : > { %6827 = vrot.lane.b32.xlu1 %v6826_v44, %s6907_s25 }
 0x2cf   : > { %v6436_v50 = vpop.f32.mrb[20].mxu0 }
 0x2d0   : > { %v2046_v3 = vpop.f32.mrb[21].mxu0  ;;  %v2052_v23 = vadd.f32 %v8511_v5, %v6436_v50 }
 0x2d1   : > { %v2047_v54 = vadd.f32 %v8511_v5, %v2046_v3 }
 0x2d2   : > { %v2494_v16 = vcombine.high %v2052_v23, %v2052_v23  ;;  %v2501_v29 = vrot.slane %v2052_v23, %v7869_v61 }
 0x2d3   : > { %v2477_v18 = vcombine.high %v2047_v54, %v2047_v54  ;;  %v2484_v19 = vrot.slane %v2047_v54, %v7869_v61 }
 0x2d4   : > { %v2508_v45 = vrot.slane %v2494_v16, %v7869_v61  ;;  %v2509_v13 = vcombine.high %v2501_v29, %v2501_v29  ;;  %v5976_v27 = vrot.slane %v2501_v29, 9 }
 0x2d5   : > { %v2491_v62 = vrot.slane %v2477_v18, %v7869_v61  ;;  %v2492_v52 = vcombine.high %v2484_v19, %v2484_v19  ;;  %v5972_v60 = vrot.slane %v2484_v19, 9 }
 0x2d6   : > { %v2510_v6 = vcombine.high %v2508_v45, %v2508_v45  ;;  %v5977_v33 = vrot.slane %v2509_v13, 9  ;;  %v5978_v41 = vrot.slane %v2508_v45, 9  ;;  %v3045_v35 = vmax.f32 %v2501_v29, %v5976_v27  ;;  %v6798_v27 = vpop.permute.xlu1 %6797 }
 0x2d7   : > { %v2493_v38 = vcombine.high %v2491_v62, %v2491_v62  ;;  %v5973_v56 = vrot.slane %v2492_v52, 9  ;;  %v5974_v1 = vrot.slane %v2491_v62, 9  ;;  %v3041_v40 = vmax.f32 %v2484_v19, %v5972_v60 }
 0x2d8   : > { %v5979_v34 = vrot.slane %v2510_v6, 9  ;;  %v3046_v15 = vmax.f32 %v2509_v13, %v5977_v33  ;;  %v3047_v63 = vmax.f32 %v2508_v45, %v5978_v41 }
 0x2d9   : > { %v5975_v51 = vrot.slane %v2493_v38, 9  ;;  %v3042_v53 = vmax.f32 %v2492_v52, %v5973_v56  ;;  %v3043_v37 = vmax.f32 %v2491_v62, %v5974_v1 }
 0x2da   : > { %v3048_v28 = vmax.f32 %v2510_v6, %v5979_v34  ;;  %v6800_v34 = vunpack.i.h.bf16 %v6798_v27 }
 0x2db   : > { %v3044_v13 = vmax.f32 %v2493_v38, %v5975_v51 }
 0x2ea   : > { %v6439_v47 = vpop.f32.mrb[22].mxu0 }
 0x2eb   : > { %v2062_v4 = vadd.f32 %v8511_v5, %v6439_v47  ;;  %v2056_v22 = vpop.f32.mrb[23].mxu0 }
 0x2ec   : > { %v2057_v11 = vadd.f32 %v8511_v5, %v2056_v22 }
 0x2ed   : > { %v2528_v32 = vcombine.high %v2062_v4, %v2062_v4  ;;  %v2535_v42 = vrot.slane %v2062_v4, %v7869_v61 }
 0x2ee   : > { %v2511_v31 = vcombine.high %v2057_v11, %v2057_v11  ;;  %v2518_v48 = vrot.slane %v2057_v11, %v7869_v61  ;;  %v6799_v11 = vunpack.i.l.bf16 %v6798_v27 }
 0x2ef   : > { %v2542_v20 = vrot.slane %v2528_v32, %v7869_v61  ;;  %v2543_v55 = vcombine.high %v2535_v42, %v2535_v42  ;;  %v6040_v49 = vrot.slane %v2535_v42, 9 }
 0x2f0   : > { %v2525_v39 = vrot.slane %v2511_v31, %v7869_v61  ;;  %v2526_v10 = vcombine.high %v2518_v48, %v2518_v48  ;;  %v6036_v5 = vrot.slane %v2518_v48, 9 }
 0x2f1   : > { %v2544_v25 = vcombine.high %v2542_v20, %v2542_v20  ;;  %v6041_v9 = vrot.slane %v2543_v55, 9  ;;  %v6042_v36 = vrot.slane %v2542_v20, 9  ;;  %v3301_v7 = vmax.f32 %v2535_v42, %v6040_v49 }
 0x2f2   : > { %v2527_v17 = vcombine.high %v2525_v39, %v2525_v39  ;;  %v6037_v30 = vrot.slane %v2526_v10, 9  ;;  %v6038_v44 = vrot.slane %v2525_v39, 9  ;;  %v3297_v50 = vmax.f32 %v2518_v48, %v6036_v5 }
 0x2f3   : > { %v6043_v3 = vrot.slane %v2544_v25, 9  ;;  %v3302_v23 = vmax.f32 %v2543_v55, %v6041_v9  ;;  %v3303_v54 = vmax.f32 %v2542_v20, %v6042_v36  ;;  %v3365_v16 = vmax.f32 %v3045_v35, %v3301_v7 }
 0x2f4   : > { %v6039_v29 = vrot.slane %v2527_v17, 9  ;;  %v3298_v18 = vmax.f32 %v2526_v10, %v6037_v30  ;;  %v3299_v19 = vmax.f32 %v2525_v39, %v6038_v44  ;;  %v3361_v45 = vmax.f32 %v3041_v40, %v3297_v50 }
 0x2f5   : > { %v3304_v62 = vmax.f32 %v2544_v25, %v6043_v3  ;;  %v3366_v52 = vmax.f32 %v3046_v15, %v3302_v23  ;;  %v3367_v6 = vmax.f32 %v3047_v63, %v3303_v54  ;;  %v3429_v35 = vmax.f32 %v3365_v16, 0.0 }
 0x2f6   : > { %v3300_v60 = vmax.f32 %v2527_v17, %v6039_v29  ;;  %v3362_v33 = vmax.f32 %v3042_v53, %v3298_v18  ;;  %v3363_v41 = vmax.f32 %v3043_v37, %v3299_v19  ;;  %v3425_v56 = vmax.f32 %v3361_v45, 0.0 }
 0x2f7   : > { %v3368_v47 = vmax.f32 %v3048_v28, %v3304_v62  ;;  %v3430_v32 = vmax.f32 %v3366_v52, 0.0  ;;  %v3431_v51 = vmax.f32 %v3367_v6, 0.0  ;;  %v3692_v55 = vrot.slane %v3429_v35, %v7905_v43 }
 0x2f8   : > { %v3364_v1 = vmax.f32 %v3044_v13, %v3300_v60  ;;  %v3426_v4 = vmax.f32 %v3362_v33, 0.0  ;;  %v3427_v22 = vmax.f32 %v3363_v41, 0.0  ;;  %v3676_v40 = vrot.slane %v3425_v56, %v7905_v43 }
 0x2f9   : > { %v3432_v48 = vmax.f32 %v3368_v47, 0.0  ;;  %v4111_v39 = vsel %vm4082_vm7, %v8622_v12, %v6799_v11  ;;  %v4085_v10 = vsel %vm4082_vm7, %v8391_v59, %v6800_v34  ;;  %v3696_v5 = vrot.slane %v3430_v32, %v7905_v43  ;;  %v8901_v47 = vld [vmem:[%s9770_s2] ss:$0 sm:$0xff] }
 0x2fa   : > { %v3428_v42 = vmax.f32 %v3364_v1, 0.0  ;;  %v3680_v38 = vrot.slane %v3426_v4, %v7905_v43  ;;  %v3684_v15 = vrot.slane %v3427_v22, %v7905_v43  ;;  %v3700_v7 = vrot.slane %v3431_v51, %v7905_v43 }
 0x2fb   : > { %v3704_v50 = vrot.slane %v3432_v48, %v7905_v43 }
 0x2fc   : > { %v6803_v63 = vpop.permute.xlu0 %6802  ;;  %v3688_v37 = vrot.slane %v3428_v42, %v7905_v43  ;;  %v3811_v20 = vsel %vm9852_vm11, %v3680_v38, %v3676_v40  ;;  %vm9859_vm11 = vmmov %vm9855_vm15 }
 0x2fd   : > { %v6805_v53 = vunpack.i.h.bf16 %v6803_v63  ;;  %v6804_v31 = vunpack.i.l.bf16 %v6803_v63  ;;  %v3812_v49 = vsel %vm3771_vm4, %v3684_v15, %v3811_v20 }
 0x2fe   : > { %v3813_v25 = vsel %vm3773_vm5, %v3688_v37, %v3812_v49 }
 0x2ff   : > { %v6808_v28 = vpop.permute.xlu1 %6807  ;;  %v3814_v17 = vsel %vm3775_vm3, %v3692_v55, %v3813_v25  ;;  %v4119_v30 = vsel %vm4091_vm8, %v4111_v39, %v6804_v31  ;;  %v4094_v44 = vsel %vm4091_vm8, %v4085_v10, %v6805_v53 }
 0x300   : > { %v6810_v9 = vunpack.i.h.bf16 %v6808_v28  ;;  %v6809_v36 = vunpack.i.l.bf16 %v6808_v28  ;;  %v3815_v3 = vsel %vm3777_vm1, %v3696_v5, %v3814_v17 }
 0x301   : > { %v3816_v23 = vsel %vm9853_vm12, %v3700_v7, %v3815_v3  ;;  %vm9860_vm12 = vmmov %vm9856_vm6 }
 0x302   : > { %v4127_v12 = vsel %vm4100_vm14, %v4119_v30, %v6809_v36  ;;  %v4103_v59 = vsel %vm4100_vm14, %v4094_v44, %v6810_v9  ;;  %v3817_v54 = vsel %vm9854_vm13, %v3704_v50, %v3816_v23  ;;  %vm9861_vm13 = vmmov %vm9857_vm9 }
 0x303   : > { %4266 = vmatprep.mubr.f32.mxu1 %v4127_v12  ;;  %v3837_v16 = vrot.slane %v3817_v54, 7 }
 0x304   : > { %4267 = vmatmul.mubr.f32.gmra.mrb[4].mxu1 %v4103_v59 }
 0x305   : > { %v8878_v29 = vsel %vm396_vm0, 0.0, %v3837_v16  ;;  %v3861_v18 = vsel %vm396_vm0, %v3837_v16, 0.0 }
 0x306   : > { %v6831_v19 = vpack.i.bf16 %v8780_v26, %v8878_v29  ;;  %v3894_v45 = vrot.slane %v8878_v29, 1  ;;  %v3895_v13 = vrot.slane %v3861_v18, 1  ;;  %v3940_v62 = vrot.slane %v8878_v29, 2 }
 0x307   : > { %v3941_v52 = vrot.slane %v3861_v18, 2 }
 0x308   : > { %6832 = vrot.lane.b32.xlu0 %v6831_v19, %s6908_s17  ;;  %v8887_v6 = vsel %vm9855_vm15, %v3894_v45, %v3895_v13  ;;  %vm9862_vm15 = vmmov %vm9858_vm10 }
 0x309   : > { %v6836_v27 = vpack.i.bf16 %v8822_v0, %v8887_v6  ;;  %v8892_v60 = vsel %vm739_vm2, %v3940_v62, %v3941_v52 }
 0x30a   : > { %v6841_v33 = vpack.i.bf16 %v8831_v24, %v8892_v60 }
 0x30b   : > { %6837 = vrot.lane.b32.xlu1 %v6836_v27, %s6909_s14 }
 0x30c   : > { %6842 = vrot.lane.b32.xlu0 %v6841_v33, %s6907_s25 }
 0x30d   : > { %v6442_v41 = vpop.f32.mrb[24].mxu0 }
 0x30e   : > { %v2066_v56 = vpop.f32.mrb[25].mxu0  ;;  %v2072_v1 = vadd.f32 %v8901_v47, %v6442_v41 }
 0x30f   : > { %v2067_v4 = vadd.f32 %v8901_v47, %v2066_v56 }
 0x310   : > { %v2562_v22 = vcombine.high %v2072_v1, %v2072_v1  ;;  %v2569_v34 = vrot.slane %v2072_v1, %v7869_v61 }
 0x311   : > { %v2545_v11 = vcombine.high %v2067_v4, %v2067_v4  ;;  %v2552_v35 = vrot.slane %v2067_v4, %v7869_v61 }
 0x312   : > { %v2576_v32 = vrot.slane %v2562_v22, %v7869_v61  ;;  %v2577_v42 = vcombine.high %v2569_v34, %v2569_v34  ;;  %v5984_v63 = vrot.slane %v2569_v34, 9 }
 0x313   : > { %v2559_v40 = vrot.slane %v2545_v11, %v7869_v61  ;;  %v2560_v38 = vcombine.high %v2552_v35, %v2552_v35  ;;  %v5980_v51 = vrot.slane %v2552_v35, 9 }
 0x314   : > { %v2578_v15 = vcombine.high %v2576_v32, %v2576_v32  ;;  %v5985_v53 = vrot.slane %v2577_v42, 9  ;;  %v5986_v31 = vrot.slane %v2576_v32, 9  ;;  %v3053_v10 = vmax.f32 %v2569_v34, %v5984_v63 }
 0x315   : > { %v2561_v48 = vcombine.high %v2559_v40, %v2559_v40  ;;  %v5981_v37 = vrot.slane %v2560_v38, 9  ;;  %v5982_v55 = vrot.slane %v2559_v40, 9  ;;  %v3049_v5 = vmax.f32 %v2552_v35, %v5980_v51 }
 0x316   : > { %v5987_v39 = vrot.slane %v2578_v15, 9  ;;  %v3054_v9 = vmax.f32 %v2577_v42, %v5985_v53  ;;  %v3055_v36 = vmax.f32 %v2576_v32, %v5986_v31  ;;  %v6813_v53 = vpop.permute.xlu0 %6812 }
 0x317   : > { %v5983_v30 = vrot.slane %v2561_v48, 9  ;;  %v3050_v44 = vmax.f32 %v2560_v38, %v5981_v37  ;;  %v3051_v59 = vmax.f32 %v2559_v40, %v5982_v55 }
 0x318   : > { %v3056_v16 = vmax.f32 %v2578_v15, %v5987_v39 }
 0x319   : > { %v3052_v38 = vmax.f32 %v2561_v48, %v5983_v30 }
 0x32a   : > { %v6445_v20 = vpop.f32.mrb[26].mxu0 }
 0x32b   : > { %v2082_v49 = vadd.f32 %v8901_v47, %v6445_v20  ;;  %v2076_v28 = vpop.f32.mrb[27].mxu0 }
 0x32c   : > { %v2077_v25 = vadd.f32 %v8901_v47, %v2076_v28 }
 0x32d   : > { %v2596_v7 = vcombine.high %v2082_v49, %v2082_v49  ;;  %v2603_v17 = vrot.slane %v2082_v49, %v7869_v61 }
 0x32e   : > { %v2579_v50 = vcombine.high %v2077_v25, %v2077_v25  ;;  %v2586_v12 = vrot.slane %v2077_v25, %v7869_v61 }
 0x32f   : > { %v2610_v3 = vrot.slane %v2596_v7, %v7869_v61  ;;  %v2611_v23 = vcombine.high %v2603_v17, %v2603_v17  ;;  %v6048_v54 = vrot.slane %v2603_v17, 9  ;;  %v6815_v7 = vunpack.i.h.bf16 %v6813_v53 }
 0x330   : > { %v2593_v18 = vrot.slane %v2579_v50, %v7869_v61  ;;  %v2594_v19 = vcombine.high %v2586_v12, %v2586_v12  ;;  %v6044_v45 = vrot.slane %v2586_v12, 9 }
 0x331   : > { %v2612_v13 = vcombine.high %v2610_v3, %v2610_v3  ;;  %v6049_v62 = vrot.slane %v2611_v23, 9  ;;  %v6050_v52 = vrot.slane %v2610_v3, 9  ;;  %v3309_v27 = vmax.f32 %v2603_v17, %v6048_v54 }
 0x332   : > { %v2595_v33 = vcombine.high %v2593_v18, %v2593_v18  ;;  %v6045_v41 = vrot.slane %v2594_v19, 9  ;;  %v6046_v56 = vrot.slane %v2593_v18, 9  ;;  %v3305_v1 = vmax.f32 %v2586_v12, %v6044_v45 }
 0x333   : > { %v6051_v4 = vrot.slane %v2612_v13, 9  ;;  %v3310_v22 = vmax.f32 %v2611_v23, %v6049_v62  ;;  %v3311_v34 = vmax.f32 %v2610_v3, %v6050_v52  ;;  %v3373_v11 = vmax.f32 %v3053_v10, %v3309_v27 }
 0x334   : > { %v6047_v35 = vrot.slane %v2595_v33, 9  ;;  %v3306_v32 = vmax.f32 %v2594_v19, %v6045_v41  ;;  %v3307_v42 = vmax.f32 %v2593_v18, %v6046_v56  ;;  %v3369_v40 = vmax.f32 %v3049_v5, %v3305_v1 }
 0x335   : > { %v3312_v15 = vmax.f32 %v2612_v13, %v6051_v4  ;;  %v3374_v63 = vmax.f32 %v3054_v9, %v3310_v22  ;;  %v3375_v51 = vmax.f32 %v3055_v36, %v3311_v34  ;;  %v6814_v17 = vunpack.i.l.bf16 %v6813_v53 }
 0x336   : > { %v3308_v31 = vmax.f32 %v2595_v33, %v6047_v35  ;;  %v3370_v37 = vmax.f32 %v3050_v44, %v3306_v32  ;;  %v3371_v20 = vmax.f32 %v3051_v59, %v3307_v42  ;;  %v3433_v55 = vmax.f32 %v3369_v40, 0.0  ;;  %v4165_v32 = vld [vmem:[%s9771_s3 + $0x100] sm:$0xff]  ;;  %v4166_v42 = vld [vmem:[%s9771_s3 + $0x108] sm:$0xff] }
 0x337   : > { %v3376_v49 = vmax.f32 %v3056_v16, %v3312_v15  ;;  %v3437_v10 = vmax.f32 %v3373_v11, 0.0  ;;  %v3438_v50 = vmax.f32 %v3374_v63, 0.0  ;;  %v3439_v30 = vmax.f32 %v3375_v51, 0.0 }
 0x338   : > { %v3372_v28 = vmax.f32 %v3052_v38, %v3308_v31  ;;  %v3434_v39 = vmax.f32 %v3370_v37, 0.0  ;;  %v3435_v25 = vmax.f32 %v3371_v20, 0.0  ;;  %v3708_v5 = vrot.slane %v3433_v55, %v7905_v43 }
 0x339   : > { %v3440_v3 = vmax.f32 %v3376_v49, 0.0  ;;  %v3724_v16 = vrot.slane %v3437_v10, %v7905_v43  ;;  %v4112_v45 = vsel %vm4082_vm7, %v8775_v46, %v6814_v17  ;;  %v4086_v13 = vsel %vm4082_vm7, %v8606_v58, %v6815_v7 }
 0x33a   : > { %v3436_v12 = vmax.f32 %v3372_v28, 0.0  ;;  %v3712_v48 = vrot.slane %v3434_v39, %v7905_v43  ;;  %v3716_v9 = vrot.slane %v3435_v25, %v7905_v43  ;;  %v6818_v36 = vpop.permute.xlu1 %6817  ;;  %v3728_v62 = vrot.slane %v3438_v50, %v7905_v43 }
 0x33b   : > { %v6820_v44 = vunpack.i.h.bf16 %v6818_v36  ;;  %v6819_v59 = vunpack.i.l.bf16 %v6818_v36  ;;  %v3732_v41 = vrot.slane %v3439_v30, %v7905_v43  ;;  %v3736_v22 = vrot.slane %v3440_v3, %v7905_v43 }
 0x33c   : > { %v3720_v23 = vrot.slane %v3436_v12, %v7905_v43  ;;  %v3818_v54 = vsel %vm9856_vm6, %v3712_v48, %v3708_v5  ;;  %v6552_v38 = vpack.c.bf16 %v4166_v42, %v4165_v32 }
 0x33d   : > { %v3819_v18 = vsel %vm3771_vm4, %v3716_v9, %v3818_v54  ;;  %v6823_v19 = vpop.permute.xlu0 %6822  ;;  %v4120_v1 = vsel %vm4091_vm8, %v4112_v45, %v6819_v59  ;;  %v4095_v4 = vsel %vm4091_vm8, %v4086_v13, %v6820_v44 }
 0x33e   : > { %v3820_v52 = vsel %vm3773_vm5, %v3720_v23, %v3819_v18  ;;  %v6825_v27 = vunpack.i.h.bf16 %v6823_v19  ;;  %v6824_v33 = vunpack.i.l.bf16 %v6823_v19  ;;  %6553 = vmatprep.subr.bf16.mxu1 %v6552_v38 }
 0x33f   : > { %v3821_v56 = vsel %vm3775_vm3, %v3724_v16, %v3820_v52  ;;  %6555 = vmatpush3.bf16.msra.mxu1 %v6552_v38  ;;  %v4168_v52 = vld [vmem:[%s9771_s3 + $0x118] sm:$0xff] }
 0x340   : > { %v4128_v46 = vsel %vm4100_vm14, %v4120_v1, %v6824_v33  ;;  %v4104_v58 = vsel %vm4100_vm14, %v4095_v4, %v6825_v27  ;;  %v3822_v34 = vsel %vm3777_vm1, %v3728_v62, %v3821_v56  ;;  %v4167_v62 = vld [vmem:[%s9771_s3 + $0x110] sm:$0xff] }
 0x341   : > { %4271 = vmatprep.mubr.f32.mxu1 %v4128_v46  ;;  %v3823_v11 = vsel %vm9857_vm9, %v3732_v41, %v3822_v34  ;;  %v6556_v42 = vpack.c.bf16 %v4168_v52, %v4167_v62 }
 0x342   : > { %4272 = vmatmul.mubr.f32.gmra.mrb[6].mxu1 %v4104_v58  ;;  %v3824_v35 = vsel %vm9858_vm10, %v3736_v22, %v3823_v11 }
 0x343   : > { %v3838_v40 = vrot.slane %v3824_v35, 7  ;;  %6557 = vmatprep.subr.bf16.mxu1 %v6556_v42 }
 0x344   : > { %6559 = vmatpush3.bf16.msra.mxu1 %v6556_v42 }
 0x345   : > { %v8945_v15 = vsel %vm396_vm0, 0.0, %v3838_v40  ;;  %v3862_v63 = vsel %vm396_vm0, %v3838_v40, 0.0 }
 0x346   : > { %v6846_v51 = vpack.i.bf16 %v8836_v14, %v8945_v15  ;;  %v3897_v53 = vrot.slane %v8945_v15, 1  ;;  %v3898_v31 = vrot.slane %v3862_v63, 1  ;;  %v3943_v37 = vrot.slane %v8945_v15, 2 }
 0x347   : > { %v3944_v20 = vrot.slane %v3862_v63, 2 }
 0x348   : > { %6847 = vrot.lane.b32.xlu1 %v6846_v51, %s6908_s17  ;;  %v8954_v55 = vsel %vm9859_vm11, %v3897_v53, %v3898_v31 }
 0x349   : > { %v6851_v49 = vpack.i.bf16 %v8878_v29, %v8954_v55  ;;  %v8959_v28 = vsel %vm739_vm2, %v3943_v37, %v3944_v20 }
 0x34a   : > { %v6856_v39 = vpack.i.bf16 %v8887_v6, %v8959_v28 }
 0x34b   : > { %6852 = vrot.lane.b32.xlu0 %v6851_v49, %s6909_s14 }
 0x34c   : > { %6857 = vrot.lane.b32.xlu1 %v6856_v39, %s6907_s25 }
 0x34f   : > { %v6448_v25 = vpop.f32.mrb[28].mxu0 }
 0x350   : > { %v2092_v7 = vadd.f32 %v8901_v47, %v6448_v25  ;;  %v2086_v17 = vpop.f32.mrb[29].mxu0 }
 0x351   : > { %v2087_v10 = vadd.f32 %v8901_v47, %v2086_v17 }
 0x352   : > { %v2630_v50 = vcombine.high %v2092_v7, %v2092_v7  ;;  %v2637_v12 = vrot.slane %v2092_v7, %v7869_v61 }
 0x353   : > { %v2613_v5 = vcombine.high %v2087_v10, %v2087_v10  ;;  %v2620_v48 = vrot.slane %v2087_v10, %v7869_v61 }
 0x354   : > { %v2644_v9 = vrot.slane %v2630_v50, %v7869_v61  ;;  %v2645_v36 = vcombine.high %v2637_v12, %v2637_v12  ;;  %v5992_v30 = vrot.slane %v2637_v12, 9 }
 0x355   : > { %v2627_v44 = vrot.slane %v2613_v5, %v7869_v61  ;;  %v2628_v59 = vcombine.high %v2620_v48, %v2620_v48  ;;  %v5988_v3 = vrot.slane %v2620_v48, 9  ;;  %v6451_v23 = vpop.f32.mrb[30].mxu0 }
 0x356   : > { %v2646_v54 = vcombine.high %v2644_v9, %v2644_v9  ;;  %v5993_v16 = vrot.slane %v2645_v36, 9  ;;  %v5994_v18 = vrot.slane %v2644_v9, 9  ;;  %v2096_v19 = vpop.f32.mrb[31].mxu0  ;;  %v3061_v27 = vmax.f32 %v2637_v12, %v5992_v30 }
 0x357   : > { %v2629_v45 = vcombine.high %v2627_v44, %v2627_v44  ;;  %v5989_v13 = vrot.slane %v2628_v59, 9  ;;  %v5990_v33 = vrot.slane %v2627_v44, 9  ;;  %v3057_v41 = vmax.f32 %v2620_v48, %v5988_v3 }
 0x358   : > { %v2102_v56 = vadd.f32 %v8901_v47, %v6451_v23  ;;  %v5995_v1 = vrot.slane %v2646_v54, 9  ;;  %v3062_v4 = vmax.f32 %v2645_v36, %v5993_v16  ;;  %v3063_v22 = vmax.f32 %v2644_v9, %v5994_v18 }
 0x359   : > { %v2097_v46 = vadd.f32 %v8901_v47, %v2096_v19  ;;  %v6195_v58 = vpop.f32.mrb[0].mxu1  ;;  %v5991_v34 = vrot.slane %v2629_v45, 9  ;;  %v3058_v40 = vmax.f32 %v2628_v59, %v5989_v13  ;;  %v3059_v53 = vmax.f32 %v2627_v44, %v5990_v33 }
 0x35a   : > { %v2664_v11 = vcombine.high %v2102_v56, %v2102_v56  ;;  %v2671_v35 = vrot.slane %v2102_v56, %v7869_v61  ;;  %v6196_v32 = vpop.f32.mrb[1].mxu1  ;;  %v3064_v47 = vmax.f32 %v2646_v54, %v5995_v1 }
 0x35b   : > { %v2647_v38 = vcombine.high %v2097_v46, %v2097_v46  ;;  %v2654_v63 = vrot.slane %v2097_v46, %v7869_v61  ;;  %v8981_v51 = vadd.f32 %v6196_v32, %v6195_v58  ;;  %v3060_v18 = vmax.f32 %v2629_v45, %v5991_v34 }
 0x35c   : > { %v2678_v31 = vrot.slane %v2664_v11, %v7869_v61  ;;  %v2679_v37 = vcombine.high %v2671_v35, %v2671_v35  ;;  %v6056_v20 = vrot.slane %v2671_v35, 9 }
 0x35d   : > { %v2661_v49 = vrot.slane %v2647_v38, %v7869_v61  ;;  %v2662_v39 = vcombine.high %v2654_v63, %v2654_v63  ;;  %v6052_v25 = vrot.slane %v2654_v63, 9 }
 0x35e   : > { %v2680_v7 = vcombine.high %v2678_v31, %v2678_v31  ;;  %v6057_v17 = vrot.slane %v2679_v37, 9  ;;  %v6058_v10 = vrot.slane %v2678_v31, 9  ;;  %v3317_v50 = vmax.f32 %v2671_v35, %v6056_v20 }
 0x35f   : > { %v2663_v12 = vcombine.high %v2661_v49, %v2661_v49  ;;  %v6053_v5 = vrot.slane %v2662_v39, 9  ;;  %v6054_v48 = vrot.slane %v2661_v49, 9  ;;  %v3313_v9 = vmax.f32 %v2654_v63, %v6052_v25 }
 0x360   : > { %v6059_v36 = vrot.slane %v2680_v7, 9  ;;  %v3318_v30 = vmax.f32 %v2679_v37, %v6057_v17  ;;  %v3319_v44 = vmax.f32 %v2678_v31, %v6058_v10  ;;  %v3381_v59 = vmax.f32 %v3061_v27, %v3317_v50 }
 0x361   : > { %v6055_v3 = vrot.slane %v2663_v12, 9  ;;  %v3314_v23 = vmax.f32 %v2662_v39, %v6053_v5  ;;  %v3315_v54 = vmax.f32 %v2661_v49, %v6054_v48  ;;  %v3377_v16 = vmax.f32 %v3057_v41, %v3313_v9 }
 0x362   : > { %v3320_v19 = vmax.f32 %v2680_v7, %v6059_v36  ;;  %v3382_v13 = vmax.f32 %v3062_v4, %v3318_v30  ;;  %v3383_v62 = vmax.f32 %v3063_v22, %v3319_v44  ;;  %v3445_v32 = vmax.f32 %v3381_v59, 0.0 }
 0x363   : > { %v3316_v52 = vmax.f32 %v2663_v12, %v6055_v3  ;;  %v3378_v33 = vmax.f32 %v3058_v40, %v3314_v23  ;;  %v3379_v56 = vmax.f32 %v3059_v53, %v3315_v54  ;;  %v3441_v1 = vmax.f32 %v3377_v16, 0.0  ;;  %v6828_v3 = vpop.permute.xlu1 %6827 }
 0x364   : > { %v3384_v46 = vmax.f32 %v3064_v47, %v3320_v19  ;;  %v3446_v42 = vmax.f32 %v3382_v13, 0.0  ;;  %v3447_v41 = vmax.f32 %v3383_v62, 0.0  ;;  %v3756_v40 = vrot.slane %v3445_v32, %v7905_v43 }
 0x365   : > { %v3380_v58 = vmax.f32 %v3060_v18, %v3316_v52  ;;  %v3442_v11 = vmax.f32 %v3378_v33, 0.0  ;;  %v3443_v35 = vmax.f32 %v3379_v56, 0.0  ;;  %v3740_v27 = vrot.slane %v3441_v1, %v7905_v43  ;;  %v9864_v52 = vld [vmem:[#allocation8_spill] sm:$0xff] }
 0x366   : > { %v3448_v4 = vmax.f32 %v3384_v46, 0.0  ;;  %v3760_v31 = vrot.slane %v3446_v42, %v7905_v43  ;;  %v3764_v20 = vrot.slane %v3447_v41, %v7905_v43  ;;  %v6830_v54 = vunpack.i.h.bf16 %v6828_v3 }
 0x367   : > { %v3444_v38 = vmax.f32 %v3380_v58, 0.0  ;;  %v3744_v63 = vrot.slane %v3442_v11, %v7905_v43  ;;  %v3748_v45 = vrot.slane %v3443_v35, %v7905_v43  ;;  %v6829_v16 = vunpack.i.l.bf16 %v6828_v3 }
 0x368   : > { %v3768_v49 = vrot.slane %v3448_v4, %v7905_v43  ;;  %v6876_v18 = vpack.i.bf16 %v8959_v28, %v6978_v2  ;;  %v4087_v11 = vsel %vm4082_vm7, %v8766_v21, %v6830_v54 }
 0x369   : > { %v3752_v22 = vrot.slane %v3444_v38, %v7905_v43  ;;  %v3825_v34 = vsel %vm9860_vm12, %v3744_v63, %v3740_v27  ;;  %v4113_v58 = vsel %vm4082_vm7, %v8831_v24, %v6829_v16 }
 0x36a   : > { %v3826_v53 = vsel %vm3771_vm4, %v3748_v45, %v3825_v34 }
 0x36b   : > { %v3827_v37 = vsel %vm3773_vm5, %v3752_v22, %v3826_v53 }
 0x36c   : > { %v3828_v47 = vsel %vm3775_vm3, %v3756_v40, %v3827_v37  ;;  %vm9863_vm3 = vmmov %vm9859_vm11 }
 0x36d   : > { %v3829_v39 = vsel %vm3777_vm1, %v3760_v31, %v3828_v47  ;;  %vm4842_vm1 = vcmask 1044480  }
 0x36e   : > { %v3830_v25 = vsel %vm9861_vm13, %v3764_v20, %v3829_v39 }
 0x36f   : > { %v3831_v7 = vsel %vm9862_vm15, %v3768_v49, %v3830_v25 }
 0x370   : > { %v3839_v17 = vrot.slane %v3831_v7, 7 }
 0x372   : > { %v3855_v10 = vsel %vm396_vm0, 0.0, %v3839_v17  ;;  %v3863_v50 = vsel %vm396_vm0, %v3839_v17, 0.0 }
 0x373   : > { %v6861_v12 = vpack.i.bf16 %v8892_v60, %v3855_v10  ;;  %v3996_v5 = vrot.slane %v3855_v10, 1  ;;  %v3997_v48 = vrot.slane %v3863_v50, 1  ;;  %v4007_v9 = vrot.slane %v3855_v10, 2 }
 0x374   : > { %v4008_v36 = vrot.slane %v3863_v50, 2  ;;  %v6881_v33 = vpack.i.bf16 %v3855_v10, %v9864_v52 }
 0x375   : > { %6862 = vrot.lane.b32.xlu0 %v6861_v12, %s6908_s17  ;;  %v9005_v30 = vsel %vm9863_vm3, %v3996_v5, %v3997_v48 }
 0x376   : > { %v6866_v44 = vpack.i.bf16 %v8945_v15, %v9005_v30  ;;  %v9010_v59 = vsel %vm739_vm2, %v4007_v9, %v4008_v36  ;;  %vm9866_vm2 = vmmov %vm9856_vm6 }
 0x377   : > { %v6871_v23 = vpack.i.bf16 %v8954_v55, %v9010_v59  ;;  %vm9869_vm6 = vmmov %vm9866_vm2 }
 0x378   : > { %6867 = vrot.lane.b32.xlu1 %v6866_v44, %s6909_s14  ;;  %vm9872_vm9 = vmmov %vm9866_vm2 }
 0x379   : > { %6872 = vrot.lane.b32.xlu0 %v6871_v23, %s6907_s25 }
 0x37a   : > { %v6833_v19 = vpop.permute.xlu0 %6832 }
 0x37b   : > { %v6835_v13 = vunpack.i.h.bf16 %v6833_v19  ;;  %v6834_v62 = vunpack.i.l.bf16 %v6833_v19 }
 0x37c   : > { %6877 = vrot.lane.b32.xlu1 %v6876_v18, %s6908_s17 }
 0x37d   : > { %6882 = vrot.lane.b32.xlu0 %v6881_v33, %s6909_s14  ;;  %v6838_v56 = vpop.permute.xlu1 %6837  ;;  %v4121_v35 = vsel %vm4091_vm8, %v4113_v58, %v6834_v62  ;;  %v4096_v32 = vsel %vm4091_vm8, %v4087_v11, %v6835_v13 }
 0x37e   : > { %v6840_v1 = vunpack.i.h.bf16 %v6838_v56  ;;  %v6839_v46 = vunpack.i.l.bf16 %v6838_v56  ;;  %v6843_v41 = vpop.permute.xlu0 %6842 }
 0x37f   : > { %v6845_v4 = vunpack.i.h.bf16 %v6843_v41  ;;  %v6844_v24 = vunpack.i.l.bf16 %v6843_v41  ;;  %v4944_v41 = vld [vmem:[%s9773_s5] sm:$0xff] }
 0x380   : > { %v4129_v42 = vsel %vm4100_vm14, %v4121_v35, %v6839_v46  ;;  %v4105_v38 = vsel %vm4100_vm14, %v4096_v32, %v6840_v1 }
 0x381   : > { %4276 = vmatprep.mubr.f32.mxu1 %v4129_v42  ;;  %v4114_v37 = vsel %vm4082_vm7, %v8887_v6, %v6844_v24  ;;  %v4088_v20 = vsel %vm4082_vm7, %v8822_v0, %v6845_v4  ;;  %v4945_v24 = vld [vmem:[%s9773_s5 + $0x8] sm:$0xff] }
 0x382   : > { %4277 = vmatmul.mubr.f32.gmra.mrb[8].mxu1 %v4105_v38 }
 0x395   : > { %v6198_v27 = vpop.f32.mrb[2].mxu1 }
 0x396   : > { %v6199_v63 = vpop.f32.mrb[3].mxu1 }
 0x397   : > { %v9029_v45 = vadd.f32 %v6199_v63, %v6198_v27 }
 0x3ba   : > { %v6848_v22 = vpop.permute.xlu1 %6847 }
 0x3bb   : > { %v6850_v34 = vunpack.i.h.bf16 %v6848_v22  ;;  %v6849_v21 = vunpack.i.l.bf16 %v6848_v22  ;;  %v4962_v22 = vld [vmem:[%s9773_s5 + $0x90] sm:$0xff] }
 0x3bd   : > { %v6853_v40 = vpop.permute.xlu0 %6852  ;;  %v4122_v47 = vsel %vm4091_vm8, %v4114_v37, %v6849_v21  ;;  %v4097_v49 = vsel %vm4091_vm8, %v4088_v20, %v6850_v34  ;;  %v4963_v34 = vld [vmem:[%s9773_s5 + $0x98] sm:$0xff]  ;;  %v6562_v21 = vpack.c.bf16 %v4945_v24, %v4944_v41  ;;  %v4964_v37 = vld [vmem:[%s9773_s5 + $0xa0] sm:$0xff]  ;;  %v4965_v20 = vld [vmem:[%s9773_s5 + $0xa8] sm:$0xff] }
 0x3be   : > { %v6855_v53 = vunpack.i.h.bf16 %v6853_v40  ;;  %v6854_v31 = vunpack.i.l.bf16 %v6853_v40  ;;  %v6858_v50 = vpop.permute.xlu1 %6857  ;;  %v6564_v40 = vpack.c.bf16 %v4963_v34, %v4962_v22  ;;  %v4955_v41 = vld [vmem:[%s9773_s5 + $0x58] sm:$0xff]  ;;  %v4982_v24 = vld [vmem:[%s9773_s5 + $0x130] sm:$0xff]  ;;  %v4972_v34 = vld [vmem:[%s9773_s5 + $0xe0] sm:$0xff] }
 0x3bf   : > { %v6860_v12 = vunpack.i.h.bf16 %v6858_v50  ;;  %v6859_v6 = vunpack.i.l.bf16 %v6858_v50  ;;  %v4967_v50 = vld [vmem:[%s9773_s5 + $0xb8] sm:$0xff] }
 0x3c0   : > { %v4130_v39 = vsel %vm4100_vm14, %v4122_v47, %v6854_v31  ;;  %v4106_v25 = vsel %vm4100_vm14, %v4097_v49, %v6855_v53  ;;  %v4946_v53 = vld [vmem:[%s9773_s5 + $0x10] sm:$0xff]  ;;  %v4947_v31 = vld [vmem:[%s9773_s5 + $0x18] sm:$0xff]  ;;  %v6568_v49 = vpack.c.bf16 %v4965_v20, %v4964_v37  ;;  %v4956_v37 = vld [vmem:[%s9773_s5 + $0x60] sm:$0xff] }
 0x3c1   : > { %4281 = vmatprep.mubr.f32.mxu1 %v4130_v39  ;;  %v4115_v23 = vsel %vm4082_vm7, %v8954_v55, %v6859_v6  ;;  %v4089_v54 = vsel %vm4082_vm7, %v8878_v29, %v6860_v12  ;;  %v6566_v47 = vpack.c.bf16 %v4947_v31, %v4946_v53  ;;  %v4948_v39 = vld [vmem:[%s9773_s5 + $0x20] sm:$0xff]  ;;  %v4950_v6 = vld [vmem:[%s9773_s5 + $0x30] sm:$0xff]  ;;  %v4983_v22 = vld [vmem:[%s9773_s5 + $0x138] sm:$0xff] }
 0x3c2   : > { %4282 = vmatmul.mubr.f32.gmra.mrb[10].mxu1 %v4106_v25  ;;  %v4949_v25 = vld [vmem:[%s9773_s5 + $0x28] sm:$0xff]  ;;  %v6606_v53 = vpack.c.bf16 %v4983_v22, %v4982_v24 }
 0x3c3   : > { %v4957_v20 = vld [vmem:[%s9773_s5 + $0x68] sm:$0xff] }
 0x3d7   : > { %v6201_v7 = vpop.f32.mrb[4].mxu1 }
 0x3d8   : > { %v6202_v17 = vpop.f32.mrb[5].mxu1 }
 0x3d9   : > { %v9039_v10 = vadd.f32 %v6202_v17, %v6201_v7  ;;  %v4966_v17 = vld [vmem:[%s9773_s5 + $0xb0] sm:$0xff] }
 0x3e7   : > { %v6863_v5 = vpop.permute.xlu0 %6862 }
 0x3e8   : > { %v6865_v48 = vunpack.i.h.bf16 %v6863_v5  ;;  %v6864_v0 = vunpack.i.l.bf16 %v6863_v5  ;;  %v4992_v5 = vld [vmem:[%s9773_s5 + $0x180] sm:$0xff] }
 0x3ea   : > { %v6868_v9 = vpop.permute.xlu1 %6867  ;;  %v4123_v19 = vsel %vm4091_vm8, %v4115_v23, %v6864_v0  ;;  %v4098_v13 = vsel %vm4091_vm8, %v4089_v54, %v6865_v48  ;;  %v4993_v48 = vld [vmem:[%s9773_s5 + $0x188] sm:$0xff]  ;;  %v4976_v23 = vld [vmem:[%s9773_s5 + $0x100] sm:$0xff]  ;;  %v6572_v54 = vpack.c.bf16 %v4967_v50, %v4966_v17 }
 0x3eb   : > { %v6870_v36 = vunpack.i.h.bf16 %v6868_v9  ;;  %v6869_v44 = vunpack.i.l.bf16 %v6868_v9  ;;  %v6873_v3 = vpop.permute.xlu0 %6872  ;;  %v6570_v9 = vpack.c.bf16 %v4949_v25, %v4948_v39  ;;  %v6060_v50 = vld [vmem:[%s9772_s4] ss:$0 sm:$0xff] }
 0x3ec   : > { %v6875_v16 = vunpack.i.h.bf16 %v6873_v3  ;;  %v6874_v18 = vunpack.i.l.bf16 %v6873_v3  ;;  %v6592_v3 = vpack.c.bf16 %v4993_v48, %v4992_v5  ;;  %v4259_v48 = vadd.f32 %v8981_v51, %v6060_v50 }
 0x3ed   : > { %v4131_v62 = vsel %vm4100_vm14, %v4123_v19, %v6869_v44  ;;  %v4107_v52 = vsel %vm4100_vm14, %v4098_v13, %v6870_v36  ;;  %v4951_v36 = vld [vmem:[%s9773_s5 + $0x38] sm:$0xff]  ;;  %v4968_v44 = vld [vmem:[%s9773_s5 + $0xc0] sm:$0xff]  ;;  %v4969_v13 = vld [vmem:[%s9773_s5 + $0xc8] sm:$0xff] }
 0x3ee   : > { %v6878_v33 = vpop.permute.xlu1 %6877  ;;  %4286 = vmatprep.mubr.f32.mxu1 %v4131_v62  ;;  %v4116_v29 = vsel %vm4082_vm7, %v9005_v30, %v6874_v18  ;;  %v4090_v11 = vsel %vm4082_vm7, %v8945_v15, %v6875_v16  ;;  %v9865_v15 = vld [vmem:[#allocation9_spill] sm:$0xff]  ;;  %v4977_v16 = vld [vmem:[%s9773_s5 + $0x108] sm:$0xff]  ;;  %v4994_v18 = vld [vmem:[%s9773_s5 + $0x190] sm:$0xff]  ;;  %6593 = vmatprep.subr.bf16.mxu1 %v6592_v3  ;;  %v4269_v3 = vadd.f32 %v9039_v10, %v6060_v50 }
 0x3ef   : > { %v6880_v56 = vunpack.i.h.bf16 %v6878_v33  ;;  %v6879_v1 = vunpack.i.l.bf16 %v6878_v33  ;;  %v6883_v46 = vpop.permute.xlu0 %6882  ;;  %4287 = vmatmul.mubr.f32.gmra.mrb[12].mxu1 %v4107_v52  ;;  %v4995_v19 = vld [vmem:[%s9773_s5 + $0x198] sm:$0xff]  ;;  %v6594_v62 = vpack.c.bf16 %v4977_v16, %v4976_v23  ;;  %v4978_v33 = vld [vmem:[%s9773_s5 + $0x110] sm:$0xff] }
 0x3f0   : > { %v6885_v55 = vunpack.i.h.bf16 %v6883_v46  ;;  %v6884_v58 = vunpack.i.l.bf16 %v6883_v46  ;;  %v6596_v52 = vpack.c.bf16 %v4995_v19, %v4994_v18  ;;  %v4997_v46 = vld [vmem:[%s9773_s5 + $0x1a8] sm:$0xff] }
 0x3f1   : > { %v4124_v35 = vsel %vm4091_vm8, %v4116_v29, %v6879_v1  ;;  %v4099_v32 = vsel %vm4091_vm8, %v4090_v11, %v6880_v56  ;;  %v4979_v56 = vld [vmem:[%s9773_s5 + $0x118] sm:$0xff]  ;;  %v4996_v1 = vld [vmem:[%s9773_s5 + $0x1a0] sm:$0xff]  ;;  %v4953_v29 = vld [vmem:[%s9773_s5 + $0x48] sm:$0xff] }
 0x3f2   : > { %v4132_v42 = vsel %vm4100_vm14, %v4124_v35, %v6884_v58  ;;  %v4108_v38 = vsel %vm4100_vm14, %v4099_v32, %v6885_v55  ;;  %v6574_v55 = vpack.c.bf16 %v4951_v36, %v4950_v6  ;;  %v4952_v58 = vld [vmem:[%s9773_s5 + $0x40] sm:$0xff]  ;;  %v6598_v11 = vpack.c.bf16 %v4979_v56, %v4978_v33  ;;  %v4970_v32 = vld [vmem:[%s9773_s5 + $0xd0] sm:$0xff]  ;;  %vm9868_vm14 = vmmov %vm9866_vm2 }
 0x3f3   : > { %4291 = vmatprep.mubr.f32.mxu1 %v4132_v42  ;;  %v6576_v35 = vpack.c.bf16 %v4969_v13, %v4968_v44  ;;  %v6600_v42 = vpack.c.bf16 %v4997_v46, %v4996_v1  ;;  %v4264_v6 = vadd.f32 %v9029_v45, %v6060_v50 }
 0x3f4   : > { %4292 = vmatmul.mubr.f32.gmra.mrb[14].mxu1 %v4108_v38  ;;  %v4980_v38 = vld [vmem:[%s9773_s5 + $0x120] sm:$0xff] }
 0x3f5   : > { %6460 = vmatprep.mubr.msk.f32.mxu1 %vm4082_vm7, %v8466_v57 }
 0x3f8   : > { %6461 = vmatmul.mubr.msk.f32.vlgmr.msra.gmra.mrb[16].mxu1 %vm4082_vm7, %v8631_v8 }
 0x3f9   : > { %6463 = vmatprep.mubr.msk.f32.mxu1 %vm4082_vm7, %v8780_v26  ;;  %6595 = vmatpush3.bf16.msra.mxu1 %v6594_v62 }
 0x3fa   : > { %6597 = vmatprep.subr.bf16.mxu1 %v6596_v52 }
 0x3fc   : > { %6464 = vmatmul.mubr.msk.f32.gmra.mrb[18].mxu1 %vm4082_vm7, %v8836_v14  ;;  %v9079_v14 = vsel %vm4842_vm1, %v6978_v2, 0.0 }
 0x3fd   : > { %6466 = vmatprep.mubr.msk.f32.mxu1 %vm4082_vm7, %v8892_v60  ;;  %v4852_v60 = vrot.slane %v9079_v14, 1  ;;  %6599 = vmatpush3.bf16.msra.mxu1 %v6598_v11 }
 0x3fe   : > { %6601 = vmatprep.subr.bf16.mxu1 %v6600_v42 }
 0x3ff   : > { %4856 = vrot.lane.b32.xlu1 %v4852_v60, %s6908_s17  ;;  %v4954_v60 = vld [vmem:[%s9773_s5 + $0x50] sm:$0xff] }
 0x400   : > { %6467 = vmatmul.mubr.msk.f32.gmra.mrb[20].mxu1 %vm4082_vm7, %v8959_v28  ;;  %v4960_v28 = vld [vmem:[%s9773_s5 + $0x80] sm:$0xff] }
 0x401   : > { %6469 = vmatprep.mubr.msk.f32.mxu1 %vm4082_vm7, %v9010_v59  ;;  %v4961_v59 = vld [vmem:[%s9773_s5 + $0x88] sm:$0xff] }
 0x402   : > { %v6560_v4 = vpack.c.bf16 %v4961_v59, %v4960_v28 }
 0x404   : > { %6470 = vmatmul.mubr.msk.f32.gmra.mrb[22].mxu1 %vm4082_vm7, %v9865_v15  ;;  %6561 = vmatprep.subr.bf16.mxu0 %v6560_v4  ;;  %v4981_v15 = vld [vmem:[%s9773_s5 + $0x128] sm:$0xff]  ;;  %vm9867_vm7 = vmmov %vm9866_vm2 }
 0x405   : > { %6563 = vmatpush3.bf16.msra.mxu0 %v6562_v21  ;;  %v6602_v28 = vpack.c.bf16 %v4981_v15, %v4980_v38  ;;  %v4973_v21 = vld [vmem:[%s9773_s5 + $0xe8] sm:$0xff] }
 0x406   : > { %6565 = vmatprep.subr.bf16.mxu0 %v6564_v40  ;;  %v6582_v40 = vpack.c.bf16 %v4955_v41, %v4954_v60  ;;  %v6584_v31 = vpack.c.bf16 %v4973_v21, %v4972_v34 }
 0x407   : > { %6603 = vmatpush3.bf16.msra.mxu1 %v6602_v28 }
 0x409   : > { %6567 = vmatpush3.bf16.msra.mxu0 %v6566_v47  ;;  %v6586_v47 = vpack.c.bf16 %v4957_v20, %v4956_v37 }
 0x40a   : > { %6569 = vmatprep.subr.bf16.mxu0 %v6568_v49 }
 0x40d   : > { %6571 = vmatpush3.bf16.msra.mxu0 %v6570_v9 }
 0x40e   : > { %6573 = vmatprep.subr.bf16.mxu0 %v6572_v54 }
 0x411   : > { %6575 = vmatpush3.bf16.msra.mxu0 %v6574_v55 }
 0x412   : > { %6577 = vmatprep.subr.bf16.mxu0 %v6576_v35 }
 0x415   : > { %v6204_v57 = vpop.f32.mrb[6].mxu1 }
 0x416   : > { %v6205_v8 = vpop.f32.mrb[7].mxu1 }
 0x417   : > { %v9073_v30 = vadd.f32 %v6205_v8, %v6204_v57  ;;  %v4971_v57 = vld [vmem:[%s9773_s5 + $0xd8] sm:$0xff]  ;;  %v4998_v8 = vld [vmem:[%s9773_s5 + $0x1b0] sm:$0xff] }
 0x418   : > { %v6580_v59 = vpack.c.bf16 %v4971_v57, %v4970_v32 }
 0x419   : > { %v4274_v16 = vadd.f32 %v9073_v30, %v6060_v50 }
 0x455   : > { %v6207_v26 = vpop.f32.mrb[8].mxu1 }
 0x456   : > { %v6208_v27 = vpop.f32.mrb[9].mxu1 }
 0x457   : > { %v9075_v63 = vadd.f32 %v6208_v27, %v6207_v26  ;;  %v4999_v26 = vld [vmem:[%s9773_s5 + $0x1b8] sm:$0xff]  ;;  %v6578_v27 = vpack.c.bf16 %v4953_v29, %v4952_v58 }
 0x458   : > { %v6604_v4 = vpack.c.bf16 %v4999_v26, %v4998_v8 }
 0x459   : > { %6579 = vmatpush3.bf16.msra.mxu0 %v6578_v27  ;;  %v4279_v18 = vadd.f32 %v9075_v63, %v6060_v50 }
 0x45a   : > { %6581 = vmatprep.subr.bf16.mxu0 %v6580_v59  ;;  %6605 = vmatprep.subr.bf16.mxu1 %v6604_v4 }
 0x45b   : > { %6607 = vmatpush3.bf16.msra.mxu1 %v6606_v53 }
 0x45d   : > { %6583 = vmatpush3.bf16.msra.mxu0 %v6582_v40 }
 0x45e   : > { %6585 = vmatprep.subr.bf16.mxu0 %v6584_v31 }
 0x461   : > { %6587 = vmatpush3.bf16.msra.mxu0 %v6586_v47 }
 0x495   : > { %v6210_v7 = vpop.f32.mrb[10].mxu1 }
 0x496   : > { %v6211_v12 = vpop.f32.mrb[11].mxu1 }
 0x497   : > { %v9134_v0 = vadd.f32 %v6211_v12, %v6210_v7 }
 0x499   : > { %v4284_v45 = vadd.f32 %v9134_v0, %v6060_v50 }
 0x4c2   : > { %v6213_v49 = vpop.f32.mrb[12].mxu1 }
 0x4c3   : > { %v6214_v39 = vpop.f32.mrb[13].mxu1 }
 0x4c4   : > { %v6215_v25 = vadd.f32 %v6214_v39, %v6213_v49 }
 0x4c6   : > { %v9228_v52 = vadd.f32 %v6215_v25, %v6060_v50 }
 0x4c7   : > { %v6216_v7 = vpop.f32.mrb[14].mxu1 }
 0x4c8   : > { %v6217_v17 = vpop.f32.mrb[15].mxu1 }
 0x4c9   : > { %v6218_v12 = vadd.f32 %v6217_v17, %v6216_v7 }
 0x4cb   : > { %v6462_v5 = vpop.f32.mrb[16].mxu1 }
 0x4cc   : > { %v4369_v9 = vadd.f32 %v6462_v5, %v4264_v6  ;;  %v4363_v36 = vpop.f32.mrb[17].mxu1 }
 0x4cd   : > { %v4364_v44 = vadd.f32 %v4363_v36, %v4259_v48  ;;  %v4294_v48 = vadd.f32 %v6218_v12, %v6060_v50 }
 0x4ce   : > { %v4427_v23 = vcombine.high %v4369_v9, %v4369_v9  ;;  %v4434_v54 = vrot.slane %v4369_v9, %v7869_v61 }
 0x4cf   : > { %v4410_v19 = vcombine.high %v4364_v44, %v4364_v44  ;;  %v4417_v13 = vrot.slane %v4364_v44, %v7869_v61  ;;  %v6465_v62 = vpop.f32.mrb[18].mxu1 }
 0x4d0   : > { %v4441_v51 = vrot.slane %v4427_v23, %v7869_v61  ;;  %v4442_v33 = vcombine.high %v4434_v54, %v4434_v54  ;;  %v6085_v56 = vrot.slane %v4434_v54, 9  ;;  %v4379_v10 = vadd.f32 %v6465_v62, %v4274_v16  ;;  %v4373_v1 = vpop.f32.mrb[19].mxu1 }
 0x4d1   : > { %v4424_v46 = vrot.slane %v4410_v19, %v7869_v61  ;;  %v4425_v55 = vcombine.high %v4417_v13, %v4417_v13  ;;  %v6069_v30 = vrot.slane %v4417_v13, 9  ;;  %v4374_v58 = vadd.f32 %v4373_v1, %v4269_v3 }
 0x4d2   : > { %v4443_v63 = vcombine.high %v4441_v51, %v4441_v51  ;;  %v6086_v29 = vrot.slane %v4442_v33, 9  ;;  %v6087_v11 = vrot.slane %v4441_v51, 9  ;;  %v4690_v35 = vmax.f32 %v4434_v54, %v6085_v56 }
 0x4d3   : > { %v4426_v32 = vcombine.high %v4424_v46, %v4424_v46  ;;  %v6070_v42 = vrot.slane %v4425_v55, 9  ;;  %v6071_v0 = vrot.slane %v4424_v46, 9  ;;  %v4626_v38 = vmax.f32 %v4417_v13, %v6069_v30  ;;  %v6468_v15 = vpop.f32.mrb[20].mxu1 }
 0x4d4   : > { %v6088_v57 = vrot.slane %v4443_v63, 9  ;;  %v4691_v8 = vmax.f32 %v4442_v33, %v6086_v29  ;;  %v4692_v26 = vmax.f32 %v4441_v51, %v6087_v11  ;;  %v4461_v27 = vcombine.high %v4379_v10, %v4379_v10  ;;  %v4383_v60 = vpop.f32.mrb[21].mxu1 }
 0x4d5   : > { %v6072_v28 = vrot.slane %v4426_v32, 9  ;;  %v4627_v59 = vmax.f32 %v4425_v55, %v6070_v42  ;;  %v4628_v41 = vmax.f32 %v4424_v46, %v6071_v0  ;;  %v4706_v4 = vmax.f32 %v4626_v38, %v4690_v35 }
 0x4d6   : > { %v9232_v24 = vmax.f32 %v4443_v63, %v6088_v57  ;;  %v4468_v22 = vrot.slane %v4379_v10, %v7869_v61  ;;  %v4475_v34 = vrot.slane %v4461_v27, %v7869_v61  ;;  %v4444_v21 = vcombine.high %v4374_v58, %v4374_v58 }
 0x4d7   : > { %v9236_v40 = vmax.f32 %v4426_v32, %v6072_v28  ;;  %v4707_v53 = vmax.f32 %v4627_v59, %v4691_v8  ;;  %v4708_v31 = vmax.f32 %v4628_v41, %v4692_v26  ;;  %v9238_v37 = vmax.f32 %v4706_v4, 0.0  ;;  %v6471_v20 = vpop.f32.mrb[22].mxu1 }
 0x4d8   : > { %v4476_v47 = vcombine.high %v4468_v22, %v4468_v22  ;;  %v4477_v49 = vcombine.high %v4475_v34, %v4475_v34  ;;  %v6089_v39 = vrot.slane %v4468_v22, 9  ;;  %v6091_v25 = vrot.slane %v4475_v34, 9  ;;  %v9240_v7 = vpop.f32.mrb[23].mxu1 }
 0x4d9   : > { %v4709_v17 = vmax.f32 %v9236_v40, %v9232_v24  ;;  %v9244_v6 = vmax.f32 %v4707_v53, 0.0  ;;  %v9246_v5 = vmax.f32 %v4708_v31, 0.0  ;;  %v4757_v9 = vrot.slane %v9238_v37, %v7905_v43 }
 0x4da   : > { %v6090_v36 = vrot.slane %v4476_v47, 9  ;;  %v6092_v44 = vrot.slane %v4477_v49, 9  ;;  %v4694_v3 = vmax.f32 %v4468_v22, %v6089_v39  ;;  %v4696_v23 = vmax.f32 %v4475_v34, %v6091_v25 }
 0x4db   : > { %v4451_v54 = vrot.slane %v4374_v58, %v7869_v61  ;;  %v4458_v16 = vrot.slane %v4444_v21, %v7869_v61  ;;  %v4389_v19 = vadd.f32 %v6468_v15, %v4284_v45  ;;  %v4384_v51 = vadd.f32 %v4383_v60, %v4279_v18 }
 0x4dc   : > { %v4695_v13 = vmax.f32 %v4476_v47, %v6090_v36  ;;  %v9252_v62 = vmax.f32 %v4477_v49, %v6092_v44  ;;  %v4399_v33 = vadd.f32 %v6471_v20, %v4294_v48  ;;  %v4761_v57 = vrot.slane %v9244_v6, %v7905_v43 }
 0x4dd   : > { %v4459_v56 = vcombine.high %v4451_v54, %v4451_v54  ;;  %v4460_v10 = vcombine.high %v4458_v16, %v4458_v16  ;;  %v6073_v50 = vrot.slane %v4451_v54, 9  ;;  %v6075_v12 = vrot.slane %v4458_v16, 9 }
 0x4de   : > { %v4495_v1 = vcombine.high %v4389_v19, %v4389_v19  ;;  %v4502_v46 = vrot.slane %v4389_v19, %v7869_v61  ;;  %v4478_v55 = vcombine.high %v4384_v51, %v4384_v51  ;;  %v4485_v30 = vrot.slane %v4384_v51, %v7869_v61 }
 0x4df   : > { %v6074_v63 = vrot.slane %v4459_v56, 9  ;;  %v6076_v58 = vrot.slane %v4460_v10, 9  ;;  %v4630_v29 = vmax.f32 %v4451_v54, %v6073_v50  ;;  %v4632_v11 = vmax.f32 %v4458_v16, %v6075_v12 }
 0x4e0   : > { %v4509_v45 = vrot.slane %v4495_v1, %v7869_v61  ;;  %v4510_v35 = vcombine.high %v4502_v46, %v4502_v46  ;;  %v6093_v32 = vrot.slane %v4502_v46, 9  ;;  %v4492_v18 = vrot.slane %v4478_v55, %v7869_v61 }
 0x4e1   : > { %v4631_v42 = vmax.f32 %v4459_v56, %v6074_v63  ;;  %v4633_v0 = vmax.f32 %v4460_v10, %v6076_v58  ;;  %v4710_v38 = vmax.f32 %v4630_v29, %v4694_v3  ;;  %v4712_v15 = vmax.f32 %v4632_v11, %v4696_v23 }
 0x4e2   : > { %v4511_v8 = vcombine.high %v4509_v45, %v4509_v45  ;;  %v6094_v26 = vrot.slane %v4510_v35, 9  ;;  %v6095_v27 = vrot.slane %v4509_v45, 9  ;;  %v4698_v41 = vmax.f32 %v4502_v46, %v6093_v32 }
 0x4e3   : > { %v4711_v60 = vmax.f32 %v4631_v42, %v4695_v13  ;;  %v4713_v28 = vmax.f32 %v4633_v0, %v9252_v62  ;;  %v4726_v59 = vmax.f32 %v4710_v38, 0.0  ;;  %v9261_v4 = vmax.f32 %v4712_v15, 0.0 }
 0x4e4   : > { %v6096_v22 = vrot.slane %v4511_v8, 9  ;;  %v4699_v34 = vmax.f32 %v4510_v35, %v6094_v26  ;;  %v4493_v21 = vcombine.high %v4485_v30, %v4485_v30  ;;  %v4700_v31 = vmax.f32 %v4509_v45, %v6095_v27 }
 0x4e5   : > { %v4727_v53 = vmax.f32 %v4711_v60, 0.0  ;;  %v4494_v20 = vcombine.high %v4492_v18, %v4492_v18  ;;  %v6077_v47 = vrot.slane %v4485_v30, 9  ;;  %v4773_v49 = vrot.slane %v4726_v59, %v7905_v43 }
 0x4e6   : > { %v6078_v39 = vrot.slane %v4493_v21, 9  ;;  %v6079_v25 = vrot.slane %v4492_v18, 9  ;;  %v4529_v6 = vcombine.high %v4399_v33, %v4399_v33  ;;  %v4701_v48 = vmax.f32 %v4511_v8, %v6096_v22 }
 0x4e7   : > { %v6080_v36 = vrot.slane %v4494_v20, 9  ;;  %v4634_v44 = vmax.f32 %v4485_v30, %v6077_v47  ;;  %v4536_v3 = vrot.slane %v4399_v33, %v7869_v61  ;;  %v4394_v19 = vadd.f32 %v9240_v7, %v9228_v52 }
 0x4e8   : > { %v4635_v23 = vmax.f32 %v4493_v21, %v6078_v39  ;;  %v4636_v54 = vmax.f32 %v4492_v18, %v6079_v25  ;;  %v4543_v16 = vrot.slane %v4529_v6, %v7869_v61  ;;  %v4777_v46 = vrot.slane %v4727_v53, %v7905_v43 }
 0x4e9   : > { %v4637_v13 = vmax.f32 %v4494_v20, %v6080_v36  ;;  %v4714_v62 = vmax.f32 %v4634_v44, %v4698_v41  ;;  %v4544_v51 = vcombine.high %v4536_v3, %v4536_v3  ;;  %v6097_v56 = vrot.slane %v4536_v3, 9  ;;  %v4975_v36 = vld [vmem:[%s9773_s5 + $0xf8] sm:$0xff] }
 0x4ea   : > { %v4715_v10 = vmax.f32 %v4635_v23, %v4699_v34  ;;  %v4716_v50 = vmax.f32 %v4636_v54, %v4700_v31  ;;  %v4545_v12 = vcombine.high %v4543_v16, %v4543_v16  ;;  %v6099_v1 = vrot.slane %v4543_v16, 9 }
 0x4eb   : > { %v4717_v55 = vmax.f32 %v4637_v13, %v4701_v48  ;;  %v4730_v30 = vmax.f32 %v4714_v62, 0.0  ;;  %v6098_v33 = vrot.slane %v4544_v51, 9  ;;  %v4702_v11 = vmax.f32 %v4536_v3, %v6097_v56  ;;  %v5001_v56 = vld [vmem:[%s9773_s5 + $0x1c8] sm:$0xff] }
 0x4ec   : > { %v4731_v63 = vmax.f32 %v4715_v10, 0.0  ;;  %v4732_v58 = vmax.f32 %v4716_v50, 0.0  ;;  %v6100_v29 = vrot.slane %v4545_v12, 9  ;;  %v4704_v35 = vmax.f32 %v4543_v16, %v6099_v1 }
 0x4ed   : > { %v4703_v45 = vmax.f32 %v4544_v51, %v6098_v33  ;;  %v4512_v52 = vcombine.high %v4394_v19, %v4394_v19  ;;  %v4519_v7 = vrot.slane %v4394_v19, %v7869_v61  ;;  %v4725_v42 = vmax.f32 %v4709_v17, 0.0  ;;  %v5000_v51 = vld [vmem:[%s9773_s5 + $0x1c0] sm:$0xff] }
 0x4ee   : > { %v4793_v32 = vrot.slane %v4731_v63, %v7905_v43  ;;  %v4705_v18 = vmax.f32 %v4545_v12, %v6100_v29  ;;  %v4765_v0 = vrot.slane %v9246_v5, %v7905_v43  ;;  %v4818_v26 = vsel %vm9866_vm2, %v4761_v57, %v4757_v9  ;;  %v4958_v63 = vld [vmem:[%s9773_s5 + $0x70] sm:$0xff]  ;;  %v4984_v29 = vld [vmem:[%s9773_s5 + $0x140] sm:$0xff] }
 0x4ef   : > { %v4526_v38 = vrot.slane %v4512_v52, %v7869_v61  ;;  %v4527_v15 = vcombine.high %v4519_v7, %v4519_v7  ;;  %v6081_v8 = vrot.slane %v4519_v7, 9  ;;  %v4769_v27 = vrot.slane %v4725_v42, %v7905_v43  ;;  %v4985_v52 = vld [vmem:[%s9773_s5 + $0x148] sm:$0xff] }
 0x4f0   : > { %v4819_v60 = vsel %vm3771_vm4, %v4765_v0, %v4818_v26  ;;  %v4729_v59 = vmax.f32 %v4713_v28, 0.0  ;;  %v4781_v24 = vrot.slane %v9261_v4, %v7905_v43  ;;  %v4821_v37 = vsel %vm9867_vm7, %v4777_v46, %v4773_v49  ;;  %v4974_v49 = vld [vmem:[%s9773_s5 + $0xf0] sm:$0xff] }
 0x4f1   : > { %v4528_v40 = vcombine.high %v4526_v38, %v4526_v38  ;;  %v6082_v17 = vrot.slane %v4527_v15, 9  ;;  %v6083_v5 = vrot.slane %v4526_v38, 9  ;;  %v4638_v41 = vmax.f32 %v4519_v7, %v6081_v8  ;;  %v5002_v7 = vld [vmem:[%s9773_s5 + $0x1d0] sm:$0xff] }
 0x4f2   : > { %v4820_v22 = vsel %vm3773_vm5, %v4769_v27, %v4819_v60  ;;  %v4785_v34 = vrot.slane %v4729_v59, %v7905_v43  ;;  %v4733_v21 = vmax.f32 %v4717_v55, 0.0  ;;  %v4789_v28 = vrot.slane %v4730_v30, %v7905_v43  ;;  %v4987_v60 = vld [vmem:[%s9773_s5 + $0x158] sm:$0xff]  ;;  %v5008_v59 = vld [vmem:[%s9773_s5 + $0x200] sm:$0xff] }
 0x4f3   : > { %v6084_v9 = vrot.slane %v4528_v40, 9  ;;  %v4639_v57 = vmax.f32 %v4527_v15, %v6082_v17  ;;  %v4640_v53 = vmax.f32 %v4526_v38, %v6083_v5  ;;  %v4718_v31 = vmax.f32 %v4638_v41, %v4702_v11  ;;  %v4986_v15 = vld [vmem:[%s9773_s5 + $0x150] sm:$0xff]  ;;  %v5004_v41 = vld [vmem:[%s9773_s5 + $0x1e0] sm:$0xff] }
 0x4f4   : > { %v4830_v20 = vrot.slane %v4820_v22, 7  ;;  %v4822_v4 = vsel %vm3771_vm4, %v4781_v24, %v4821_v37  ;;  %v4797_v47 = vrot.slane %v4732_v58, %v7905_v43  ;;  %v4801_v23 = vrot.slane %v4733_v21, %v7905_v43  ;;  %v4959_v58 = vld [vmem:[%s9773_s5 + $0x78] sm:$0xff]  ;;  %v5009_v24 = vld [vmem:[%s9773_s5 + $0x208] sm:$0xff] }
 0x4f5   : > { %v4641_v39 = vmax.f32 %v4528_v40, %v6084_v9  ;;  %v4719_v25 = vmax.f32 %v4639_v57, %v4703_v45  ;;  %v4720_v6 = vmax.f32 %v4640_v53, %v4704_v35  ;;  %v4734_v48 = vmax.f32 %v4718_v31, 0.0  ;;  %v5005_v22 = vld [vmem:[%s9773_s5 + $0x1e8] sm:$0xff]  ;;  %v4988_v31 = vld [vmem:[%s9773_s5 + $0x160] sm:$0xff] }
 0x4f6   : > { %v4838_v44 = vsel %vm396_vm0, 0.0, %v4830_v20  ;;  %v4823_v3 = vsel %vm3773_vm5, %v4785_v34, %v4822_v4  ;;  %v4824_v54 = vsel %vm9868_vm14, %v4793_v32, %v4789_v28  ;;  %v6588_v1 = vpack.c.bf16 %v4975_v36, %v4974_v49  ;;  %v5003_v32 = vld [vmem:[%s9773_s5 + $0x1d8] sm:$0xff]  ;;  %v4989_v28 = vld [vmem:[%s9773_s5 + $0x168] sm:$0xff]  ;;  %v4990_v36 = vld [vmem:[%s9773_s5 + $0x170] sm:$0xff] }
 0x4f7   : > { %v4721_v16 = vmax.f32 %v4641_v39, %v4705_v18  ;;  %v4735_v19 = vmax.f32 %v4719_v25, 0.0  ;;  %v4736_v13 = vmax.f32 %v4720_v6, 0.0  ;;  %v4805_v62 = vrot.slane %v4734_v48, %v7905_v43  ;;  %v5007_v39 = vld [vmem:[%s9773_s5 + $0x1f8] sm:$0xff] }
 0x4f8   : > { %v9309_v10 = vsel %vm4842_vm1, %v4838_v44, 0.0  ;;  %v4831_v50 = vrot.slane %v4823_v3, 7  ;;  %v4825_v12 = vsel %vm3771_vm4, %v4797_v47, %v4824_v54  ;;  %6589 = vmatprep.subr.bf16.mxu0 %v6588_v1  ;;  %v6608_v35 = vpack.c.bf16 %v5001_v56, %v5000_v51  ;;  %v5006_v47 = vld [vmem:[%s9773_s5 + $0x1f0] sm:$0xff]  ;;  %v4991_v44 = vld [vmem:[%s9773_s5 + $0x178] sm:$0xff] }
 0x4f9   : > { %v4737_v46 = vmax.f32 %v4721_v16, 0.0  ;;  %v4809_v55 = vrot.slane %v4735_v19, %v7905_v43  ;;  %v4813_v30 = vrot.slane %v4736_v13, %v7905_v43  ;;  %4877 = vrot.lane.b32.xlu1 %v9309_v10, %s6908_s17  ;;  %v4853_v33 = vrot.slane %v9309_v10, 1  ;;  %v4857_v13 = vpop.permute.xlu1 %4856 }
 0x4fa   : > { %v4839_v11 = vsel %vm396_vm0, 0.0, %v4831_v50  ;;  %v4826_v45 = vsel %vm3773_vm5, %v4801_v23, %v4825_v12  ;;  %v4869_v0 = vrot.slane %v9309_v10, 2  ;;  %6609 = vmatprep.subr.bf16.mxu1 %v6608_v35  ;;  %v6590_v27 = vpack.c.bf16 %v4959_v58, %v4958_v63 }
 0x4fb   : > { %v4817_v18 = vrot.slane %v4737_v46, %v7905_v43  ;;  %v4827_v42 = vsel %vm9869_vm6, %v4809_v55, %v4805_v62  ;;  %4858 = vrot.lane.b32.xlu0 %v4853_v33, %s6908_s17  ;;  %v4832_v38 = vrot.slane %v4826_v45, 7  ;;  %v9347_v8 = vsel %vm4842_vm1, %v4839_v11, 0.0  ;;  %v5010_v55 = vld [vmem:[%s9773_s5 + $0x210] sm:$0xff] }
 0x4fc   : > { %v4828_v26 = vsel %vm3771_vm4, %v4813_v30, %v4827_v42  ;;  %v6610_v17 = vpack.c.bf16 %v4985_v52, %v4984_v29  ;;  %v6612_v5 = vpack.c.bf16 %v5003_v32, %v5002_v7  ;;  %6591 = vmatpush3.bf16.msra.mxu0 %v6590_v27  ;;  %v4854_v37 = vrot.slane %v9347_v8, 1  ;;  %v5011_v30 = vld [vmem:[%s9773_s5 + $0x218] sm:$0xff]  ;;  %v5012_v52 = vld [vmem:[%s9773_s5 + $0x220] sm:$0xff]  ;;  %v5013_v7 = vld [vmem:[%s9773_s5 + $0x228] sm:$0xff] }
 0x4fd   : > { %4895 = vrot.lane.b32.xlu1 %v4869_v0, %s6908_s17  ;;  %v4829_v40 = vsel %vm3773_vm5, %v4817_v18, %v4828_v26  ;;  %v4840_v21 = vsel %vm396_vm0, 0.0, %v4832_v38  ;;  %v6614_v9 = vpack.c.bf16 %v4987_v60, %v4986_v15  ;;  %v6624_v57 = vpack.c.bf16 %v5009_v24, %v5008_v59  ;;  %v5014_v38 = vld [vmem:[%s9773_s5 + $0x230] sm:$0xff]  ;;  %v5015_v15 = vld [vmem:[%s9773_s5 + $0x238] sm:$0xff]  ;;  %vm9871_vm5 = vmmov %vm9866_vm2 }
 0x4fe   : > { %v4833_v34 = vrot.slane %v4829_v40, 7  ;;  %6611 = vmatpush3.bf16.msra.mxu1 %v6610_v17  ;;  %v6616_v53 = vpack.c.bf16 %v5005_v22, %v5004_v41  ;;  %v9383_v20 = vrot.slane %v9347_v8, 2  ;;  %v9393_v25 = vsel %vm4842_vm1, %v4840_v21, 0.0 }
 0x4ff   : > { %4879 = vrot.lane.b32.xlu0 %v9347_v8, %s6908_s17  ;;  %6613 = vmatprep.subr.bf16.mxu1 %v6612_v5  ;;  %v6618_v6 = vpack.c.bf16 %v4989_v28, %v4988_v31  ;;  %v6620_v49 = vpack.c.bf16 %v5007_v39, %v5006_v47  ;;  %v4855_v3 = vrot.slane %v9393_v25, 1  ;;  %v6622_v54 = vpack.c.bf16 %v4991_v44, %v4990_v36  ;;  %v5498_v47 = vld [vmem:[%s9775_s7 + $0x88] sm:$0xff]  ;;  %v5481_v39 = vld [vmem:[%s9775_s7] sm:$0xff]  ;;  %v5483_v44 = vld [vmem:[%s9775_s7 + $0x10] sm:$0xff] }
 0x500   : > { %v4841_v4 = vsel %vm396_vm0, 0.0, %v4833_v34  ;;  %6625 = vmatprep.subr.bf16.mxu0 %v6624_v57  ;;  %v4871_v19 = vrot.slane %v9393_v25, 2  ;;  %v4868_v50 = vrot.slane %v9079_v14, 2  ;;  %v4910_v12 = vsel %vm4091_vm8, %v9079_v14, %v4857_v13 }
 0x501   : > { %4860 = vrot.lane.b32.xlu1 %v4854_v37, %s6908_s17  ;;  %v9398_v48 = vsel %vm4842_vm1, %v4841_v4, 0.0  ;;  %v6628_v45 = vpack.c.bf16 %v5011_v30, %v5010_v55  ;;  %v6632_v18 = vpack.c.bf16 %v5013_v7, %v5012_v52  ;;  %v6636_v5 = vpack.c.bf16 %v5015_v15, %v5014_v38  ;;  %v5497_v4 = vld [vmem:[%s9775_s7 + $0x80] sm:$0xff]  ;;  %v5531_v55 = vld [vmem:[%s9775_s7 + $0x190] sm:$0xff]  ;;  %v5532_v30 = vld [vmem:[%s9775_s7 + $0x198] sm:$0xff] }
 0x502   : > { %6615 = vmatpush3.bf16.msra.mxu1 %v6614_v9  ;;  %v4889_v23 = vrot.slane %v9398_v48, 1  ;;  %v4894_v16 = vrot.slane %v9398_v48, 2  ;;  %v5027_v21 = vcombine.low %v9383_v20, %v4871_v19  ;;  %vm9870_vm4 = vcmask 1042432   ;;  %v5533_v52 = vld [vmem:[%s9775_s7 + $0x1a0] sm:$0xff]  ;;  %v5534_v7 = vld [vmem:[%s9775_s7 + $0x1a8] sm:$0xff] }
 0x503   : > { %4897 = vrot.lane.b32.xlu0 %v9383_v20, %s6908_s17  ;;  %6617 = vmatprep.subr.bf16.mxu1 %v6616_v53  ;;  %v9479_v28 = vsel %vm9870_vm4, %v6978_v2, 0.0  ;;  %v5482_v2 = vld [vmem:[%s9775_s7 + $0x8] sm:$0xff]  ;;  %v6680_v38 = vpack.c.bf16 %v5534_v7, %v5533_v52  ;;  %vm9873_vm10 = vmmov %vm9870_vm4 }
 0x504   : > { %v5032_v31 = vcombine.low %v4894_v16, %v4868_v50  ;;  %v5518_v15 = vld [vmem:[%s9775_s7 + $0x128] sm:$0xff]  ;;  %vm9874_vm11 = vmmov %vm9870_vm4 }
 0x505   : > { %4881 = vrot.lane.b32.xlu1 %v9393_v25, %s6908_s17 }
 0x506   : > { %6619 = vmatpush3.bf16.msra.mxu1 %v6618_v6  ;;  %v5499_v6 = vld [vmem:[%s9775_s7 + $0x90] sm:$0xff] }
 0x507   : > { %4862 = vrot.lane.b32.xlu0 %v4855_v3, %s6908_s17  ;;  %6621 = vmatprep.subr.bf16.mxu1 %v6620_v49  ;;  %v6642_v49 = vpack.c.bf16 %v5482_v2, %v5481_v39 }
 0x509   : > { %4907 = vrot.lane.b32.xlu1 %v4889_v23, %s6908_s17 }
 0x50a   : > { %6623 = vmatpush3.bf16.msra.mxu1 %v6622_v54  ;;  %v5530_v54 = vld [vmem:[%s9775_s7 + $0x188] sm:$0xff] }
 0x50b   : > { %4883 = vrot.lane.b32.xlu0 %v9398_v48, %s6908_s17 }
 0x50d   : > { %4901 = vrot.lane.b32.xlu1 %v4894_v16, %s6908_s17  ;;  %v5513_v16 = vld [vmem:[%s9775_s7 + $0x100] sm:$0xff] }
 0x50f   : > { %4899 = vrot.lane.b32.xlu0 %v4871_v19, %s6908_s17 }
 0x56b   : > { %v4878_v62 = vpop.permute.xlu1 %4877 }
 0x56c   : > { %v4914_v63 = vsel %vm4091_vm8, %v4868_v50, %v4878_v62  ;;  %v5502_v50 = vld [vmem:[%s9775_s7 + $0xa8] sm:$0xff] }
 0x56d   : > { %v4859_v51 = vpop.permute.xlu0 %4858 }
 0x56e   : > { %v4911_v1 = vsel %vm4091_vm8, %v9309_v10, %v4859_v51 }
 0x56f   : > { %v4896_v56 = vpop.permute.xlu1 %4895  ;;  %v6102_v11 = vcombine.low %v4910_v12, %v4911_v1 }
 0x570   : > { %v4918_v60 = vsel %vm4091_vm8, %v4853_v33, %v4896_v56  ;;  %v5501_v56 = vld [vmem:[%s9775_s7 + $0xa0] sm:$0xff] }
 0x571   : > { %v4880_v46 = vpop.permute.xlu0 %4879  ;;  %v6648_v1 = vpack.c.bf16 %v5502_v50, %v5501_v56 }
 0x572   : > { %v4915_v58 = vsel %vm4091_vm8, %v4869_v0, %v4880_v46  ;;  %v5486_v46 = vld [vmem:[%s9775_s7 + $0x28] sm:$0xff] }
 0x573   : > { %v6103_v29 = vcombine.low %v4914_v63, %v4915_v58  ;;  %v4861_v14 = vpop.permute.xlu1 %4860  ;;  %v6676_v63 = vpack.c.bf16 %v5532_v30, %v5531_v55  ;;  %v5515_v58 = vld [vmem:[%s9775_s7 + $0x110] sm:$0xff] }
 0x574   : > { %v4912_v26 = vsel %vm4091_vm8, %v9347_v8, %v4861_v14  ;;  %v5503_v14 = vld [vmem:[%s9775_s7 + $0xb0] sm:$0xff] }
 0x575   : > { %5109 = vmatprep.mubr.f32.mxu0 %v6103_v29  ;;  %v4898_v35 = vpop.permute.xlu0 %4897  ;;  %v5516_v29 = vld [vmem:[%s9775_s7 + $0x118] sm:$0xff] }
 0x576   : > { %5110 = vmatmul.mubr.f32.vlgmr.msra.gmra.mrb[32].mxu0 %v6102_v11  ;;  %v4919_v42 = vsel %vm4091_vm8, %v4854_v37, %v4898_v35  ;;  %v6678_v11 = vpack.c.bf16 %v5516_v29, %v5515_v58  ;;  %v5489_v29 = vld [vmem:[%s9775_s7 + $0x40] sm:$0xff] }
 0x577   : > { %v4882_v32 = vpop.permute.xlu1 %4881  ;;  %6627 = vmatpush3.bf16.msra.mxu0 %v6624_v57  ;;  %v6104_v40 = vcombine.low %v4918_v60, %v4919_v42  ;;  %v5487_v42 = vld [vmem:[%s9775_s7 + $0x30] sm:$0xff] }
 0x578   : > { %6629 = vmatprep.subr.bf16.mxu0 %v6628_v45  ;;  %v4916_v8 = vsel %vm4091_vm8, %v9383_v20, %v4882_v32  ;;  %v5387_v20 = vrot.slane %v9479_v28, 1  ;;  %v5517_v32 = vld [vmem:[%s9775_s7 + $0x120] sm:$0xff] }
 0x579   : > { %v4863_v0 = vpop.permute.xlu0 %4862 }
 0x57a   : > { %v4913_v27 = vsel %vm4091_vm8, %v9393_v25, %v4863_v0  ;;  %5389 = vrot.lane.b32.xlu0 %v5387_v20, %s6908_s17  ;;  %v6640_v25 = vpack.c.bf16 %v5498_v47, %v5497_v4  ;;  %v5488_v0 = vld [vmem:[%s9775_s7 + $0x38] sm:$0xff] }
 0x57b   : > { %v6105_v59 = vcombine.low %v4912_v26, %v4913_v27  ;;  %6631 = vmatpush3.bf16.msra.mxu0 %v6628_v45  ;;  %v4908_v24 = vpop.permute.xlu1 %4907  ;;  %v5504_v45 = vld [vmem:[%s9775_s7 + $0xb8] sm:$0xff]  ;;  %v6682_v26 = vpack.c.bf16 %v5518_v15, %v5517_v32  ;;  %v6654_v27 = vpack.c.bf16 %v5488_v0, %v5487_v42 }
 0x57c   : > { %v4922_v17 = vsel %vm4091_vm8, %v9398_v48, %v4908_v24  ;;  %6633 = vmatprep.subr.bf16.mxu0 %v6632_v18  ;;  %v5500_v48 = vld [vmem:[%s9775_s7 + $0x98] sm:$0xff] }
 0x57d   : > { %v6109_v41 = vcombine.low %v4922_v17, %v4910_v12  ;;  %5184 = vmatprep.mubr.f32.mxu1 %v6105_v59  ;;  %v4884_v22 = vpop.permute.xlu0 %4883  ;;  %v6644_v36 = vpack.c.bf16 %v5500_v48, %v5499_v6  ;;  %v5485_v12 = vld [vmem:[%s9775_s7 + $0x20] sm:$0xff]  ;;  %v5536_v32 = vld [vmem:[%s9775_s7 + $0x1b8] sm:$0xff] }
 0x57e   : > { %v4917_v34 = vsel %vm4091_vm8, %v4871_v19, %v4884_v22  ;;  %5185 = vmatmul.mubr.f32.vlgmr.msra.gmra.mrb[24].mxu1 %v6104_v40  ;;  %v5514_v19 = vld [vmem:[%s9775_s7 + $0x108] sm:$0xff]  ;;  %v6650_v35 = vpack.c.bf16 %v5486_v46, %v5485_v12  ;;  %v6101_v40 = vld [vmem:[%s9774_s6] ss:$0 sm:$0xff]  ;;  %v5520_v42 = vld [vmem:[%s9775_s7 + $0x138] sm:$0xff] }
 0x57f   : > { %v6107_v10 = vcombine.low %v4916_v8, %v4917_v34  ;;  %5189 = vmatprep.mubr.f32.mxu1 %v6109_v41  ;;  %6635 = vmatpush3.bf16.msra.mxu0 %v6632_v18  ;;  %v4902_v33 = vpop.permute.xlu1 %4901  ;;  %v6674_v51 = vpack.c.bf16 %v5514_v19, %v5513_v16  ;;  %v6652_v18 = vpack.c.bf16 %v5504_v45, %v5503_v14  ;;  %v5506_v46 = vld [vmem:[%s9775_s7 + $0xc8] sm:$0xff] }
 0x580   : > { %6637 = vmatprep.subr.bf16.mxu0 %v6636_v5  ;;  %v4921_v9 = vsel %vm4091_vm8, %v4889_v23, %v4902_v33  ;;  %v5529_v23 = vld [vmem:[%s9775_s7 + $0x180] sm:$0xff]  ;;  %v5490_v14 = vld [vmem:[%s9775_s7 + $0x48] sm:$0xff] }
 0x581   : > { %5114 = vmatprep.mubr.f32.mxu0 %v6107_v10  ;;  %v4900_v37 = vpop.permute.xlu0 %4899  ;;  %v6672_v62 = vpack.c.bf16 %v5530_v54, %v5529_v23  ;;  %v6658_v7 = vpack.c.bf16 %v5490_v14, %v5489_v29  ;;  %v5542_v14 = vld [vmem:[%s9775_s7 + $0x1e8] sm:$0xff] }
 0x582   : > { %v4920_v57 = vsel %vm4091_vm8, %v4855_v3, %v4900_v37  ;;  %5115 = vmatmul.mubr.f32.gmra.mrb[34].mxu0 %v6105_v59  ;;  %v5484_v3 = vld [vmem:[%s9775_s7 + $0x18] sm:$0xff] }
 0x583   : > { %v6108_v53 = vcombine.low %v4920_v57, %v4921_v9  ;;  %6639 = vmatpush3.bf16.msra.mxu0 %v6636_v5  ;;  %6488 = vmatprep.mubr.msk.f32.mxu0 %vm4091_vm8, %v5027_v21  ;;  %v6646_v13 = vpack.c.bf16 %v5484_v3, %v5483_v44 }
 0x584   : > { %6641 = vmatprep.subr.bf16.mxu0 %v6640_v25  ;;  %6673 = vmatprep.subr.bf16.mxu1 %v6672_v62 }
 0x585   : > { %5190 = vmatmul.mubr.f32.gmra.mrb[26].mxu1 %v6108_v53 }
 0x586   : > { %6489 = vmatmul.mubr.msk.f32.vlgmr.msra.gmra.mrb[36].mxu0 %vm4091_vm8, %v5032_v31  ;;  %6675 = vmatpush3.bf16.msra.mxu1 %v6674_v51 }
 0x587   : > { %6643 = vmatpush3.bf16.msra.mxu0 %v6642_v49  ;;  %6677 = vmatprep.subr.bf16.mxu1 %v6676_v63 }
 0x588   : > { %6645 = vmatprep.subr.bf16.mxu0 %v6644_v36 }
 0x58a   : > { %6679 = vmatpush3.bf16.msra.mxu1 %v6678_v11  ;;  %v5535_v11 = vld [vmem:[%s9775_s7 + $0x1b0] sm:$0xff] }
 0x58b   : > { %6647 = vmatpush3.bf16.msra.mxu0 %v6646_v13  ;;  %6681 = vmatprep.subr.bf16.mxu1 %v6680_v38  ;;  %v6684_v15 = vpack.c.bf16 %v5536_v32, %v5535_v11  ;;  %v5525_v11 = vld [vmem:[%s9775_s7 + $0x160] sm:$0xff] }
 0x58c   : > { %6649 = vmatprep.subr.bf16.mxu0 %v6648_v1  ;;  %v5505_v1 = vld [vmem:[%s9775_s7 + $0xc0] sm:$0xff] }
 0x58d   : > { %v6656_v58 = vpack.c.bf16 %v5506_v46, %v5505_v1 }
 0x58e   : > { %6683 = vmatpush3.bf16.msra.mxu1 %v6682_v26 }
 0x58f   : > { %6651 = vmatpush3.bf16.msra.mxu0 %v6650_v35  ;;  %6685 = vmatprep.subr.bf16.mxu1 %v6684_v15  ;;  %v5527_v15 = vld [vmem:[%s9775_s7 + $0x170] sm:$0xff] }
 0x590   : > { %6653 = vmatprep.subr.bf16.mxu0 %v6652_v18  ;;  %v5519_v18 = vld [vmem:[%s9775_s7 + $0x130] sm:$0xff] }
 0x591   : > { %v6686_v26 = vpack.c.bf16 %v5520_v42, %v5519_v18  ;;  %v5543_v42 = vld [vmem:[%s9775_s7 + $0x1f0] sm:$0xff] }
 0x593   : > { %6655 = vmatpush3.bf16.msra.mxu0 %v6654_v27  ;;  %6687 = vmatpush3.bf16.msra.mxu1 %v6686_v26  ;;  %v5528_v26 = vld [vmem:[%s9775_s7 + $0x178] sm:$0xff] }
 0x594   : > { %6657 = vmatprep.subr.bf16.mxu0 %v6656_v58 }
 0x597   : > { %6659 = vmatpush3.bf16.msra.mxu0 %v6658_v7 }
 0x649   : > { %v6263_v60 = vpop.f32.mrb[32].mxu0 }
 0x64a   : > { %v6264_v59 = vpop.f32.mrb[33].mxu0 }
 0x64b   : > { %v6265_v24 = vadd.f32 %v6264_v59, %v6263_v60 }
 0x64d   : > { %v5112_v41 = vadd.f32 %v6265_v24, %v6101_v40  ;;  %v5507_v24 = vld [vmem:[%s9775_s7 + $0xd0] sm:$0xff] }
 0x651   : > { %v6301_v17 = vpop.f32.mrb[24].mxu1 }
 0x652   : > { %v6302_v5 = vpop.f32.mrb[25].mxu1 }
 0x653   : > { %v6303_v22 = vadd.f32 %v6302_v5, %v6301_v17 }
 0x655   : > { %v6266_v8 = vpop.f32.mrb[34].mxu0  ;;  %v5187_v34 = vadd.f32 %v6303_v22, %v5112_v41  ;;  %v5491_v41 = vld [vmem:[%s9775_s7 + $0x50] sm:$0xff]  ;;  %v5492_v22 = vld [vmem:[%s9775_s7 + $0x58] sm:$0xff] }
 0x656   : > { %v6267_v10 = vpop.f32.mrb[35].mxu0 }
 0x657   : > { %v6268_v33 = vadd.f32 %v6267_v10, %v6266_v8  ;;  %v5537_v8 = vld [vmem:[%s9775_s7 + $0x1c0] sm:$0xff] }
 0x658   : > { %v6304_v37 = vpop.f32.mrb[26].mxu1 }
 0x659   : > { %v5117_v21 = vadd.f32 %v6268_v33, %v6101_v40  ;;  %v6305_v9 = vpop.f32.mrb[27].mxu1  ;;  %v6490_v57 = vpop.f32.mrb[36].mxu0  ;;  %v5508_v40 = vld [vmem:[%s9775_s7 + $0xd8] sm:$0xff]  ;;  %v6662_v33 = vpack.c.bf16 %v5492_v22, %v5491_v41 }
 0x65a   : > { %v6306_v53 = vadd.f32 %v6305_v9, %v6304_v37  ;;  %v5261_v31 = vpop.f32.mrb[37].mxu0  ;;  %v6660_v5 = vpack.c.bf16 %v5508_v40, %v5507_v24  ;;  %v5538_v37 = vld [vmem:[%s9775_s7 + $0x1c8] sm:$0xff]  ;;  %v5390_v40 = vpop.permute.xlu0 %5389 }
 0x65b   : > { %v5262_v20 = vadd.f32 %v5261_v31, %v5187_v34  ;;  %v5522_v9 = vld [vmem:[%s9775_s7 + $0x148] sm:$0xff]  ;;  %v6688_v31 = vpack.c.bf16 %v5538_v37, %v5537_v8  ;;  %v5419_v22 = vsel %vm4091_vm8, %v9479_v28, %v5390_v40 }
 0x65c   : > { %v5192_v4 = vadd.f32 %v6306_v53, %v5117_v21  ;;  %v5521_v21 = vld [vmem:[%s9775_s7 + $0x140] sm:$0xff]  ;;  %6661 = vmatprep.subr.bf16.mxu0 %v6660_v5  ;;  %v5395_v5 = vrot.slane %v9479_v28, 2 }
 0x65d   : > { %v5272_v47 = vcombine.high %v5262_v20, %v5262_v20  ;;  %v5279_v39 = vrot.slane %v5262_v20, %v7869_v61  ;;  %v6690_v20 = vpack.c.bf16 %v5522_v9, %v5521_v21  ;;  %6663 = vmatpush3.bf16.msra.mxu0 %v6662_v33  ;;  %6689 = vmatprep.subr.bf16.mxu1 %v6688_v31 }
 0x65e   : > { %v5267_v25 = vadd.f32 %v6490_v57, %v5192_v4 }
 0x65f   : > { %v5286_v2 = vrot.slane %v5272_v47, %v7869_v61  ;;  %v5287_v6 = vcombine.high %v5279_v39, %v5279_v39  ;;  %v6112_v48 = vrot.slane %v5279_v39, 9  ;;  %v5509_v47 = vld [vmem:[%s9775_s7 + $0xe0] sm:$0xff]  ;;  %6691 = vmatpush3.bf16.msra.mxu1 %v6690_v20 }
 0x660   : > { %v5289_v49 = vcombine.high %v5267_v25, %v5267_v25  ;;  %v5296_v36 = vrot.slane %v5267_v25, %v7869_v61 }
 0x661   : > { %v5288_v44 = vcombine.high %v5286_v2, %v5286_v2  ;;  %v6113_v3 = vrot.slane %v5287_v6, 9  ;;  %v6116_v23 = vrot.slane %v5286_v2, 9  ;;  %v5326_v13 = vmax.f32 %v5279_v39, %v6112_v48  ;;  %v5510_v39 = vld [vmem:[%s9775_s7 + $0xe8] sm:$0xff] }
 0x662   : > { %v5303_v54 = vrot.slane %v5289_v49, %v7869_v61  ;;  %v5304_v16 = vcombine.high %v5296_v36, %v5296_v36  ;;  %v6114_v19 = vrot.slane %v5296_v36, 9  ;;  %v5494_v48 = vld [vmem:[%s9775_s7 + $0x68] sm:$0xff]  ;;  %v5539_v49 = vld [vmem:[%s9775_s7 + $0x1d0] sm:$0xff] }
 0x663   : > { %v6117_v62 = vrot.slane %v5288_v44, 9  ;;  %v5342_v51 = vmax.f32 %v5286_v2, %v6116_v23  ;;  %v5327_v55 = vmax.f32 %v5287_v6, %v6113_v3  ;;  %v6664_v2 = vpack.c.bf16 %v5510_v39, %v5509_v47  ;;  %v5493_v6 = vld [vmem:[%s9775_s7 + $0x60] sm:$0xff] }
 0x664   : > { %v5305_v56 = vcombine.high %v5303_v54, %v5303_v54  ;;  %v6115_v50 = vrot.slane %v5304_v16, 9  ;;  %v6118_v12 = vrot.slane %v5303_v54, 9  ;;  %v5328_v45 = vmax.f32 %v5296_v36, %v6114_v19  ;;  %v5524_v19 = vld [vmem:[%s9775_s7 + $0x158] sm:$0xff] }
 0x665   : > { %v5343_v30 = vmax.f32 %v5288_v44, %v6117_v62  ;;  %v5346_v63 = vmax.f32 %v5326_v13, %v5342_v51  ;;  %v6666_v23 = vpack.c.bf16 %v5494_v48, %v5493_v6  ;;  %6665 = vmatprep.subr.bf16.mxu0 %v6664_v2  ;;  %v5545_v6 = vld [vmem:[%s9775_s7 + $0x200] sm:$0xff]  ;;  %v5546_v48 = vld [vmem:[%s9775_s7 + $0x208] sm:$0xff] }
 0x666   : > { %v6119_v35 = vrot.slane %v5305_v56, 9  ;;  %v5344_v52 = vmax.f32 %v5303_v54, %v6118_v12  ;;  %v5329_v27 = vmax.f32 %v5304_v16, %v6115_v50  ;;  %v5540_v54 = vld [vmem:[%s9775_s7 + $0x1d8] sm:$0xff]  ;;  %v5523_v16 = vld [vmem:[%s9775_s7 + $0x150] sm:$0xff] }
 0x667   : > { %v5347_v0 = vmax.f32 %v5327_v55, %v5343_v30  ;;  %v5350_v38 = vmax.f32 %v5346_v63, 0.0  ;;  %v6692_v13 = vpack.c.bf16 %v5540_v54, %v5539_v49  ;;  %v6694_v62 = vpack.c.bf16 %v5524_v19, %v5523_v16  ;;  %6667 = vmatpush3.bf16.msra.mxu0 %v6666_v23  ;;  %v5512_v50 = vld [vmem:[%s9775_s7 + $0xf8] sm:$0xff]  ;;  %v5495_v55 = vld [vmem:[%s9775_s7 + $0x70] sm:$0xff]  ;;  %v5541_v63 = vld [vmem:[%s9775_s7 + $0x1e0] sm:$0xff] }
 0x668   : > { %v5345_v60 = vmax.f32 %v5305_v56, %v6119_v35  ;;  %v5348_v59 = vmax.f32 %v5328_v45, %v5344_v52  ;;  %v5511_v56 = vld [vmem:[%s9775_s7 + $0xf0] sm:$0xff]  ;;  %v5496_v30 = vld [vmem:[%s9775_s7 + $0x78] sm:$0xff]  ;;  %v5526_v45 = vld [vmem:[%s9775_s7 + $0x168] sm:$0xff]  ;;  %v6696_v52 = vpack.c.bf16 %v5542_v14, %v5541_v63  ;;  %v6705_v54 = vpack.c.bf16 %v5546_v48, %v5545_v6 }
 0x669   : > { %v5351_v17 = vmax.f32 %v5347_v0, 0.0  ;;  %v5361_v57 = vrot.slane %v5350_v38, %v7905_v43  ;;  %6693 = vmatprep.subr.bf16.mxu1 %v6692_v13  ;;  %v6668_v46 = vpack.c.bf16 %v5512_v50, %v5511_v56  ;;  %v6670_v29 = vpack.c.bf16 %v5496_v30, %v5495_v55  ;;  %v5544_v0 = vld [vmem:[%s9775_s7 + $0x1f8] sm:$0xff]  ;;  %v5547_v16 = vld [vmem:[%s9775_s7 + $0x210] sm:$0xff]  ;;  %v5549_v56 = vld [vmem:[%s9775_s7 + $0x220] sm:$0xff] }
 0x66a   : > { %v5349_v34 = vmax.f32 %v5329_v27, %v5345_v60  ;;  %v5352_v10 = vmax.f32 %v5348_v59, 0.0  ;;  %6695 = vmatpush3.bf16.msra.mxu1 %v6694_v62  ;;  %v6698_v7 = vpack.c.bf16 %v5526_v45, %v5525_v11  ;;  %v6700_v38 = vpack.c.bf16 %v5544_v0, %v5543_v42  ;;  %v5548_v19 = vld [vmem:[%s9775_s7 + $0x218] sm:$0xff]  ;;  %v5550_v50 = vld [vmem:[%s9775_s7 + $0x228] sm:$0xff]  ;;  %v5551_v55 = vld [vmem:[%s9775_s7 + $0x230] sm:$0xff] }
 0x66b   : > { %v5365_v53 = vrot.slane %v5351_v17, %v7905_v43  ;;  %6669 = vmatprep.subr.bf16.mxu0 %v6668_v46  ;;  %6697 = vmatprep.subr.bf16.mxu1 %v6696_v52  ;;  %v6910_v27 = vmov 0.0|0.0   ;;  %v6702_v60 = vpack.c.bf16 %v5528_v26, %v5527_v15  ;;  %v5480_v46 = vrot.slane %v5395_v5, %v7869_v61  ;;  %v5552_v30 = vld [vmem:[%s9775_s7 + $0x238] sm:$0xff] }
 0x66c   : > { %v5353_v4 = vmax.f32 %v5349_v34, 0.0  ;;  %v5369_v44 = vrot.slane %v5352_v10, %v7905_v43  ;;  %6671 = vmatpush3.bf16.msra.mxu0 %v6670_v29  ;;  %v6714_v63 = vpack.c.bf16 %v5552_v30, %v5551_v55  ;;  %v6912_v0 = vmov 1934713408  }
 0x66d   : > { %v5374_v25 = vsel %vm9871_vm5, %v5365_v53, %v5361_v57  ;;  %6704 = vmatprep.subr.bf16.mxu0 %v6910_v27 }
 0x66e   : > { %v5376_v36 = vrot.slane %v5374_v25, 7  ;;  %v5373_v3 = vrot.slane %v5353_v4, %v7905_v43  ;;  %6699 = vmatpush3.bf16.msra.mxu1 %v6698_v7 }
 0x66f   : > { %6701 = vmatprep.subr.bf16.mxu1 %v6700_v38  ;;  %v5817_v38 = vunpack.c.l.s4 %v6912_v0 }
 0x670   : > { %v5380_v51 = vsel %vm396_vm0, 0.0, %v5376_v36  ;;  %v5375_v43 = vsel %vm9872_vm9, %v5373_v3, %v5369_v44 }
 0x671   : > { %v5383_v12 = vsel %vm9873_vm10, %v5380_v51, 0.0  ;;  %v5377_v1 = vrot.slane %v5375_v43, 7  ;;  %v6708_v51 = vpack.c.bf16 %v5548_v19, %v5547_v16  ;;  %v9875_v43 = vmov 0.0  }
 0x672   : > { %5400 = vrot.lane.b32.xlu0 %v5383_v12, %s6908_s17  ;;  %v5388_v58 = vrot.slane %v5383_v12, 1  ;;  %v5396_v32 = vrot.slane %v5383_v12, 2  ;;  %6703 = vmatpush3.bf16.msra.mxu1 %v6702_v60 }
 0x673   : > { %v5381_v35 = vsel %vm396_vm0, 0.0, %v5377_v1  ;;  %vm6911_vm0 = vmmov 0  }
 0x674   : > { %5391 = vrot.lane.b32.xlu1 %v5388_v58, %s6908_s17  ;;  %v9682_v18 = vsel %vm9874_vm11, %v5381_v35, 0.0  ;;  %v6120_v35 = vld [vmem:[%s9776_s8] ss:$0 sm:$0xff] }
 0x675   : > { %v5406_v59 = vrot.slane %v9682_v18, 1  ;;  %v5409_v24 = vrot.slane %v9682_v18, 2 }
 0x676   : > { %5410 = vrot.lane.b32.xlu0 %v5396_v32, %s6908_s17 }
 0x677   : > { %v5456_v1 = vrot.slane %v5409_v24, %v7869_v61 }
 0x678   : > { %5402 = vrot.lane.b32.xlu1 %v9682_v18, %s6908_s17 }
 0x67a   : > { %5416 = vrot.lane.b32.xlu0 %v5406_v59, %s6908_s17 }
 0x67c   : > { %5412 = vrot.lane.b32.xlu1 %v5409_v24, %s6908_s17 }
 0x6e4   : > { %v5401_v17 = vpop.permute.xlu0 %5400 }
 0x6e5   : > { %v5421_v8 = vsel %vm4091_vm8, %v5395_v5, %v5401_v17  ;;  %v9876_v5 = vld [vmem:[#allocation6_spill] sm:$0xff] }
 0x6e6   : > { %v5392_v41 = vpop.permute.xlu1 %5391  ;;  %v5433_v10 = vcombine.low %v5419_v22, %v5421_v8 }
 0x6e7   : > { %v5420_v37 = vsel %vm4091_vm8, %v5383_v12, %v5392_v41  ;;  %v6711_v12 = vpack.c.bf16 %v5550_v50, %v5549_v56 }
 0x6e8   : > { %v5411_v34 = vpop.permute.xlu0 %5410  ;;  %v5441_v20 = vrot.slane %v5433_v10, %v7869_v61 }
 0x6e9   : > { %v5423_v53 = vsel %vm4091_vm8, %v5388_v58, %v5411_v34  ;;  %v5578_v58 = vcombine.low %v5456_v1, %v5480_v46 }
 0x6ea   : > { %v5403_v33 = vpop.permute.xlu1 %5402 }
 0x6eb   : > { %v5422_v21 = vsel %vm4091_vm8, %v5396_v32, %v5403_v33  ;;  %v5585_v29 = vrot.slane %v5578_v58, %v7869_v61 }
 0x6ec   : > { %v5457_v9 = vcombine.low %v5420_v37, %v5422_v21  ;;  %v5417_v57 = vpop.permute.xlu0 %5416 }
 0x6ed   : > { %v5425_v31 = vsel %vm4091_vm8, %v9682_v18, %v5417_v57 }
 0x6ee   : > { %v5465_v28 = vrot.slane %v5457_v9, %v7869_v61  ;;  %v5434_v4 = vcombine.low %v5423_v53, %v5425_v31  ;;  %v5413_v47 = vpop.permute.xlu1 %5412 }
 0x6ef   : > { %v5424_v39 = vsel %vm4091_vm8, %v5406_v59, %v5413_v47  ;;  %v5818_v59 = vunpack.c.0.s8 %v5817_v38 }
 0x6f0   : > { %v6121_v25 = vcombine.low %v5441_v20, %v5465_v28  ;;  %v5458_v2 = vcombine.low %v5424_v39, %v5419_v22  ;;  %v5448_v49 = vrot.slane %v5434_v4, %v7869_v61 }
 0x6f1   : > { %v5821_v41 = vsub.s32 %v5818_v59, %v9876_v5 }
 0x6f2   : > { %v5472_v36 = vrot.slane %v5458_v2, %v7869_v61  ;;  %v5568_v44 = vrot.slane %v6121_v25, %v7869_v61 }
 0x6f4   : > { %v6122_v3 = vcombine.low %v5448_v49, %v5472_v36  ;;  %v5576_v23 = vcombine.high %v5568_v44, %v5568_v44 }
 0x6f6   : > { %5656 = vmatprep.mubr.f32.mxu0 %v5576_v23  ;;  %v5575_v13 = vrot.slane %v6122_v3, %v7869_v61 }
 0x6f7   : > { %5657 = vmatmul.mubr.f32.vlgmr.msra.gmra.mrb[38].mxu0 %v5568_v44 }
 0x6f8   : > { %6706 = vmatpush3.bf16.msra.mxu0 %v6705_v54  ;;  %v5577_v62 = vcombine.high %v5575_v13, %v5575_v13  ;;  %6507 = vmatprep.mubr.msk.f32.mxu0 %vm6911_vm0, %v9875_v43 }
 0x6f9   : > { %6707 = vmatprep.subr.bf16.mxu0 %v6910_v27 }
 0x6fa   : > { %5726 = vmatprep.mubr.f32.mxu1 %v5577_v62 }
 0x6fb   : > { %5727 = vmatmul.mubr.f32.vlgmr.msra.gmra.mrb[28].mxu1 %v5575_v13 }
 0x6fc   : > { %6709 = vmatpush3.bf16.msra.mxu0 %v6708_v51 }
 0x6fd   : > { %6710 = vmatprep.subr.bf16.mxu0 %v6910_v27 }
 0x700   : > { %6712 = vmatpush3.bf16.msra.mxu0 %v6711_v12 }
 0x701   : > { %6713 = vmatprep.subr.bf16.mxu0 %v6910_v27 }
 0x704   : > { %6715 = vmatpush3.bf16.msra.mxu0 %v6714_v63 }
 0x707   : > { %6508 = vmatmul.mubr.msk.f32.vlgmr.msra.gmra.mrb[40].mxu0 %vm4091_vm8, %v5585_v29 }
 0x7ca   : > { %v6349_v14 = vpop.f32.mrb[38].mxu0 }
 0x7cb   : > { %v6350_v11 = vpop.f32.mrb[39].mxu0 }
 0x7cc   : > { %v6351_v45 = vadd.f32 %v6350_v11, %v6349_v14 }
 0x7ce   : > { %v6384_v52 = vpop.f32.mrb[28].mxu1  ;;  %v5659_v32 = vadd.f32 %v6351_v45, %v6120_v35 }
 0x7cf   : > { %v6385_v7 = vpop.f32.mrb[29].mxu1 }
 0x7d0   : > { %v6386_v18 = vadd.f32 %v6385_v7, %v6384_v52 }
 0x7d2   : > { %v5729_v42 = vadd.f32 %v6386_v18, %v5659_v32 }
 0x7da   : > { %v5798_v15 = vpop.f32.mrb[40].mxu0 }
 0x7db   : > { %v5799_v26 = vadd.f32 %v5798_v15, %v5729_v42  ;;  %v6509_v27 = vpop.f32.mrb[41].mxu0 }
 0x7dd   : > { %v5809_v60 = vrot.slane %v5799_v26, %v7869_v61 }
 0x7df   : > { %v5810_v24 = vcombine.high %v5809_v60, %v5809_v60  ;;  %v5813_v40 = vmax.f32 %v5809_v60, 0.0 }
 0x7e1   : > { %v5814_v17 = vmax.f32 %v5810_v24, 0.0 }
 0x7e3   : > { %v5815_v22 = vcombine.low %v5813_v40, %v5814_v17 }
 0x7e5   : > { %v5822_v8 = vrot.slane %v5815_v22, %v5821_v41 }
 0x7e7   : > { %v5823_v34 = vcombine.high %v5822_v8, %v9875_v43 }
 0x7e9   : > { %v5831_v10 = vrot.slane %v5823_v34, %v7869_v61 }
 0x7eb   : > { %5832 = vrot.lane.b32.xlu1 %v5831_v10, %s6908_s17 }
 0x85d   : > { %v5833_v33 = vpop.permute.xlu1 %5832 }
 0x85e   : > { %v5835_v37 = vsel %vm4091_vm8, %v5822_v8, %v5833_v33 }
 0x85f   : > { %5836 = vst [vmem:[%s330_s24] sm:$0x3] %v5835_v37 }
 0x860 PF: > { %s19_s30 = sadd.s32 1, %s6894_s30  }
 0x861   : > { %p16_p4 = scmp.ge.s32.totalorder %s19_s30, 4  }
 0x863   :  { %18 = sbr.rel (!%p16_p4) target bundleno = 1 (0x1), region = 86 }

</bundles_post_ra>
